<compile_context>
chip_gen: v6e
topology: v6e:2x2x1
jax: 0.10.0
libtpu: 0.0.40
codegen_flags: <defaults>
</compile_context>

<pallas_src>
import functools

import jax
import jax.numpy as jnp
import numpy as np
from jax.experimental import pallas as pl
from jax.experimental.pallas import tpu as pltpu


# ----------------------------------------------------------------------------
# 0/1 gather matrices: g[k, m_out, m_in] = 1  <=>  output pixel m_out receives
# input pixel m_in through kernel tap k = ki*3 + kj   (one image, row-major).
# ----------------------------------------------------------------------------
def _conv_gather(hin, win, hout, wout, stride, pad):
    g = np.zeros((9, hout * wout, hin * win), np.float32)
    for oh in range(hout):
        for ow in range(wout):
            mo = oh * wout + ow
            for ki in range(3):
                for kj in range(3):
                    ih = oh * stride + ki - pad
                    iw = ow * stride + kj - pad
                    if 0 <= ih < hin and 0 <= iw < win:
                        g[ki * 3 + kj, mo, ih * win + iw] = 1.0
    return g


def _convT_gather(hin, win, hout, wout, stride, pad):
    g = np.zeros((9, hout * wout, hin * win), np.float32)
    for ih in range(hin):
        for iw in range(win):
            mi = ih * win + iw
            for ki in range(3):
                for kj in range(3):
                    oh = ih * stride - pad + ki
                    ow = iw * stride - pad + kj
                    if 0 <= oh < hout and 0 <= ow < wout:
                        g[ki * 3 + kj, oh * wout + ow, mi] = 1.0
    return g


def _stack_gather_weight_first(g, b):
    # (9, Mo, Mi) -> (b*Mo, 9*b*Mi), matching T_cat = row-concat over taps of the
    # batched activation (row order inside each tap chunk: image-major, pixel-minor).
    nk, mo, mi = g.shape
    out = np.zeros((b * mo, nk * b * mi), np.float32)
    for k in range(nk):
        for img in range(b):
            out[img * mo:(img + 1) * mo,
                k * b * mi + img * mi:k * b * mi + (img + 1) * mi] = g[k]
    return out


def _blockdiag_gather(g, b):
    # (9, Mo, Mi) -> (9, b*Mo, b*Mi): per-tap block-diagonal over the image block.
    nk, mo, mi = g.shape
    out = np.zeros((nk, b * mo, b * mi), np.float32)
    for k in range(nk):
        for img in range(b):
            out[k, img * mo:(img + 1) * mo, img * mi:(img + 1) * mi] = g[k]
    return out


# ----------------------------------------------------------------------------
# Deterministic parameter construction (matches the nn.Module's shapes)
# ----------------------------------------------------------------------------
def make_params(seed=0):
    key = jax.random.PRNGKey(seed)
    params = {}

    def conv_p(name, k, cout, cin, kk):
        kw_, kb_ = jax.random.split(k)
        bound = 1.0 / float((cin * kk * kk) ** 0.5)
        params[name + "_w"] = jax.random.uniform(kw_, (cout, cin, kk, kk),
                                                 jnp.float32, -bound, bound)
        params[name + "_b"] = jax.random.uniform(kb_, (cout,),
                                                 jnp.float32, -bound, bound)

    def convT_p(name, k, cin, cout, kk):
        kw_, kb_ = jax.random.split(k)
        bound = 1.0 / float((cout * kk * kk) ** 0.5)
        params[name + "_w"] = jax.random.uniform(kw_, (cin, cout, kk, kk),
                                                 jnp.float32, -bound, bound)
        params[name + "_b"] = jax.random.uniform(kb_, (cout,),
                                                 jnp.float32, -bound, bound)

    def bn_p(name, k, c):
        k1, k2, k3, k4 = jax.random.split(k, 4)
        params[name] = (
            1.0 + 0.1 * jax.random.normal(k1, (c,), jnp.float32),           # gamma
            0.1 * jax.random.normal(k2, (c,), jnp.float32),                 # beta
            0.1 * jax.random.normal(k3, (c,), jnp.float32),                 # running_mean
            1.0 + 0.1 * jnp.abs(jax.random.normal(k4, (c,), jnp.float32)),  # running_var
        )

    keys = jax.random.split(key, 11)
    conv_p("enc1", keys[0], 32, 1, 3)
    bn_p("bn1", keys[1], 32)
    conv_p("enc2", keys[2], 64, 32, 3)
    bn_p("bn2", keys[3], 64)
    conv_p("enc3", keys[4], 128, 64, 3)
    bn_p("bn3", keys[5], 128)
    convT_p("dec1", keys[6], 128, 64, 3)
    bn_p("bn4", keys[7], 64)
    convT_p("dec2", keys[8], 64, 32, 3)
    bn_p("bn5", keys[9], 32)
    convT_p("dec3", keys[10], 32, 1, 3)
    return params


# ----------------------------------------------------------------------------
# One-time packing: fold BN into bf16 per-tap weight stacks + f32 biases and
# build the batched/stacked 0/1 gather matrices for every layer.
# ----------------------------------------------------------------------------
def prepare_packed(params, height=16, width=16, batch_block=1, eps=1e-5):
    B = int(batch_block)
    bf = jnp.bfloat16

    def fold(conv_b, bn):
        if bn is None:
            return jnp.ones_like(conv_b), conv_b
        gamma, beta, mean, var = bn
        s = gamma * jax.lax.rsqrt(var + eps)
        return s, beta + (conv_b - mean) * s

    def pack_conv(w, scale):          # torch Conv2d (Cout, Cin, 3, 3) -> (9, Cin, Cout)
        cout, cin = w.shape[0], w.shape[1]
        wt = jnp.transpose(w, (2, 3, 1, 0)).reshape(9, cin, cout)
        return (wt * scale.reshape(1, 1, cout)).astype(bf)

    def pack_convT(w, scale):         # torch ConvTranspose2d (Cin, Cout, 3, 3) -> (9, Cin, Cout)
        cin, cout = w.shape[0], w.shape[1]
        wt = jnp.transpose(w, (2, 3, 0, 1)).reshape(9, cin, cout)
        return (wt * scale.reshape(1, 1, cout)).astype(bf)

    H0, W0 = height, width
    H1, W1 = H0 // 2, W0 // 2
    H2, W2 = H1 // 2, W1 // 2

    s1, b1 = fold(params["enc1_b"], params["bn1"])
    s2, b2 = fold(params["enc2_b"], params["bn2"])
    s3, b3 = fold(params["enc3_b"], params["bn3"])
    s4, b4 = fold(params["dec1_b"], params["bn4"])
    s5, b5 = fold(params["dec2_b"], params["bn5"])
    s6, b6 = fold(params["dec3_b"], None)

    g2 = _conv_gather(H1, W1, H2, W2, 2, 1)     # (9, 16, 64)
    g3 = _conv_gather(H2, W2, H2, W2, 1, 1)     # (9, 16, 16)
    g4 = _convT_gather(H2, W2, H2, W2, 1, 1)    # (9, 16, 16)
    g5 = _convT_gather(H2, W2, H1, W1, 2, 1)    # (9, 64, 16)
    g6 = _convT_gather(H1, W1, H0, W0, 2, 1)    # (9, 256, 64)

    packed = {
        # enc1: plain im2col matmul (patches come from the wrapper).
        "w1": pack_conv(params["enc1_w"], s1).reshape(9, 32),
        "b1": b1.reshape(1, -1).astype(jnp.float32),
        # weight-first stacked layers.
        "w2": pack_conv(params["enc2_w"], s2),                      # (9, 32, 64)
        "b2": b2.reshape(1, -1).astype(jnp.float32),
        "g2": jnp.asarray(_stack_gather_weight_first(g2, B), bf),   # (B*16, 9*B*64)
        "w3": pack_conv(params["enc3_w"], s3),                      # (9, 64, 128)
        "b3": b3.reshape(1, -1).astype(jnp.float32),
        "g3": jnp.asarray(_stack_gather_weight_first(g3, B), bf),   # (B*16, 9*B*16)
        # dec1: gather-first im2col (Cin = 128, lane-aligned concat).
        "w4": pack_convT(params["dec1_w"], s4).reshape(9 * 128, 64),
        "b4": b4.reshape(1, -1).astype(jnp.float32),
        "g4": jnp.asarray(_blockdiag_gather(g4, B), bf),            # (9, B*16, B*16)
        "w5": pack_convT(params["dec2_w"], s5),                     # (9, 64, 32)
        "b5": b5.reshape(1, -1).astype(jnp.float32),
        "g5": jnp.asarray(_stack_gather_weight_first(g5, B), bf),   # (B*64, 9*B*16)
        # final ConvTranspose2d (Cout=1): transposed, lane-dense formulation.
        "w6": pack_convT(params["dec3_w"], s6).reshape(9, 32),
        "b6": b6.reshape(1, 1).astype(jnp.float32),
        "g6t": jnp.asarray(g6.transpose(0, 2, 1), bf),              # (9, 64, 256)
    }
    return packed


# ----------------------------------------------------------------------------
# The single fused Pallas kernel: one grid step == `batch_block` images.
# ----------------------------------------------------------------------------
def _autoencoder_fused_kernel(
    p1_ref,                                  # (B*64, 9)   enc1 im2col patches
    w1_ref, b1_ref,                          # (9, 32),    (1, 32)
    w2_ref, b2_ref, g2_ref,                  # (9,32,64),  (1,64),  (B*16, 9*B*64)
    w3_ref, b3_ref, g3_ref,                  # (9,64,128), (1,128), (B*16, 9*B*16)
    w4_ref, b4_ref, g4_ref,                  # (1152,64),  (1,64),  (9, B*16, B*16)
    w5_ref, b5_ref, g5_ref,                  # (9,64,32),  (1,32),  (B*64, 9*B*16)
    w6_ref, b6_ref, g6t_ref,                 # (9,32),     (1,1),   (9, 64, 256)
    out_ref,                                 # (1, B*256)  sigmoid output
    *, batch_block, m1, m0,
):
    f32, bf16 = jnp.float32, jnp.bfloat16

    def relu(v):
        return jnp.maximum(v, 0.0)

    def weight_first(x, w_ref, g_ref, b_ref):
        # 9 batched weight matmuls -> sublane-aligned row-concat -> one big-K
        # gather matmul (G_cat is 0/1 and block-diagonal over the image block).
        taps = [jnp.dot(x, w_ref[k], preferred_element_type=f32).astype(bf16)
                for k in range(9)]
        t_cat = jnp.concatenate(taps, axis=0)
        return jnp.dot(g_ref[...], t_cat, preferred_element_type=f32) + b_ref[...]

    def gather_first(x, w_ref, g_ref, b_ref):
        # 9 exact 0/1 gathers -> lane-aligned concat (Cin=128) -> one K=1152
        # im2col weight matmul.  No intermediate rounding (x already bf16).
        pats = [jnp.dot(g_ref[k], x, preferred_element_type=f32).astype(bf16)
                for k in range(9)]
        p_cat = jnp.concatenate(pats, axis=1)
        return jnp.dot(p_cat, w_ref[...], preferred_element_type=f32) + b_ref[...]

    # ----- encoder (Dropout = identity in eval mode) ---------------------------
    x = jnp.dot(p1_ref[...], w1_ref[...], preferred_element_type=f32)
    x = relu(x + b1_ref[...]).astype(bf16)                               # (B*64, 32)
    x = relu(weight_first(x, w2_ref, g2_ref, b2_ref)).astype(bf16)       # (B*16, 64)
    x = relu(weight_first(x, w3_ref, g3_ref, b3_ref)).astype(bf16)       # (B*16, 128)

    # ----- decoder --------------------------------------------------------------
    x = relu(gather_first(x, w4_ref, g4_ref, b4_ref)).astype(bf16)       # (B*16, 64)
    x = relu(weight_first(x, w5_ref, g5_ref, b5_ref)).astype(bf16)       # (B*64, 32)

    # Final ConvTranspose2d (Cout=1) + Sigmoid, computed transposed per image so
    # each written block is a lane-dense (1, 256) row (no 1-lane masked stores).
    for b in range(batch_block):
        xb = x[b * m1:(b + 1) * m1, :]                                   # (64, 32)
        zt = jax.lax.dot_general(
            w6_ref[...], xb,
            dimension_numbers=(((1,), (1,)), ((), ())),
            preferred_element_type=f32)                                  # (9, 64)
        acc = None
        for k in range(9):
            c = jnp.dot(zt[k:k + 1, :].astype(bf16), g6t_ref[k],
                        preferred_element_type=f32)                      # (1, 256)
            acc = c if acc is None else acc + c
        out_ref[:, b * m0:(b + 1) * m0] = jax.nn.sigmoid(acc + b6_ref[...])


# ----------------------------------------------------------------------------
# Forward wrapper: NCHW float32 in -> NCHW float32 out (eval semantics).
# ----------------------------------------------------------------------------
def autoencoder_forward(x_nchw, packed, batch_block=1):
    n, _, h, w = x_nchw.shape
    bb = int(batch_block)
    m1 = (h // 2) * (w // 2)      # pixels after enc1 / before dec3 (= 64)
    m0 = h * w                    # output pixels (= 256)

    n_pad = ((n + bb - 1) // bb) * bb
    if n_pad != n:
        x_nchw = jnp.pad(x_nchw, ((0, n_pad - n), (0, 0), (0, 0), (0, 0)))

    # enc1 im2col on the tiny raw input: one fused XLA op (Cin = 1).
    patches = jax.lax.conv_general_dilated_patches(
        x_nchw.astype(jnp.float32),
        filter_shape=(3, 3), window_strides=(2, 2),
        padding=((1, 1), (1, 1)),
        dimension_numbers=("NCHW", "OIHW", "NCHW"))            # (n_pad, 9, h/2, w/2)
    patches = jnp.transpose(patches, (0, 2, 3, 1)).reshape(n_pad * m1, 9)
    patches = patches.astype(jnp.bfloat16)

    consts = [packed[k] for k in (
        "w1", "b1",
        "w2", "b2", "g2",
        "w3", "b3", "g3",
        "w4", "b4", "g4",
        "w5", "b5", "g5",
        "w6", "b6", "g6t")]

    def const_spec(a):
        zeros = (0,) * a.ndim
        return pl.BlockSpec(a.shape, lambda i, _z=zeros: _z)   # grid-invariant block

    kernel = functools.partial(_autoencoder_fused_kernel,
                               batch_block=bb, m1=m1, m0=m0)

    out = pl.pallas_call(
        kernel,
        out_shape=jax.ShapeDtypeStruct((1, n_pad * m0), jnp.float32),
        grid=(n_pad // bb,),
        in_specs=[pl.BlockSpec((bb * m1, 9), lambda i: (i, 0))]
                 + [const_spec(a) for a in consts],
        out_specs=pl.BlockSpec((1, bb * m0), lambda i: (0, i)),
        compiler_params=pltpu.CompilerParams(
            dimension_semantics=("parallel",),      # steps sharded across TCs (v7x)
            vmem_limit_bytes=32 * 1024 * 1024,
        ),
    )(patches, *consts)

    return out.reshape(n_pad, 1, h, w)[:n]


# ----------------------------------------------------------------------------
# Plain-JAX reference (XLA convolutions) for correctness cross-check.
# ----------------------------------------------------------------------------
def _reference_forward(x, p, eps=1e-5):
    dn = ("NCHW", "OIHW", "NCHW")
    hi = jax.lax.Precision.HIGHEST

    def bn(y, stats):
        g, b, m, v = (s.reshape(1, -1, 1, 1) for s in stats)
        return (y - m) * (g * jax.lax.rsqrt(v + eps)) + b

    def conv(y, w, b, stride, pad):
        out = jax.lax.conv_general_dilated(
            y, w, (stride, stride), ((pad, pad), (pad, pad)),
            dimension_numbers=dn, precision=hi)
        return out + b.reshape(1, -1, 1, 1)

    def convT(y, w, b, stride, pad, out_pad):
        wc = jnp.transpose(w[:, :, ::-1, ::-1], (1, 0, 2, 3))
        out = jax.lax.conv_general_dilated(
            y, wc, (1, 1),
            ((2 - pad, 2 - pad + out_pad), (2 - pad, 2 - pad + out_pad)),
            lhs_dilation=(stride, stride), dimension_numbers=dn, precision=hi)
        return out + b.reshape(1, -1, 1, 1)

    y = jax.nn.relu(bn(conv(x, p["enc1_w"], p["enc1_b"], 2, 1), p["bn1"]))
    y = jax.nn.relu(bn(conv(y, p["enc2_w"], p["enc2_b"], 2, 1), p["bn2"]))
    y = jax.nn.relu(bn(conv(y, p["enc3_w"], p["enc3_b"], 1, 1), p["bn3"]))
    y = jax.nn.relu(bn(convT(y, p["dec1_w"], p["dec1_b"], 1, 1, 0), p["bn4"]))
    y = jax.nn.relu(bn(convT(y, p["dec2_w"], p["dec2_b"], 2, 1, 1), p["bn5"]))
    y = jax.nn.sigmoid(convT(y, p["dec3_w"], p["dec3_b"], 2, 1, 1))
    return y


if __name__ == "__main__":
    params = make_params(seed=0)
    x = jax.random.normal(jax.random.PRNGKey(0), (2, 1, 16, 16), jnp.float32)
    n = x.shape[0]

    # Batch images per grid step, but keep grid length >= 2 so both v7x
    # TensorCores are used (for n=2: batch_block=1, grid=(2,)).
    batch_block = max(1, min(8, n // 2)) if n >= 2 else 1

    packed = prepare_packed(params, height=16, width=16, batch_block=batch_block)
    fwd = jax.jit(lambda xx, pp: autoencoder_forward(xx, pp, batch_block=batch_block))
    out = jax.block_until_ready(fwd(x, packed))

    assert out.shape == (2, 1, 16, 16), out.shape
    assert out.dtype == jnp.float32
    assert bool(jnp.all(jnp.isfinite(out)))
    assert bool(jnp.all((out >= 0.0) & (out <= 1.0)))   # sigmoid output range

    # Cross-check against a plain-JAX (XLA conv) reference.  bf16 MXU inputs
    # with f32 accumulation keep the fused kernel well inside this tolerance.
    ref = jax.block_until_ready(jax.jit(_reference_forward)(x, params))
    err = float(jnp.max(jnp.abs(out - ref)))
    assert err < 5e-2, err

    print("KERNEL_OK")
</pallas_src>

<mosaic_0001>
module attributes {stable_mosaic.version = 11 : i64} {
  func.func @_autoencoder_fused_kernel(%arg0: i32, %arg1: memref<64x9xbf16, #tpu.memory_space<vmem>>, %arg2: memref<9x32xbf16, #tpu.memory_space<vmem>>, %arg3: memref<1x32xf32, #tpu.memory_space<vmem>>, %arg4: memref<9x32x64xbf16, #tpu.memory_space<vmem>>, %arg5: memref<1x64xf32, #tpu.memory_space<vmem>>, %arg6: memref<16x576xbf16, #tpu.memory_space<vmem>>, %arg7: memref<9x64x128xbf16, #tpu.memory_space<vmem>>, %arg8: memref<1x128xf32, #tpu.memory_space<vmem>>, %arg9: memref<16x144xbf16, #tpu.memory_space<vmem>>, %arg10: memref<1152x64xbf16, #tpu.memory_space<vmem>>, %arg11: memref<1x64xf32, #tpu.memory_space<vmem>>, %arg12: memref<9x16x16xbf16, #tpu.memory_space<vmem>>, %arg13: memref<9x64x32xbf16, #tpu.memory_space<vmem>>, %arg14: memref<1x32xf32, #tpu.memory_space<vmem>>, %arg15: memref<64x144xbf16, #tpu.memory_space<vmem>>, %arg16: memref<9x32xbf16, #tpu.memory_space<vmem>>, %arg17: memref<1x1xf32, #tpu.memory_space<vmem>>, %arg18: memref<9x64x256xbf16, #tpu.memory_space<vmem>>, %arg19: memref<1x256xf32, #tpu.memory_space<vmem>>) attributes {dimension_semantics = [#tpu.dimension_semantics<parallel>], iteration_bounds = array<i64: 2>, scalar_prefetch = 0 : i64, scratch_operands = 0 : i64, tpu.core_type = #tpu.core_type<tc>, window_params = [{transform_indices = @transform_0, window_bounds = array<i64: 64, 9>}, {pipeline_mode = #tpu.pipeline_mode<synchronous>, transform_indices = @transform_1, window_bounds = array<i64: 9, 32>}, {pipeline_mode = #tpu.pipeline_mode<synchronous>, transform_indices = @transform_2, window_bounds = array<i64: 1, 32>}, {pipeline_mode = #tpu.pipeline_mode<synchronous>, transform_indices = @transform_3, window_bounds = array<i64: 9, 32, 64>}, {pipeline_mode = #tpu.pipeline_mode<synchronous>, transform_indices = @transform_4, window_bounds = array<i64: 1, 64>}, {pipeline_mode = #tpu.pipeline_mode<synchronous>, transform_indices = @transform_5, window_bounds = array<i64: 16, 576>}, {pipeline_mode = #tpu.pipeline_mode<synchronous>, transform_indices = @transform_6, window_bounds = array<i64: 9, 64, 128>}, {pipeline_mode = #tpu.pipeline_mode<synchronous>, transform_indices = @transform_7, window_bounds = array<i64: 1, 128>}, {pipeline_mode = #tpu.pipeline_mode<synchronous>, transform_indices = @transform_8, window_bounds = array<i64: 16, 144>}, {pipeline_mode = #tpu.pipeline_mode<synchronous>, transform_indices = @transform_9, window_bounds = array<i64: 1152, 64>}, {pipeline_mode = #tpu.pipeline_mode<synchronous>, transform_indices = @transform_10, window_bounds = array<i64: 1, 64>}, {pipeline_mode = #tpu.pipeline_mode<synchronous>, transform_indices = @transform_11, window_bounds = array<i64: 9, 16, 16>}, {pipeline_mode = #tpu.pipeline_mode<synchronous>, transform_indices = @transform_12, window_bounds = array<i64: 9, 64, 32>}, {pipeline_mode = #tpu.pipeline_mode<synchronous>, transform_indices = @transform_13, window_bounds = array<i64: 1, 32>}, {pipeline_mode = #tpu.pipeline_mode<synchronous>, transform_indices = @transform_14, window_bounds = array<i64: 64, 144>}, {pipeline_mode = #tpu.pipeline_mode<synchronous>, transform_indices = @transform_15, window_bounds = array<i64: 9, 32>}, {pipeline_mode = #tpu.pipeline_mode<synchronous>, transform_indices = @transform_16, window_bounds = array<i64: 1, 1>}, {pipeline_mode = #tpu.pipeline_mode<synchronous>, transform_indices = @transform_17, window_bounds = array<i64: 9, 64, 256>}, {transform_indices = @transform_18, window_bounds = array<i64: 1, 256>}]} {
    %c0 = arith.constant 0 : index
    %c0_0 = arith.constant 0 : index
    %0 = vector.load %arg1[%c0, %c0_0] : memref<64x9xbf16, #tpu.memory_space<vmem>>, vector<64x9xbf16>
    %c0_1 = arith.constant 0 : index
    %c0_2 = arith.constant 0 : index
    %1 = vector.load %arg2[%c0_1, %c0_2] : memref<9x32xbf16, #tpu.memory_space<vmem>>, vector<9x32xbf16>
    %cst = arith.constant dense<0.000000e+00> : vector<64x32xf32>
    %2 = tpu.matmul %0, %1, %cst {dimension_numbers = #tpu.dot_dimension_numbers<[1], [0], [0], [1], [0, 0, 1, 1], [], []>} : vector<64x9xbf16>, vector<9x32xbf16>, vector<64x32xf32> -> vector<64x32xf32>
    %c0_3 = arith.constant 0 : index
    %c0_4 = arith.constant 0 : index
    %3 = vector.load %arg3[%c0_3, %c0_4] : memref<1x32xf32, #tpu.memory_space<vmem>>, vector<1x32xf32>
    %4 = vector.broadcast %3 : vector<1x32xf32> to vector<64x32xf32>
    %5 = arith.addf %2, %4 : vector<64x32xf32>
    %cst_5 = arith.constant 0.000000e+00 : f32
    %6 = vector.broadcast %cst_5 : f32 to vector<64x32xf32>
    %7 = arith.maximumf %5, %6 : vector<64x32xf32>
    %8 = arith.truncf %7 : vector<64x32xf32> to vector<64x32xbf16>
    %c0_6 = arith.constant 0 : index
    %c0_7 = arith.constant 0 : index
    %c0_8 = arith.constant 0 : index
    %9 = vector.load %arg4[%c0_6, %c0_7, %c0_8] : memref<9x32x64xbf16, #tpu.memory_space<vmem>>, vector<1x32x64xbf16>
    %10 = vector.shape_cast %9 : vector<1x32x64xbf16> to vector<32x64xbf16>
    %cst_9 = arith.constant dense<0.000000e+00> : vector<64x64xf32>
    %11 = tpu.matmul %8, %10, %cst_9 {dimension_numbers = #tpu.dot_dimension_numbers<[1], [0], [0], [1], [0, 0, 1, 1], [], []>} : vector<64x32xbf16>, vector<32x64xbf16>, vector<64x64xf32> -> vector<64x64xf32>
    %12 = arith.truncf %11 : vector<64x64xf32> to vector<64x64xbf16>
    %c1 = arith.constant 1 : index
    %c0_10 = arith.constant 0 : index
    %c0_11 = arith.constant 0 : index
    %13 = vector.load %arg4[%c1, %c0_10, %c0_11] : memref<9x32x64xbf16, #tpu.memory_space<vmem>>, vector<1x32x64xbf16>
    %14 = vector.shape_cast %13 : vector<1x32x64xbf16> to vector<32x64xbf16>
    %cst_12 = arith.constant dense<0.000000e+00> : vector<64x64xf32>
    %15 = tpu.matmul %8, %14, %cst_12 {dimension_numbers = #tpu.dot_dimension_numbers<[1], [0], [0], [1], [0, 0, 1, 1], [], []>} : vector<64x32xbf16>, vector<32x64xbf16>, vector<64x64xf32> -> vector<64x64xf32>
    %16 = arith.truncf %15 : vector<64x64xf32> to vector<64x64xbf16>
    %c2 = arith.constant 2 : index
    %c0_13 = arith.constant 0 : index
    %c0_14 = arith.constant 0 : index
    %17 = vector.load %arg4[%c2, %c0_13, %c0_14] : memref<9x32x64xbf16, #tpu.memory_space<vmem>>, vector<1x32x64xbf16>
    %18 = vector.shape_cast %17 : vector<1x32x64xbf16> to vector<32x64xbf16>
    %cst_15 = arith.constant dense<0.000000e+00> : vector<64x64xf32>
    %19 = tpu.matmul %8, %18, %cst_15 {dimension_numbers = #tpu.dot_dimension_numbers<[1], [0], [0], [1], [0, 0, 1, 1], [], []>} : vector<64x32xbf16>, vector<32x64xbf16>, vector<64x64xf32> -> vector<64x64xf32>
    %20 = arith.truncf %19 : vector<64x64xf32> to vector<64x64xbf16>
    %c3 = arith.constant 3 : index
    %c0_16 = arith.constant 0 : index
    %c0_17 = arith.constant 0 : index
    %21 = vector.load %arg4[%c3, %c0_16, %c0_17] : memref<9x32x64xbf16, #tpu.memory_space<vmem>>, vector<1x32x64xbf16>
    %22 = vector.shape_cast %21 : vector<1x32x64xbf16> to vector<32x64xbf16>
    %cst_18 = arith.constant dense<0.000000e+00> : vector<64x64xf32>
    %23 = tpu.matmul %8, %22, %cst_18 {dimension_numbers = #tpu.dot_dimension_numbers<[1], [0], [0], [1], [0, 0, 1, 1], [], []>} : vector<64x32xbf16>, vector<32x64xbf16>, vector<64x64xf32> -> vector<64x64xf32>
    %24 = arith.truncf %23 : vector<64x64xf32> to vector<64x64xbf16>
    %c4 = arith.constant 4 : index
    %c0_19 = arith.constant 0 : index
    %c0_20 = arith.constant 0 : index
    %25 = vector.load %arg4[%c4, %c0_19, %c0_20] : memref<9x32x64xbf16, #tpu.memory_space<vmem>>, vector<1x32x64xbf16>
    %26 = vector.shape_cast %25 : vector<1x32x64xbf16> to vector<32x64xbf16>
    %cst_21 = arith.constant dense<0.000000e+00> : vector<64x64xf32>
    %27 = tpu.matmul %8, %26, %cst_21 {dimension_numbers = #tpu.dot_dimension_numbers<[1], [0], [0], [1], [0, 0, 1, 1], [], []>} : vector<64x32xbf16>, vector<32x64xbf16>, vector<64x64xf32> -> vector<64x64xf32>
    %28 = arith.truncf %27 : vector<64x64xf32> to vector<64x64xbf16>
    %c5 = arith.constant 5 : index
    %c0_22 = arith.constant 0 : index
    %c0_23 = arith.constant 0 : index
    %29 = vector.load %arg4[%c5, %c0_22, %c0_23] : memref<9x32x64xbf16, #tpu.memory_space<vmem>>, vector<1x32x64xbf16>
    %30 = vector.shape_cast %29 : vector<1x32x64xbf16> to vector<32x64xbf16>
    %cst_24 = arith.constant dense<0.000000e+00> : vector<64x64xf32>
    %31 = tpu.matmul %8, %30, %cst_24 {dimension_numbers = #tpu.dot_dimension_numbers<[1], [0], [0], [1], [0, 0, 1, 1], [], []>} : vector<64x32xbf16>, vector<32x64xbf16>, vector<64x64xf32> -> vector<64x64xf32>
    %32 = arith.truncf %31 : vector<64x64xf32> to vector<64x64xbf16>
    %c6 = arith.constant 6 : index
    %c0_25 = arith.constant 0 : index
    %c0_26 = arith.constant 0 : index
    %33 = vector.load %arg4[%c6, %c0_25, %c0_26] : memref<9x32x64xbf16, #tpu.memory_space<vmem>>, vector<1x32x64xbf16>
    %34 = vector.shape_cast %33 : vector<1x32x64xbf16> to vector<32x64xbf16>
    %cst_27 = arith.constant dense<0.000000e+00> : vector<64x64xf32>
    %35 = tpu.matmul %8, %34, %cst_27 {dimension_numbers = #tpu.dot_dimension_numbers<[1], [0], [0], [1], [0, 0, 1, 1], [], []>} : vector<64x32xbf16>, vector<32x64xbf16>, vector<64x64xf32> -> vector<64x64xf32>
    %36 = arith.truncf %35 : vector<64x64xf32> to vector<64x64xbf16>
    %c7 = arith.constant 7 : index
    %c0_28 = arith.constant 0 : index
    %c0_29 = arith.constant 0 : index
    %37 = vector.load %arg4[%c7, %c0_28, %c0_29] : memref<9x32x64xbf16, #tpu.memory_space<vmem>>, vector<1x32x64xbf16>
    %38 = vector.shape_cast %37 : vector<1x32x64xbf16> to vector<32x64xbf16>
    %cst_30 = arith.constant dense<0.000000e+00> : vector<64x64xf32>
    %39 = tpu.matmul %8, %38, %cst_30 {dimension_numbers = #tpu.dot_dimension_numbers<[1], [0], [0], [1], [0, 0, 1, 1], [], []>} : vector<64x32xbf16>, vector<32x64xbf16>, vector<64x64xf32> -> vector<64x64xf32>
    %40 = arith.truncf %39 : vector<64x64xf32> to vector<64x64xbf16>
    %c8 = arith.constant 8 : index
    %c0_31 = arith.constant 0 : index
    %c0_32 = arith.constant 0 : index
    %41 = vector.load %arg4[%c8, %c0_31, %c0_32] : memref<9x32x64xbf16, #tpu.memory_space<vmem>>, vector<1x32x64xbf16>
    %42 = vector.shape_cast %41 : vector<1x32x64xbf16> to vector<32x64xbf16>
    %cst_33 = arith.constant dense<0.000000e+00> : vector<64x64xf32>
    %43 = tpu.matmul %8, %42, %cst_33 {dimension_numbers = #tpu.dot_dimension_numbers<[1], [0], [0], [1], [0, 0, 1, 1], [], []>} : vector<64x32xbf16>, vector<32x64xbf16>, vector<64x64xf32> -> vector<64x64xf32>
    %44 = arith.truncf %43 : vector<64x64xf32> to vector<64x64xbf16>
    %45 = tpu.concatenate %12, %16, %20, %24, %28, %32, %36, %40, %44 in 0 : vector<64x64xbf16>, vector<64x64xbf16>, vector<64x64xbf16>, vector<64x64xbf16>, vector<64x64xbf16>, vector<64x64xbf16>, vector<64x64xbf16>, vector<64x64xbf16>, vector<64x64xbf16> -> vector<576x64xbf16>
    %c0_34 = arith.constant 0 : index
    %c0_35 = arith.constant 0 : index
    %46 = vector.load %arg6[%c0_34, %c0_35] : memref<16x576xbf16, #tpu.memory_space<vmem>>, vector<16x576xbf16>
    %cst_36 = arith.constant dense<0.000000e+00> : vector<16x64xf32>
    %47 = tpu.matmul %46, %45, %cst_36 {dimension_numbers = #tpu.dot_dimension_numbers<[1], [0], [0], [1], [0, 0, 1, 1], [], []>} : vector<16x576xbf16>, vector<576x64xbf16>, vector<16x64xf32> -> vector<16x64xf32>
    %c0_37 = arith.constant 0 : index
    %c0_38 = arith.constant 0 : index
    %48 = vector.load %arg5[%c0_37, %c0_38] : memref<1x64xf32, #tpu.memory_space<vmem>>, vector<1x64xf32>
    %49 = vector.broadcast %48 : vector<1x64xf32> to vector<16x64xf32>
    %50 = arith.addf %47, %49 : vector<16x64xf32>
    %cst_39 = arith.constant 0.000000e+00 : f32
    %51 = vector.broadcast %cst_39 : f32 to vector<16x64xf32>
    %52 = arith.maximumf %50, %51 : vector<16x64xf32>
    %53 = arith.truncf %52 : vector<16x64xf32> to vector<16x64xbf16>
    %c0_40 = arith.constant 0 : index
    %c0_41 = arith.constant 0 : index
    %c0_42 = arith.constant 0 : index
    %54 = vector.load %arg7[%c0_40, %c0_41, %c0_42] : memref<9x64x128xbf16, #tpu.memory_space<vmem>>, vector<1x64x128xbf16>
    %55 = vector.shape_cast %54 : vector<1x64x128xbf16> to vector<64x128xbf16>
    %cst_43 = arith.constant dense<0.000000e+00> : vector<16x128xf32>
    %56 = tpu.matmul %53, %55, %cst_43 {dimension_numbers = #tpu.dot_dimension_numbers<[1], [0], [0], [1], [0, 0, 1, 1], [], []>} : vector<16x64xbf16>, vector<64x128xbf16>, vector<16x128xf32> -> vector<16x128xf32>
    %57 = arith.truncf %56 : vector<16x128xf32> to vector<16x128xbf16>
    %c1_44 = arith.constant 1 : index
    %c0_45 = arith.constant 0 : index
    %c0_46 = arith.constant 0 : index
    %58 = vector.load %arg7[%c1_44, %c0_45, %c0_46] : memref<9x64x128xbf16, #tpu.memory_space<vmem>>, vector<1x64x128xbf16>
    %59 = vector.shape_cast %58 : vector<1x64x128xbf16> to vector<64x128xbf16>
    %cst_47 = arith.constant dense<0.000000e+00> : vector<16x128xf32>
    %60 = tpu.matmul %53, %59, %cst_47 {dimension_numbers = #tpu.dot_dimension_numbers<[1], [0], [0], [1], [0, 0, 1, 1], [], []>} : vector<16x64xbf16>, vector<64x128xbf16>, vector<16x128xf32> -> vector<16x128xf32>
    %61 = arith.truncf %60 : vector<16x128xf32> to vector<16x128xbf16>
    %c2_48 = arith.constant 2 : index
    %c0_49 = arith.constant 0 : index
    %c0_50 = arith.constant 0 : index
    %62 = vector.load %arg7[%c2_48, %c0_49, %c0_50] : memref<9x64x128xbf16, #tpu.memory_space<vmem>>, vector<1x64x128xbf16>
    %63 = vector.shape_cast %62 : vector<1x64x128xbf16> to vector<64x128xbf16>
    %cst_51 = arith.constant dense<0.000000e+00> : vector<16x128xf32>
    %64 = tpu.matmul %53, %63, %cst_51 {dimension_numbers = #tpu.dot_dimension_numbers<[1], [0], [0], [1], [0, 0, 1, 1], [], []>} : vector<16x64xbf16>, vector<64x128xbf16>, vector<16x128xf32> -> vector<16x128xf32>
    %65 = arith.truncf %64 : vector<16x128xf32> to vector<16x128xbf16>
    %c3_52 = arith.constant 3 : index
    %c0_53 = arith.constant 0 : index
    %c0_54 = arith.constant 0 : index
    %66 = vector.load %arg7[%c3_52, %c0_53, %c0_54] : memref<9x64x128xbf16, #tpu.memory_space<vmem>>, vector<1x64x128xbf16>
    %67 = vector.shape_cast %66 : vector<1x64x128xbf16> to vector<64x128xbf16>
    %cst_55 = arith.constant dense<0.000000e+00> : vector<16x128xf32>
    %68 = tpu.matmul %53, %67, %cst_55 {dimension_numbers = #tpu.dot_dimension_numbers<[1], [0], [0], [1], [0, 0, 1, 1], [], []>} : vector<16x64xbf16>, vector<64x128xbf16>, vector<16x128xf32> -> vector<16x128xf32>
    %69 = arith.truncf %68 : vector<16x128xf32> to vector<16x128xbf16>
    %c4_56 = arith.constant 4 : index
    %c0_57 = arith.constant 0 : index
    %c0_58 = arith.constant 0 : index
    %70 = vector.load %arg7[%c4_56, %c0_57, %c0_58] : memref<9x64x128xbf16, #tpu.memory_space<vmem>>, vector<1x64x128xbf16>
    %71 = vector.shape_cast %70 : vector<1x64x128xbf16> to vector<64x128xbf16>
    %cst_59 = arith.constant dense<0.000000e+00> : vector<16x128xf32>
    %72 = tpu.matmul %53, %71, %cst_59 {dimension_numbers = #tpu.dot_dimension_numbers<[1], [0], [0], [1], [0, 0, 1, 1], [], []>} : vector<16x64xbf16>, vector<64x128xbf16>, vector<16x128xf32> -> vector<16x128xf32>
    %73 = arith.truncf %72 : vector<16x128xf32> to vector<16x128xbf16>
    %c5_60 = arith.constant 5 : index
    %c0_61 = arith.constant 0 : index
    %c0_62 = arith.constant 0 : index
    %74 = vector.load %arg7[%c5_60, %c0_61, %c0_62] : memref<9x64x128xbf16, #tpu.memory_space<vmem>>, vector<1x64x128xbf16>
    %75 = vector.shape_cast %74 : vector<1x64x128xbf16> to vector<64x128xbf16>
    %cst_63 = arith.constant dense<0.000000e+00> : vector<16x128xf32>
    %76 = tpu.matmul %53, %75, %cst_63 {dimension_numbers = #tpu.dot_dimension_numbers<[1], [0], [0], [1], [0, 0, 1, 1], [], []>} : vector<16x64xbf16>, vector<64x128xbf16>, vector<16x128xf32> -> vector<16x128xf32>
    %77 = arith.truncf %76 : vector<16x128xf32> to vector<16x128xbf16>
    %c6_64 = arith.constant 6 : index
    %c0_65 = arith.constant 0 : index
    %c0_66 = arith.constant 0 : index
    %78 = vector.load %arg7[%c6_64, %c0_65, %c0_66] : memref<9x64x128xbf16, #tpu.memory_space<vmem>>, vector<1x64x128xbf16>
    %79 = vector.shape_cast %78 : vector<1x64x128xbf16> to vector<64x128xbf16>
    %cst_67 = arith.constant dense<0.000000e+00> : vector<16x128xf32>
    %80 = tpu.matmul %53, %79, %cst_67 {dimension_numbers = #tpu.dot_dimension_numbers<[1], [0], [0], [1], [0, 0, 1, 1], [], []>} : vector<16x64xbf16>, vector<64x128xbf16>, vector<16x128xf32> -> vector<16x128xf32>
    %81 = arith.truncf %80 : vector<16x128xf32> to vector<16x128xbf16>
    %c7_68 = arith.constant 7 : index
    %c0_69 = arith.constant 0 : index
    %c0_70 = arith.constant 0 : index
    %82 = vector.load %arg7[%c7_68, %c0_69, %c0_70] : memref<9x64x128xbf16, #tpu.memory_space<vmem>>, vector<1x64x128xbf16>
    %83 = vector.shape_cast %82 : vector<1x64x128xbf16> to vector<64x128xbf16>
    %cst_71 = arith.constant dense<0.000000e+00> : vector<16x128xf32>
    %84 = tpu.matmul %53, %83, %cst_71 {dimension_numbers = #tpu.dot_dimension_numbers<[1], [0], [0], [1], [0, 0, 1, 1], [], []>} : vector<16x64xbf16>, vector<64x128xbf16>, vector<16x128xf32> -> vector<16x128xf32>
    %85 = arith.truncf %84 : vector<16x128xf32> to vector<16x128xbf16>
    %c8_72 = arith.constant 8 : index
    %c0_73 = arith.constant 0 : index
    %c0_74 = arith.constant 0 : index
    %86 = vector.load %arg7[%c8_72, %c0_73, %c0_74] : memref<9x64x128xbf16, #tpu.memory_space<vmem>>, vector<1x64x128xbf16>
    %87 = vector.shape_cast %86 : vector<1x64x128xbf16> to vector<64x128xbf16>
    %cst_75 = arith.constant dense<0.000000e+00> : vector<16x128xf32>
    %88 = tpu.matmul %53, %87, %cst_75 {dimension_numbers = #tpu.dot_dimension_numbers<[1], [0], [0], [1], [0, 0, 1, 1], [], []>} : vector<16x64xbf16>, vector<64x128xbf16>, vector<16x128xf32> -> vector<16x128xf32>
    %89 = arith.truncf %88 : vector<16x128xf32> to vector<16x128xbf16>
    %90 = tpu.concatenate %57, %61, %65, %69, %73, %77, %81, %85, %89 in 0 : vector<16x128xbf16>, vector<16x128xbf16>, vector<16x128xbf16>, vector<16x128xbf16>, vector<16x128xbf16>, vector<16x128xbf16>, vector<16x128xbf16>, vector<16x128xbf16>, vector<16x128xbf16> -> vector<144x128xbf16>
    %c0_76 = arith.constant 0 : index
    %c0_77 = arith.constant 0 : index
    %91 = vector.load %arg9[%c0_76, %c0_77] : memref<16x144xbf16, #tpu.memory_space<vmem>>, vector<16x144xbf16>
    %cst_78 = arith.constant dense<0.000000e+00> : vector<16x128xf32>
    %92 = tpu.matmul %91, %90, %cst_78 {dimension_numbers = #tpu.dot_dimension_numbers<[1], [0], [0], [1], [0, 0, 1, 1], [], []>} : vector<16x144xbf16>, vector<144x128xbf16>, vector<16x128xf32> -> vector<16x128xf32>
    %c0_79 = arith.constant 0 : index
    %c0_80 = arith.constant 0 : index
    %93 = vector.load %arg8[%c0_79, %c0_80] : memref<1x128xf32, #tpu.memory_space<vmem>>, vector<1x128xf32>
    %94 = vector.broadcast %93 : vector<1x128xf32> to vector<16x128xf32>
    %95 = arith.addf %92, %94 : vector<16x128xf32>
    %cst_81 = arith.constant 0.000000e+00 : f32
    %96 = vector.broadcast %cst_81 : f32 to vector<16x128xf32>
    %97 = arith.maximumf %95, %96 : vector<16x128xf32>
    %98 = arith.truncf %97 : vector<16x128xf32> to vector<16x128xbf16>
    %c0_82 = arith.constant 0 : index
    %c0_83 = arith.constant 0 : index
    %c0_84 = arith.constant 0 : index
    %99 = vector.load %arg12[%c0_82, %c0_83, %c0_84] : memref<9x16x16xbf16, #tpu.memory_space<vmem>>, vector<1x16x16xbf16>
    %100 = vector.shape_cast %99 : vector<1x16x16xbf16> to vector<16x16xbf16>
    %cst_85 = arith.constant dense<0.000000e+00> : vector<16x128xf32>
    %101 = tpu.matmul %100, %98, %cst_85 {dimension_numbers = #tpu.dot_dimension_numbers<[1], [0], [0], [1], [0, 0, 1, 1], [], []>} : vector<16x16xbf16>, vector<16x128xbf16>, vector<16x128xf32> -> vector<16x128xf32>
    %102 = arith.truncf %101 : vector<16x128xf32> to vector<16x128xbf16>
    %c1_86 = arith.constant 1 : index
    %c0_87 = arith.constant 0 : index
    %c0_88 = arith.constant 0 : index
    %103 = vector.load %arg12[%c1_86, %c0_87, %c0_88] : memref<9x16x16xbf16, #tpu.memory_space<vmem>>, vector<1x16x16xbf16>
    %104 = vector.shape_cast %103 : vector<1x16x16xbf16> to vector<16x16xbf16>
    %cst_89 = arith.constant dense<0.000000e+00> : vector<16x128xf32>
    %105 = tpu.matmul %104, %98, %cst_89 {dimension_numbers = #tpu.dot_dimension_numbers<[1], [0], [0], [1], [0, 0, 1, 1], [], []>} : vector<16x16xbf16>, vector<16x128xbf16>, vector<16x128xf32> -> vector<16x128xf32>
    %106 = arith.truncf %105 : vector<16x128xf32> to vector<16x128xbf16>
    %c2_90 = arith.constant 2 : index
    %c0_91 = arith.constant 0 : index
    %c0_92 = arith.constant 0 : index
    %107 = vector.load %arg12[%c2_90, %c0_91, %c0_92] : memref<9x16x16xbf16, #tpu.memory_space<vmem>>, vector<1x16x16xbf16>
    %108 = vector.shape_cast %107 : vector<1x16x16xbf16> to vector<16x16xbf16>
    %cst_93 = arith.constant dense<0.000000e+00> : vector<16x128xf32>
    %109 = tpu.matmul %108, %98, %cst_93 {dimension_numbers = #tpu.dot_dimension_numbers<[1], [0], [0], [1], [0, 0, 1, 1], [], []>} : vector<16x16xbf16>, vector<16x128xbf16>, vector<16x128xf32> -> vector<16x128xf32>
    %110 = arith.truncf %109 : vector<16x128xf32> to vector<16x128xbf16>
    %c3_94 = arith.constant 3 : index
    %c0_95 = arith.constant 0 : index
    %c0_96 = arith.constant 0 : index
    %111 = vector.load %arg12[%c3_94, %c0_95, %c0_96] : memref<9x16x16xbf16, #tpu.memory_space<vmem>>, vector<1x16x16xbf16>
    %112 = vector.shape_cast %111 : vector<1x16x16xbf16> to vector<16x16xbf16>
    %cst_97 = arith.constant dense<0.000000e+00> : vector<16x128xf32>
    %113 = tpu.matmul %112, %98, %cst_97 {dimension_numbers = #tpu.dot_dimension_numbers<[1], [0], [0], [1], [0, 0, 1, 1], [], []>} : vector<16x16xbf16>, vector<16x128xbf16>, vector<16x128xf32> -> vector<16x128xf32>
    %114 = arith.truncf %113 : vector<16x128xf32> to vector<16x128xbf16>
    %c4_98 = arith.constant 4 : index
    %c0_99 = arith.constant 0 : index
    %c0_100 = arith.constant 0 : index
    %115 = vector.load %arg12[%c4_98, %c0_99, %c0_100] : memref<9x16x16xbf16, #tpu.memory_space<vmem>>, vector<1x16x16xbf16>
    %116 = vector.shape_cast %115 : vector<1x16x16xbf16> to vector<16x16xbf16>
    %cst_101 = arith.constant dense<0.000000e+00> : vector<16x128xf32>
    %117 = tpu.matmul %116, %98, %cst_101 {dimension_numbers = #tpu.dot_dimension_numbers<[1], [0], [0], [1], [0, 0, 1, 1], [], []>} : vector<16x16xbf16>, vector<16x128xbf16>, vector<16x128xf32> -> vector<16x128xf32>
    %118 = arith.truncf %117 : vector<16x128xf32> to vector<16x128xbf16>
    %c5_102 = arith.constant 5 : index
    %c0_103 = arith.constant 0 : index
    %c0_104 = arith.constant 0 : index
    %119 = vector.load %arg12[%c5_102, %c0_103, %c0_104] : memref<9x16x16xbf16, #tpu.memory_space<vmem>>, vector<1x16x16xbf16>
    %120 = vector.shape_cast %119 : vector<1x16x16xbf16> to vector<16x16xbf16>
    %cst_105 = arith.constant dense<0.000000e+00> : vector<16x128xf32>
    %121 = tpu.matmul %120, %98, %cst_105 {dimension_numbers = #tpu.dot_dimension_numbers<[1], [0], [0], [1], [0, 0, 1, 1], [], []>} : vector<16x16xbf16>, vector<16x128xbf16>, vector<16x128xf32> -> vector<16x128xf32>
    %122 = arith.truncf %121 : vector<16x128xf32> to vector<16x128xbf16>
    %c6_106 = arith.constant 6 : index
    %c0_107 = arith.constant 0 : index
    %c0_108 = arith.constant 0 : index
    %123 = vector.load %arg12[%c6_106, %c0_107, %c0_108] : memref<9x16x16xbf16, #tpu.memory_space<vmem>>, vector<1x16x16xbf16>
    %124 = vector.shape_cast %123 : vector<1x16x16xbf16> to vector<16x16xbf16>
    %cst_109 = arith.constant dense<0.000000e+00> : vector<16x128xf32>
    %125 = tpu.matmul %124, %98, %cst_109 {dimension_numbers = #tpu.dot_dimension_numbers<[1], [0], [0], [1], [0, 0, 1, 1], [], []>} : vector<16x16xbf16>, vector<16x128xbf16>, vector<16x128xf32> -> vector<16x128xf32>
    %126 = arith.truncf %125 : vector<16x128xf32> to vector<16x128xbf16>
    %c7_110 = arith.constant 7 : index
    %c0_111 = arith.constant 0 : index
    %c0_112 = arith.constant 0 : index
    %127 = vector.load %arg12[%c7_110, %c0_111, %c0_112] : memref<9x16x16xbf16, #tpu.memory_space<vmem>>, vector<1x16x16xbf16>
    %128 = vector.shape_cast %127 : vector<1x16x16xbf16> to vector<16x16xbf16>
    %cst_113 = arith.constant dense<0.000000e+00> : vector<16x128xf32>
    %129 = tpu.matmul %128, %98, %cst_113 {dimension_numbers = #tpu.dot_dimension_numbers<[1], [0], [0], [1], [0, 0, 1, 1], [], []>} : vector<16x16xbf16>, vector<16x128xbf16>, vector<16x128xf32> -> vector<16x128xf32>
    %130 = arith.truncf %129 : vector<16x128xf32> to vector<16x128xbf16>
    %c8_114 = arith.constant 8 : index
    %c0_115 = arith.constant 0 : index
    %c0_116 = arith.constant 0 : index
    %131 = vector.load %arg12[%c8_114, %c0_115, %c0_116] : memref<9x16x16xbf16, #tpu.memory_space<vmem>>, vector<1x16x16xbf16>
    %132 = vector.shape_cast %131 : vector<1x16x16xbf16> to vector<16x16xbf16>
    %cst_117 = arith.constant dense<0.000000e+00> : vector<16x128xf32>
    %133 = tpu.matmul %132, %98, %cst_117 {dimension_numbers = #tpu.dot_dimension_numbers<[1], [0], [0], [1], [0, 0, 1, 1], [], []>} : vector<16x16xbf16>, vector<16x128xbf16>, vector<16x128xf32> -> vector<16x128xf32>
    %134 = arith.truncf %133 : vector<16x128xf32> to vector<16x128xbf16>
    %135 = tpu.concatenate %102, %106, %110, %114, %118, %122, %126, %130, %134 in 1 : vector<16x128xbf16>, vector<16x128xbf16>, vector<16x128xbf16>, vector<16x128xbf16>, vector<16x128xbf16>, vector<16x128xbf16>, vector<16x128xbf16>, vector<16x128xbf16>, vector<16x128xbf16> -> vector<16x1152xbf16>
    %c0_118 = arith.constant 0 : index
    %c0_119 = arith.constant 0 : index
    %136 = vector.load %arg10[%c0_118, %c0_119] : memref<1152x64xbf16, #tpu.memory_space<vmem>>, vector<1152x64xbf16>
    %cst_120 = arith.constant dense<0.000000e+00> : vector<16x64xf32>
    %137 = tpu.matmul %135, %136, %cst_120 {dimension_numbers = #tpu.dot_dimension_numbers<[1], [0], [0], [1], [0, 0, 1, 1], [], []>} : vector<16x1152xbf16>, vector<1152x64xbf16>, vector<16x64xf32> -> vector<16x64xf32>
    %c0_121 = arith.constant 0 : index
    %c0_122 = arith.constant 0 : index
    %138 = vector.load %arg11[%c0_121, %c0_122] : memref<1x64xf32, #tpu.memory_space<vmem>>, vector<1x64xf32>
    %139 = vector.broadcast %138 : vector<1x64xf32> to vector<16x64xf32>
    %140 = arith.addf %137, %139 : vector<16x64xf32>
    %cst_123 = arith.constant 0.000000e+00 : f32
    %141 = vector.broadcast %cst_123 : f32 to vector<16x64xf32>
    %142 = arith.maximumf %140, %141 : vector<16x64xf32>
    %143 = arith.truncf %142 : vector<16x64xf32> to vector<16x64xbf16>
    %c0_124 = arith.constant 0 : index
    %c0_125 = arith.constant 0 : index
    %c0_126 = arith.constant 0 : index
    %144 = vector.load %arg13[%c0_124, %c0_125, %c0_126] : memref<9x64x32xbf16, #tpu.memory_space<vmem>>, vector<1x64x32xbf16>
    %145 = vector.shape_cast %144 : vector<1x64x32xbf16> to vector<64x32xbf16>
    %cst_127 = arith.constant dense<0.000000e+00> : vector<16x32xf32>
    %146 = tpu.matmul %143, %145, %cst_127 {dimension_numbers = #tpu.dot_dimension_numbers<[1], [0], [0], [1], [0, 0, 1, 1], [], []>} : vector<16x64xbf16>, vector<64x32xbf16>, vector<16x32xf32> -> vector<16x32xf32>
    %147 = arith.truncf %146 : vector<16x32xf32> to vector<16x32xbf16>
    %c1_128 = arith.constant 1 : index
    %c0_129 = arith.constant 0 : index
    %c0_130 = arith.constant 0 : index
    %148 = vector.load %arg13[%c1_128, %c0_129, %c0_130] : memref<9x64x32xbf16, #tpu.memory_space<vmem>>, vector<1x64x32xbf16>
    %149 = vector.shape_cast %148 : vector<1x64x32xbf16> to vector<64x32xbf16>
    %cst_131 = arith.constant dense<0.000000e+00> : vector<16x32xf32>
    %150 = tpu.matmul %143, %149, %cst_131 {dimension_numbers = #tpu.dot_dimension_numbers<[1], [0], [0], [1], [0, 0, 1, 1], [], []>} : vector<16x64xbf16>, vector<64x32xbf16>, vector<16x32xf32> -> vector<16x32xf32>
    %151 = arith.truncf %150 : vector<16x32xf32> to vector<16x32xbf16>
    %c2_132 = arith.constant 2 : index
    %c0_133 = arith.constant 0 : index
    %c0_134 = arith.constant 0 : index
    %152 = vector.load %arg13[%c2_132, %c0_133, %c0_134] : memref<9x64x32xbf16, #tpu.memory_space<vmem>>, vector<1x64x32xbf16>
    %153 = vector.shape_cast %152 : vector<1x64x32xbf16> to vector<64x32xbf16>
    %cst_135 = arith.constant dense<0.000000e+00> : vector<16x32xf32>
    %154 = tpu.matmul %143, %153, %cst_135 {dimension_numbers = #tpu.dot_dimension_numbers<[1], [0], [0], [1], [0, 0, 1, 1], [], []>} : vector<16x64xbf16>, vector<64x32xbf16>, vector<16x32xf32> -> vector<16x32xf32>
    %155 = arith.truncf %154 : vector<16x32xf32> to vector<16x32xbf16>
    %c3_136 = arith.constant 3 : index
    %c0_137 = arith.constant 0 : index
    %c0_138 = arith.constant 0 : index
    %156 = vector.load %arg13[%c3_136, %c0_137, %c0_138] : memref<9x64x32xbf16, #tpu.memory_space<vmem>>, vector<1x64x32xbf16>
    %157 = vector.shape_cast %156 : vector<1x64x32xbf16> to vector<64x32xbf16>
    %cst_139 = arith.constant dense<0.000000e+00> : vector<16x32xf32>
    %158 = tpu.matmul %143, %157, %cst_139 {dimension_numbers = #tpu.dot_dimension_numbers<[1], [0], [0], [1], [0, 0, 1, 1], [], []>} : vector<16x64xbf16>, vector<64x32xbf16>, vector<16x32xf32> -> vector<16x32xf32>
    %159 = arith.truncf %158 : vector<16x32xf32> to vector<16x32xbf16>
    %c4_140 = arith.constant 4 : index
    %c0_141 = arith.constant 0 : index
    %c0_142 = arith.constant 0 : index
    %160 = vector.load %arg13[%c4_140, %c0_141, %c0_142] : memref<9x64x32xbf16, #tpu.memory_space<vmem>>, vector<1x64x32xbf16>
    %161 = vector.shape_cast %160 : vector<1x64x32xbf16> to vector<64x32xbf16>
    %cst_143 = arith.constant dense<0.000000e+00> : vector<16x32xf32>
    %162 = tpu.matmul %143, %161, %cst_143 {dimension_numbers = #tpu.dot_dimension_numbers<[1], [0], [0], [1], [0, 0, 1, 1], [], []>} : vector<16x64xbf16>, vector<64x32xbf16>, vector<16x32xf32> -> vector<16x32xf32>
    %163 = arith.truncf %162 : vector<16x32xf32> to vector<16x32xbf16>
    %c5_144 = arith.constant 5 : index
    %c0_145 = arith.constant 0 : index
    %c0_146 = arith.constant 0 : index
    %164 = vector.load %arg13[%c5_144, %c0_145, %c0_146] : memref<9x64x32xbf16, #tpu.memory_space<vmem>>, vector<1x64x32xbf16>
    %165 = vector.shape_cast %164 : vector<1x64x32xbf16> to vector<64x32xbf16>
    %cst_147 = arith.constant dense<0.000000e+00> : vector<16x32xf32>
    %166 = tpu.matmul %143, %165, %cst_147 {dimension_numbers = #tpu.dot_dimension_numbers<[1], [0], [0], [1], [0, 0, 1, 1], [], []>} : vector<16x64xbf16>, vector<64x32xbf16>, vector<16x32xf32> -> vector<16x32xf32>
    %167 = arith.truncf %166 : vector<16x32xf32> to vector<16x32xbf16>
    %c6_148 = arith.constant 6 : index
    %c0_149 = arith.constant 0 : index
    %c0_150 = arith.constant 0 : index
    %168 = vector.load %arg13[%c6_148, %c0_149, %c0_150] : memref<9x64x32xbf16, #tpu.memory_space<vmem>>, vector<1x64x32xbf16>
    %169 = vector.shape_cast %168 : vector<1x64x32xbf16> to vector<64x32xbf16>
    %cst_151 = arith.constant dense<0.000000e+00> : vector<16x32xf32>
    %170 = tpu.matmul %143, %169, %cst_151 {dimension_numbers = #tpu.dot_dimension_numbers<[1], [0], [0], [1], [0, 0, 1, 1], [], []>} : vector<16x64xbf16>, vector<64x32xbf16>, vector<16x32xf32> -> vector<16x32xf32>
    %171 = arith.truncf %170 : vector<16x32xf32> to vector<16x32xbf16>
    %c7_152 = arith.constant 7 : index
    %c0_153 = arith.constant 0 : index
    %c0_154 = arith.constant 0 : index
    %172 = vector.load %arg13[%c7_152, %c0_153, %c0_154] : memref<9x64x32xbf16, #tpu.memory_space<vmem>>, vector<1x64x32xbf16>
    %173 = vector.shape_cast %172 : vector<1x64x32xbf16> to vector<64x32xbf16>
    %cst_155 = arith.constant dense<0.000000e+00> : vector<16x32xf32>
    %174 = tpu.matmul %143, %173, %cst_155 {dimension_numbers = #tpu.dot_dimension_numbers<[1], [0], [0], [1], [0, 0, 1, 1], [], []>} : vector<16x64xbf16>, vector<64x32xbf16>, vector<16x32xf32> -> vector<16x32xf32>
    %175 = arith.truncf %174 : vector<16x32xf32> to vector<16x32xbf16>
    %c8_156 = arith.constant 8 : index
    %c0_157 = arith.constant 0 : index
    %c0_158 = arith.constant 0 : index
    %176 = vector.load %arg13[%c8_156, %c0_157, %c0_158] : memref<9x64x32xbf16, #tpu.memory_space<vmem>>, vector<1x64x32xbf16>
    %177 = vector.shape_cast %176 : vector<1x64x32xbf16> to vector<64x32xbf16>
    %cst_159 = arith.constant dense<0.000000e+00> : vector<16x32xf32>
    %178 = tpu.matmul %143, %177, %cst_159 {dimension_numbers = #tpu.dot_dimension_numbers<[1], [0], [0], [1], [0, 0, 1, 1], [], []>} : vector<16x64xbf16>, vector<64x32xbf16>, vector<16x32xf32> -> vector<16x32xf32>
    %179 = arith.truncf %178 : vector<16x32xf32> to vector<16x32xbf16>
    %180 = tpu.concatenate %147, %151, %155, %159, %163, %167, %171, %175, %179 in 0 : vector<16x32xbf16>, vector<16x32xbf16>, vector<16x32xbf16>, vector<16x32xbf16>, vector<16x32xbf16>, vector<16x32xbf16>, vector<16x32xbf16>, vector<16x32xbf16>, vector<16x32xbf16> -> vector<144x32xbf16>
    %c0_160 = arith.constant 0 : index
    %c0_161 = arith.constant 0 : index
    %181 = vector.load %arg15[%c0_160, %c0_161] : memref<64x144xbf16, #tpu.memory_space<vmem>>, vector<64x144xbf16>
    %cst_162 = arith.constant dense<0.000000e+00> : vector<64x32xf32>
    %182 = tpu.matmul %181, %180, %cst_162 {dimension_numbers = #tpu.dot_dimension_numbers<[1], [0], [0], [1], [0, 0, 1, 1], [], []>} : vector<64x144xbf16>, vector<144x32xbf16>, vector<64x32xf32> -> vector<64x32xf32>
    %c0_163 = arith.constant 0 : index
    %c0_164 = arith.constant 0 : index
    %183 = vector.load %arg14[%c0_163, %c0_164] : memref<1x32xf32, #tpu.memory_space<vmem>>, vector<1x32xf32>
    %184 = vector.broadcast %183 : vector<1x32xf32> to vector<64x32xf32>
    %185 = arith.addf %182, %184 : vector<64x32xf32>
    %cst_165 = arith.constant 0.000000e+00 : f32
    %186 = vector.broadcast %cst_165 : f32 to vector<64x32xf32>
    %187 = arith.maximumf %185, %186 : vector<64x32xf32>
    %188 = arith.truncf %187 : vector<64x32xf32> to vector<64x32xbf16>
    %c0_166 = arith.constant 0 : index
    %c0_167 = arith.constant 0 : index
    %189 = vector.load %arg16[%c0_166, %c0_167] : memref<9x32xbf16, #tpu.memory_space<vmem>>, vector<9x32xbf16>
    %cst_168 = arith.constant dense<0.000000e+00> : vector<9x64xf32>
    %190 = tpu.matmul %189, %188, %cst_168 {dimension_numbers = #tpu.dot_dimension_numbers<[1], [1], [0], [0], [0, 0, 1, 0], [], []>} : vector<9x32xbf16>, vector<64x32xbf16>, vector<9x64xf32> -> vector<9x64xf32>
    %191 = vector.extract_strided_slice %190 {offsets = [0, 0], sizes = [1, 64], strides = [1, 1]} : vector<9x64xf32> to vector<1x64xf32>
    %192 = arith.truncf %191 : vector<1x64xf32> to vector<1x64xbf16>
    %c0_169 = arith.constant 0 : index
    %c0_170 = arith.constant 0 : index
    %c0_171 = arith.constant 0 : index
    %193 = vector.load %arg18[%c0_169, %c0_170, %c0_171] : memref<9x64x256xbf16, #tpu.memory_space<vmem>>, vector<1x64x256xbf16>
    %194 = vector.shape_cast %193 : vector<1x64x256xbf16> to vector<64x256xbf16>
    %cst_172 = arith.constant dense<0.000000e+00> : vector<1x256xf32>
    %195 = tpu.matmul %192, %194, %cst_172 {dimension_numbers = #tpu.dot_dimension_numbers<[1], [0], [0], [1], [0, 0, 1, 1], [], []>} : vector<1x64xbf16>, vector<64x256xbf16>, vector<1x256xf32> -> vector<1x256xf32>
    %196 = vector.extract_strided_slice %190 {offsets = [1, 0], sizes = [1, 64], strides = [1, 1]} : vector<9x64xf32> to vector<1x64xf32>
    %197 = arith.truncf %196 : vector<1x64xf32> to vector<1x64xbf16>
    %c1_173 = arith.constant 1 : index
    %c0_174 = arith.constant 0 : index
    %c0_175 = arith.constant 0 : index
    %198 = vector.load %arg18[%c1_173, %c0_174, %c0_175] : memref<9x64x256xbf16, #tpu.memory_space<vmem>>, vector<1x64x256xbf16>
    %199 = vector.shape_cast %198 : vector<1x64x256xbf16> to vector<64x256xbf16>
    %cst_176 = arith.constant dense<0.000000e+00> : vector<1x256xf32>
    %200 = tpu.matmul %197, %199, %cst_176 {dimension_numbers = #tpu.dot_dimension_numbers<[1], [0], [0], [1], [0, 0, 1, 1], [], []>} : vector<1x64xbf16>, vector<64x256xbf16>, vector<1x256xf32> -> vector<1x256xf32>
    %201 = arith.addf %195, %200 : vector<1x256xf32>
    %202 = vector.extract_strided_slice %190 {offsets = [2, 0], sizes = [1, 64], strides = [1, 1]} : vector<9x64xf32> to vector<1x64xf32>
    %203 = arith.truncf %202 : vector<1x64xf32> to vector<1x64xbf16>
    %c2_177 = arith.constant 2 : index
    %c0_178 = arith.constant 0 : index
    %c0_179 = arith.constant 0 : index
    %204 = vector.load %arg18[%c2_177, %c0_178, %c0_179] : memref<9x64x256xbf16, #tpu.memory_space<vmem>>, vector<1x64x256xbf16>
    %205 = vector.shape_cast %204 : vector<1x64x256xbf16> to vector<64x256xbf16>
    %cst_180 = arith.constant dense<0.000000e+00> : vector<1x256xf32>
    %206 = tpu.matmul %203, %205, %cst_180 {dimension_numbers = #tpu.dot_dimension_numbers<[1], [0], [0], [1], [0, 0, 1, 1], [], []>} : vector<1x64xbf16>, vector<64x256xbf16>, vector<1x256xf32> -> vector<1x256xf32>
    %207 = arith.addf %201, %206 : vector<1x256xf32>
    %208 = vector.extract_strided_slice %190 {offsets = [3, 0], sizes = [1, 64], strides = [1, 1]} : vector<9x64xf32> to vector<1x64xf32>
    %209 = arith.truncf %208 : vector<1x64xf32> to vector<1x64xbf16>
    %c3_181 = arith.constant 3 : index
    %c0_182 = arith.constant 0 : index
    %c0_183 = arith.constant 0 : index
    %210 = vector.load %arg18[%c3_181, %c0_182, %c0_183] : memref<9x64x256xbf16, #tpu.memory_space<vmem>>, vector<1x64x256xbf16>
    %211 = vector.shape_cast %210 : vector<1x64x256xbf16> to vector<64x256xbf16>
    %cst_184 = arith.constant dense<0.000000e+00> : vector<1x256xf32>
    %212 = tpu.matmul %209, %211, %cst_184 {dimension_numbers = #tpu.dot_dimension_numbers<[1], [0], [0], [1], [0, 0, 1, 1], [], []>} : vector<1x64xbf16>, vector<64x256xbf16>, vector<1x256xf32> -> vector<1x256xf32>
    %213 = arith.addf %207, %212 : vector<1x256xf32>
    %214 = vector.extract_strided_slice %190 {offsets = [4, 0], sizes = [1, 64], strides = [1, 1]} : vector<9x64xf32> to vector<1x64xf32>
    %215 = arith.truncf %214 : vector<1x64xf32> to vector<1x64xbf16>
    %c4_185 = arith.constant 4 : index
    %c0_186 = arith.constant 0 : index
    %c0_187 = arith.constant 0 : index
    %216 = vector.load %arg18[%c4_185, %c0_186, %c0_187] : memref<9x64x256xbf16, #tpu.memory_space<vmem>>, vector<1x64x256xbf16>
    %217 = vector.shape_cast %216 : vector<1x64x256xbf16> to vector<64x256xbf16>
    %cst_188 = arith.constant dense<0.000000e+00> : vector<1x256xf32>
    %218 = tpu.matmul %215, %217, %cst_188 {dimension_numbers = #tpu.dot_dimension_numbers<[1], [0], [0], [1], [0, 0, 1, 1], [], []>} : vector<1x64xbf16>, vector<64x256xbf16>, vector<1x256xf32> -> vector<1x256xf32>
    %219 = arith.addf %213, %218 : vector<1x256xf32>
    %220 = vector.extract_strided_slice %190 {offsets = [5, 0], sizes = [1, 64], strides = [1, 1]} : vector<9x64xf32> to vector<1x64xf32>
    %221 = arith.truncf %220 : vector<1x64xf32> to vector<1x64xbf16>
    %c5_189 = arith.constant 5 : index
    %c0_190 = arith.constant 0 : index
    %c0_191 = arith.constant 0 : index
    %222 = vector.load %arg18[%c5_189, %c0_190, %c0_191] : memref<9x64x256xbf16, #tpu.memory_space<vmem>>, vector<1x64x256xbf16>
    %223 = vector.shape_cast %222 : vector<1x64x256xbf16> to vector<64x256xbf16>
    %cst_192 = arith.constant dense<0.000000e+00> : vector<1x256xf32>
    %224 = tpu.matmul %221, %223, %cst_192 {dimension_numbers = #tpu.dot_dimension_numbers<[1], [0], [0], [1], [0, 0, 1, 1], [], []>} : vector<1x64xbf16>, vector<64x256xbf16>, vector<1x256xf32> -> vector<1x256xf32>
    %225 = arith.addf %219, %224 : vector<1x256xf32>
    %226 = vector.extract_strided_slice %190 {offsets = [6, 0], sizes = [1, 64], strides = [1, 1]} : vector<9x64xf32> to vector<1x64xf32>
    %227 = arith.truncf %226 : vector<1x64xf32> to vector<1x64xbf16>
    %c6_193 = arith.constant 6 : index
    %c0_194 = arith.constant 0 : index
    %c0_195 = arith.constant 0 : index
    %228 = vector.load %arg18[%c6_193, %c0_194, %c0_195] : memref<9x64x256xbf16, #tpu.memory_space<vmem>>, vector<1x64x256xbf16>
    %229 = vector.shape_cast %228 : vector<1x64x256xbf16> to vector<64x256xbf16>
    %cst_196 = arith.constant dense<0.000000e+00> : vector<1x256xf32>
    %230 = tpu.matmul %227, %229, %cst_196 {dimension_numbers = #tpu.dot_dimension_numbers<[1], [0], [0], [1], [0, 0, 1, 1], [], []>} : vector<1x64xbf16>, vector<64x256xbf16>, vector<1x256xf32> -> vector<1x256xf32>
    %231 = arith.addf %225, %230 : vector<1x256xf32>
    %232 = vector.extract_strided_slice %190 {offsets = [7, 0], sizes = [1, 64], strides = [1, 1]} : vector<9x64xf32> to vector<1x64xf32>
    %233 = arith.truncf %232 : vector<1x64xf32> to vector<1x64xbf16>
    %c7_197 = arith.constant 7 : index
    %c0_198 = arith.constant 0 : index
    %c0_199 = arith.constant 0 : index
    %234 = vector.load %arg18[%c7_197, %c0_198, %c0_199] : memref<9x64x256xbf16, #tpu.memory_space<vmem>>, vector<1x64x256xbf16>
    %235 = vector.shape_cast %234 : vector<1x64x256xbf16> to vector<64x256xbf16>
    %cst_200 = arith.constant dense<0.000000e+00> : vector<1x256xf32>
    %236 = tpu.matmul %233, %235, %cst_200 {dimension_numbers = #tpu.dot_dimension_numbers<[1], [0], [0], [1], [0, 0, 1, 1], [], []>} : vector<1x64xbf16>, vector<64x256xbf16>, vector<1x256xf32> -> vector<1x256xf32>
    %237 = arith.addf %231, %236 : vector<1x256xf32>
    %238 = vector.extract_strided_slice %190 {offsets = [8, 0], sizes = [1, 64], strides = [1, 1]} : vector<9x64xf32> to vector<1x64xf32>
    %239 = arith.truncf %238 : vector<1x64xf32> to vector<1x64xbf16>
    %c8_201 = arith.constant 8 : index
    %c0_202 = arith.constant 0 : index
    %c0_203 = arith.constant 0 : index
    %240 = vector.load %arg18[%c8_201, %c0_202, %c0_203] : memref<9x64x256xbf16, #tpu.memory_space<vmem>>, vector<1x64x256xbf16>
    %241 = vector.shape_cast %240 : vector<1x64x256xbf16> to vector<64x256xbf16>
    %cst_204 = arith.constant dense<0.000000e+00> : vector<1x256xf32>
    %242 = tpu.matmul %239, %241, %cst_204 {dimension_numbers = #tpu.dot_dimension_numbers<[1], [0], [0], [1], [0, 0, 1, 1], [], []>} : vector<1x64xbf16>, vector<64x256xbf16>, vector<1x256xf32> -> vector<1x256xf32>
    %243 = arith.addf %237, %242 : vector<1x256xf32>
    %c0_205 = arith.constant 0 : index
    %c0_206 = arith.constant 0 : index
    %244 = vector.load %arg17[%c0_205, %c0_206] : memref<1x1xf32, #tpu.memory_space<vmem>>, vector<1x1xf32>
    %245 = vector.broadcast %244 : vector<1x1xf32> to vector<1x256xf32>
    %246 = arith.addf %243, %245 : vector<1x256xf32>
    %247 = arith.negf %246 : vector<1x256xf32>
    %248 = math.exp %247 : vector<1x256xf32>
    %cst_207 = arith.constant 1.000000e+00 : f32
    %249 = vector.broadcast %cst_207 : f32 to vector<1x256xf32>
    %250 = arith.addf %249, %248 : vector<1x256xf32>
    %251 = arith.divf %249, %250 : vector<1x256xf32>
    %c0_208 = arith.constant 0 : index
    %c0_209 = arith.constant 0 : index
    %252 = vector.load %arg19[%c0_208, %c0_209] : memref<1x256xf32, #tpu.memory_space<vmem>>, vector<1x256xf32>
    tpu.vector_store %arg19[%c0_208, %c0_209], %251 {strides = array<i32>} : memref<1x256xf32, #tpu.memory_space<vmem>>, vector<1x256xf32>,
    return
  }
  func.func @transform_0(%arg0: i32) -> (i32, i32) {
    %c0_i32 = arith.constant 0 : i32
    %c0_i32_0 = arith.constant 0 : i32
    return %arg0, %c0_i32 : i32, i32
  }
  func.func @transform_1(%arg0: i32) -> (i32, i32) {
    %c0_i32 = arith.constant 0 : i32
    %c0_i32_0 = arith.constant 0 : i32
    %c0_i32_1 = arith.constant 0 : i32
    return %c0_i32, %c0_i32_0 : i32, i32
  }
  func.func @transform_2(%arg0: i32) -> (i32, i32) {
    %c0_i32 = arith.constant 0 : i32
    %c0_i32_0 = arith.constant 0 : i32
    %c0_i32_1 = arith.constant 0 : i32
    return %c0_i32, %c0_i32_0 : i32, i32
  }
  func.func @transform_3(%arg0: i32) -> (i32, i32, i32) {
    %c0_i32 = arith.constant 0 : i32
    %c0_i32_0 = arith.constant 0 : i32
    %c0_i32_1 = arith.constant 0 : i32
    %c0_i32_2 = arith.constant 0 : i32
    return %c0_i32, %c0_i32_0, %c0_i32_1 : i32, i32, i32
  }
  func.func @transform_4(%arg0: i32) -> (i32, i32) {
    %c0_i32 = arith.constant 0 : i32
    %c0_i32_0 = arith.constant 0 : i32
    %c0_i32_1 = arith.constant 0 : i32
    return %c0_i32, %c0_i32_0 : i32, i32
  }
  func.func @transform_5(%arg0: i32) -> (i32, i32) {
    %c0_i32 = arith.constant 0 : i32
    %c0_i32_0 = arith.constant 0 : i32
    %c0_i32_1 = arith.constant 0 : i32
    return %c0_i32, %c0_i32_0 : i32, i32
  }
  func.func @transform_6(%arg0: i32) -> (i32, i32, i32) {
    %c0_i32 = arith.constant 0 : i32
    %c0_i32_0 = arith.constant 0 : i32
    %c0_i32_1 = arith.constant 0 : i32
    %c0_i32_2 = arith.constant 0 : i32
    return %c0_i32, %c0_i32_0, %c0_i32_1 : i32, i32, i32
  }
  func.func @transform_7(%arg0: i32) -> (i32, i32) {
    %c0_i32 = arith.constant 0 : i32
    %c0_i32_0 = arith.constant 0 : i32
    %c0_i32_1 = arith.constant 0 : i32
    return %c0_i32, %c0_i32_0 : i32, i32
  }
  func.func @transform_8(%arg0: i32) -> (i32, i32) {
    %c0_i32 = arith.constant 0 : i32
    %c0_i32_0 = arith.constant 0 : i32
    %c0_i32_1 = arith.constant 0 : i32
    return %c0_i32, %c0_i32_0 : i32, i32
  }
  func.func @transform_9(%arg0: i32) -> (i32, i32) {
    %c0_i32 = arith.constant 0 : i32
    %c0_i32_0 = arith.constant 0 : i32
    %c0_i32_1 = arith.constant 0 : i32
    return %c0_i32, %c0_i32_0 : i32, i32
  }
  func.func @transform_10(%arg0: i32) -> (i32, i32) {
    %c0_i32 = arith.constant 0 : i32
    %c0_i32_0 = arith.constant 0 : i32
    %c0_i32_1 = arith.constant 0 : i32
    return %c0_i32, %c0_i32_0 : i32, i32
  }
  func.func @transform_11(%arg0: i32) -> (i32, i32, i32) {
    %c0_i32 = arith.constant 0 : i32
    %c0_i32_0 = arith.constant 0 : i32
    %c0_i32_1 = arith.constant 0 : i32
    %c0_i32_2 = arith.constant 0 : i32
    return %c0_i32, %c0_i32_0, %c0_i32_1 : i32, i32, i32
  }
  func.func @transform_12(%arg0: i32) -> (i32, i32, i32) {
    %c0_i32 = arith.constant 0 : i32
    %c0_i32_0 = arith.constant 0 : i32
    %c0_i32_1 = arith.constant 0 : i32
    %c0_i32_2 = arith.constant 0 : i32
    return %c0_i32, %c0_i32_0, %c0_i32_1 : i32, i32, i32
  }
  func.func @transform_13(%arg0: i32) -> (i32, i32) {
    %c0_i32 = arith.constant 0 : i32
    %c0_i32_0 = arith.constant 0 : i32
    %c0_i32_1 = arith.constant 0 : i32
    return %c0_i32, %c0_i32_0 : i32, i32
  }
  func.func @transform_14(%arg0: i32) -> (i32, i32) {
    %c0_i32 = arith.constant 0 : i32
    %c0_i32_0 = arith.constant 0 : i32
    %c0_i32_1 = arith.constant 0 : i32
    return %c0_i32, %c0_i32_0 : i32, i32
  }
  func.func @transform_15(%arg0: i32) -> (i32, i32) {
    %c0_i32 = arith.constant 0 : i32
    %c0_i32_0 = arith.constant 0 : i32
    %c0_i32_1 = arith.constant 0 : i32
    return %c0_i32, %c0_i32_0 : i32, i32
  }
  func.func @transform_16(%arg0: i32) -> (i32, i32) {
    %c0_i32 = arith.constant 0 : i32
    %c0_i32_0 = arith.constant 0 : i32
    %c0_i32_1 = arith.constant 0 : i32
    return %c0_i32, %c0_i32_0 : i32, i32
  }
  func.func @transform_17(%arg0: i32) -> (i32, i32, i32) {
    %c0_i32 = arith.constant 0 : i32
    %c0_i32_0 = arith.constant 0 : i32
    %c0_i32_1 = arith.constant 0 : i32
    %c0_i32_2 = arith.constant 0 : i32
    return %c0_i32, %c0_i32_0, %c0_i32_1 : i32, i32, i32
  }
  func.func @transform_18(%arg0: i32) -> (i32, i32) {
    %c0_i32 = arith.constant 0 : i32
    %c0_i32_0 = arith.constant 0 : i32
    return %c0_i32, %arg0 : i32, i32
  }
}

</mosaic_0001>

<bundles_post_ra>
// kernel: _lambda_.1
= control target key start
LH: loop header
LB: loop body
LE: loop exit
PB: predicated region body
PF: predicated region fallthrough
CT: control target
= control target key end

     0   :  { %s7315_s29 = smov 0   ;;  %s8557_s0 = inlined_call_operand.vmem [shape: bf16[128,9], index: 0, kind: input, shape index: {}]   ;;  %s8558_s1 = inlined_call_operand.vmem [shape: bf16[9,32], index: 1, kind: input, shape index: {}]   ;;  %s8559_s2 = inlined_call_operand.vmem [shape: f32[1,32], index: 2, kind: input, shape index: {}]   ;;  %s8560_s3 = inlined_call_operand.vmem [shape: bf16[9,32,64], index: 3, kind: input, shape index: {}]   ;;  %s8561_s4 = inlined_call_operand.vmem [shape: f32[1,64], index: 4, kind: input, shape index: {}]   ;;  %s8562_s5 = inlined_call_operand.vmem [shape: bf16[16,576], index: 5, kind: input, shape index: {}]   ;;  %s8563_s6 = inlined_call_operand.vmem [shape: bf16[9,64,128], index: 6, kind: input, shape index: {}]   ;;  %s8564_s7 = inlined_call_operand.vmem [shape: f32[1,128], index: 7, kind: input, shape index: {}]   ;;  %s8565_s8 = inlined_call_operand.vmem [shape: bf16[16,144], index: 8, kind: input, shape index: {}]   ;;  %s8566_s9 = inlined_call_operand.vmem [shape: bf16[1152,64], index: 9, kind: input, shape index: {}]   ;;  %s8567_s10 = inlined_call_operand.vmem [shape: f32[1,64], index: 10, kind: input, shape index: {}]   ;;  %s8568_s11 = inlined_call_operand.vmem [shape: bf16[9,16,16], index: 11, kind: input, shape index: {}]   ;;  %s8569_s12 = inlined_call_operand.vmem [shape: bf16[9,64,32], index: 12, kind: input, shape index: {}]   ;;  %s8570_s13 = inlined_call_operand.vmem [shape: f32[1,32], index: 13, kind: input, shape index: {}]   ;;  %s8571_s14 = inlined_call_operand.vmem [shape: bf16[64,144], index: 14, kind: input, shape index: {}]   ;;  %s8572_s15 = inlined_call_operand.vmem [shape: bf16[9,32], index: 15, kind: input, shape index: {}]   ;;  %s8573_s16 = inlined_call_operand.<no memory space> [shape: f32[1,1], index: 16, kind: input, shape index: {}]   ;;  %s8574_s17 = inlined_call_operand.vmem [shape: bf16[9,64,256], index: 17, kind: input, shape index: {}]   ;;  %s8575_s18 = inlined_call_operand.vmem [shape: f32[1,512], index: 18, kind: output, shape index: {}]  }
   0x1   :  { %8576 = sst [smem:[#allocation3_spill]] %s8557_s0  ;;  %v23_v0 = vstv %s8573_s16 }
   0x2   :  { %8577 = sst [smem:[#allocation4_spill]] %s8558_s1  ;;  %24 = vst [vmem:[#allocation2] sm:$0x1] %v23_v0 }
   0x3   :  { %8578 = sst [smem:[#allocation5_spill]] %s8559_s2 }
   0x4 LB: > { %s5521_s30 = sadd.s32 4294967295, %s7210_s29   ;;  %p5525_p0 = scmp.ge.s32.totalorder %s7210_s29, 1  ;;  %s7210_s29 = sphi %s7315_s29, %s30_s29  }
   0x5   : > { %p515_p1 = scmp.lt.s32.totalorder %s7210_s29, 3 }
   0x7   : > { %p516_p2 = pnand %p5525_p0, %p515_p1 }
   0x8   : > { %s8579_s1 = sld [smem:[#allocation4_spill]] (!%p516_p2)  ;;  %s5526_s16 = sshll.u32 (!%p516_p2), %s5521_s30, 3 }
   0x9   : > { %519 = sbr.rel (%p516_p2) target bundleno = 2744 (0xab8), region = 92  ;;  %p569_p3 = scmp.lt.s32.totalorder (!%p516_p2), %s5526_s16, 15 }
   0xa   : > { %s8580_s2 = sld [smem:[#allocation3_spill]] (!%p516_p2)  ;;  %s5528_s22 = sshll.u32 (!%p516_p2), %s5521_s30, 1 }
   0xb   : > { %s8581_s24 = sld [smem:[#allocation5_spill]] (!%p516_p2)  ;;  %p575_p4 = scmp.lt.s32.totalorder (!%p516_p2), %s5528_s22, 3 }
   0xe   : > { %v6889_v1 = vld [vmem:[%s8579_s1] sm:$0x1f]   ;;  %vm635_vm0 = vcmask 1043456   ;;  %vm636_vm1 = vcmask 1044480   ;;  %vm622_vm2 = vcmask 72704   ;;  %v7212_v2 = vmov 65535  }
   0xf   : > { %v637_v3 = vsel %vm635_vm0, 4294967295, %v7212_v2  ;;  %s8583_s16 = smov (!%p569_p3, %s5526_s16), 15  ;;  %v6894_v10 = vld [vmem:[%s8560_s3 + $0x18] sm:$0xff]   ;;  %v6895_v11 = vld [vmem:[%s8560_s3 + $0x8] sm:$0xff]   ;;  %v6896_v12 = vld [vmem:[%s8560_s3] sm:$0xff]   ;;  %vm735_vm3 = vcmask 261120  }
  0x10   : > { %v638_v4 = vsel %vm636_vm1, %v637_v3, 0  ;;  %s5527_s20 = sshll.u32 %s8583_s16, 2  ;;  %6453 = vmatprep.subr.bf16.mxu1 %v6895_v11  ;;  %v6897_v13 = vld [vmem:[%s8560_s3 + $0x10] sm:$0xff]   ;;  %v6898_v14 = vld [vmem:[%s8560_s3 + $0x38] sm:$0xff]   ;;  %v6899_v15 = vld [vmem:[%s8560_s3 + $0x28] sm:$0xff]   ;;  %vm7214_vm4 = vmmov 0  }
  0x11   : > { %v640_v5 = vand.u32 %v6889_v1, %v638_v4  ;;  %s572_s23 = scalar_lea.vmem %s8580_s2, %s5527_s20  ;;  %6454 = vmatpush3.bf16.msra.mxu1 %v6895_v11  ;;  %v5529_v18 = vld [vmem:[%s8581_s24] ss:$0 sm:$0xff]  ;;  %v6901_v35 = vld [vmem:[%s8560_s3 + $0x30] sm:$0xff]   ;;  %v6902_v42 = vld [vmem:[%s8560_s3 + $0x58] sm:$0xff]   ;;  %vm1543_vm5 = vcmask 523264   ;;  %vm2368_vm6 = vcmask 130048  }
  0x12   : > { %v6890_v6 = vld [vmem:[%s572_s23] sm:$0xff]   ;;  %v6891_v7 = vld [vmem:[%s572_s23 + $0x8] sm:$0xff]   ;;  %v6892_v8 = vld [vmem:[%s572_s23 + $0x10] sm:$0xff]   ;;  %6455 = vmatprep.subr.bf16.mxu1 %v6896_v12  ;;  %s8585_s22 = smov (!%p575_p4, %s5528_s22), 3 }
  0x13   : > { %6443 = vmatprep.subr.bf16.mxu0 %v640_v5  ;;  %6445 = vmatprep.mubr.msk.bf16.mxu0 %vm622_vm2, %v6890_v6  ;;  %v6893_v9 = vld [vmem:[%s572_s23 + $0x18] sm:$0xff]   ;;  %v6900_v34 = vld [vmem:[%s8560_s3 + $0x20] sm:$0xff]   ;;  %v6903_v43 = vld [vmem:[%s8560_s3 + $0x48] sm:$0xff]   ;;  %s577_s24 = scalar_lea.vmem %s8575_s18, %s8585_s22 }
  0x14   : > { %6444 = vmatpush3.bf16.msra.mxu0 %v640_v5  ;;  %v6904_v49 = vld [vmem:[%s8560_s3 + $0x40] sm:$0xff]   ;;  %v6905_v50 = vld [vmem:[%s8560_s3 + $0x50] sm:$0xff]   ;;  %v6906_v51 = vld [vmem:[%s8560_s3 + $0x78] sm:$0xff]  }
  0x15   : > { %6465 = vmatprep.subr.bf16.mxu0 %v6894_v10  ;;  %6456 = vmatpush3.bf16.msra.mxu1 %v6896_v12  ;;  %v6907_v52 = vld [vmem:[%s8560_s3 + $0x68] sm:$0xff]   ;;  %v6908_v53 = vld [vmem:[%s8560_s3 + $0x60] sm:$0xff]   ;;  %v6909_v54 = vld [vmem:[%s8560_s3 + $0x70] sm:$0xff]  }
  0x16   : > { %6477 = vmatprep.subr.bf16.mxu1 %v6899_v15  ;;  %v6910_v55 = vld [vmem:[%s8560_s3 + $0x88] sm:$0xff]   ;;  %v6911_v56 = vld [vmem:[%s8560_s3 + $0x80] sm:$0xff]  }
  0x17   : > { %6446 = vmatmul.mubr.msk.bf16.vlgmr.msra.gmra.mxu0 %vm622_vm2, %v6891_v7  ;;  %v6914_v57 = vld [vmem:[%s8562_s5 + $0x4] ss:$20 sps:$4 sm:$0xff]   ;;  %v6917_v58 = vld [vmem:[%s8562_s5 + $0xc] ss:$20 sps:$4 sm:$0xff]  }
  0x18   : > { %6449 = vmatprep.mubr.msk.bf16.mxu0 %vm622_vm2, %v6892_v8  ;;  %6466 = vmatpush3.bf16.msra.mxu0 %v6894_v10 }
  0x19   : > { %6467 = vmatprep.subr.bf16.mxu0 %v6897_v13 }
  0x1c   : > { %6468 = vmatpush3.bf16.msra.mxu0 %v6897_v13 }
  0x1d   : > { %6489 = vmatprep.subr.bf16.mxu0 %v6898_v14 }
  0x1f   : > { %6450 = vmatmul.mubr.msk.bf16.gmra.mxu0 %vm622_vm2, %v6893_v9 }
  0xd7   : > { %v6447_v16 = vpop.f32.mrf.mxu0 }
  0xd8   : > { %v685_v22 = vadd.f32 %v6447_v16, %v5529_v18 }
  0xd9   : > { %v676_v17 = vpop.f32.mrf.mxu0 }
  0xda   : > { %v677_v20 = vadd.f32 %v5529_v18, %v676_v17  ;;  %v709_v29 = vmax.f32 %v685_v22, 0.0 }
  0xdb   : > { %v6448_v19 = vpop.f32.mrf.mxu0 }
  0xdc   : > { %v688_v21 = vadd.f32 %v6448_v19, %v5529_v18  ;;  %v707_v27 = vmax.f32 %v677_v20, 0.0 }
  0xdd   : > { %v679_v23 = vpop.f32.mrf.mxu0 }
  0xde   : > { %v680_v24 = vadd.f32 %v5529_v18, %v679_v23  ;;  %v710_v25 = vmax.f32 %v688_v21, 0.0 }
  0xdf   : > { %v6451_v26 = vpop.f32.mrf.mxu0 }
  0xe0   : > { %v708_v28 = vmax.f32 %v680_v24, 0.0  ;;  %v7358_v32 = vpack.c.bf16 %v710_v25, %v709_v29  ;;  %v701_v38 = vadd.f32 %v6451_v26, %v5529_v18 }
  0xe1   : > { %v692_v30 = vpop.f32.mrf.mxu0 }
  0xe2   : > { %v7356_v31 = vpack.c.bf16 %v708_v28, %v707_v27  ;;  %v693_v36 = vadd.f32 %v5529_v18, %v692_v30  ;;  %v713_v46 = vmax.f32 %v701_v38, 0.0 }
  0xe3   : > { %v6452_v33 = vpop.f32.mrf.mxu0 }
  0xe4   : > { %v704_v37 = vadd.f32 %v6452_v33, %v5529_v18  ;;  %6457 = vmatprep.mubr.msk.bf16.mxu1 %vm735_vm3, %v7356_v31  ;;  %6469 = vmatprep.mubr.msk.bf16.mxu0 %vm735_vm3, %v7356_v31  ;;  %v711_v44 = vmax.f32 %v693_v36, 0.0 }
  0xe5   : > { %v695_v39 = vpop.f32.mrf.mxu0  ;;  %6458 = vmatmul.mubr.msk.bf16.vlgmr.msra.gmra.mxu1 %vm735_vm3, %v7358_v32  ;;  %6470 = vmatmul.mubr.msk.bf16.vlgmr.msra.gmra.mxu0 %vm735_vm3, %v7358_v32 }
  0xe6   : > { %v696_v40 = vadd.f32 %v5529_v18, %v695_v39  ;;  %6490 = vmatpush3.bf16.msra.mxu0 %v6898_v14  ;;  %6478 = vmatpush3.bf16.msra.mxu1 %v6899_v15  ;;  %v714_v41 = vmax.f32 %v704_v37, 0.0 }
  0xe7   : > { %6479 = vmatprep.subr.bf16.mxu1 %v6900_v34  ;;  %6491 = vmatprep.subr.bf16.mxu0 %v6901_v35 }
  0xe8   : > { %v712_v45 = vmax.f32 %v696_v40, 0.0  ;;  %v718_v48 = vpack.c.bf16 %v714_v41, %v713_v46 }
  0xea   : > { %v717_v47 = vpack.c.bf16 %v712_v45, %v711_v44  ;;  %6480 = vmatpush3.bf16.msra.mxu1 %v6900_v34  ;;  %6492 = vmatpush3.bf16.msra.mxu0 %v6901_v35 }
  0xeb   : > { %6513 = vmatprep.subr.bf16.mxu0 %v6902_v42  ;;  %6501 = vmatprep.subr.bf16.mxu1 %v6903_v43 }
  0xec   : > { %6461 = vmatprep.mubr.msk.bf16.mxu1 %vm735_vm3, %v717_v47  ;;  %6473 = vmatprep.mubr.msk.bf16.mxu0 %vm735_vm3, %v717_v47 }
  0xed   : > { %6462 = vmatmul.mubr.msk.bf16.gmra.mxu1 %vm735_vm3, %v718_v48  ;;  %6474 = vmatmul.mubr.msk.bf16.gmra.mxu0 %vm735_vm3, %v718_v48 }
  0xee   : > { %6481 = vmatprep.mubr.msk.bf16.mxu1 %vm735_vm3, %v7356_v31  ;;  %6493 = vmatprep.mubr.msk.bf16.mxu0 %vm735_vm3, %v7356_v31 }
  0xf5   : > { %6482 = vmatmul.mubr.msk.bf16.vlgmr.msra.gmra.mxu1 %vm735_vm3, %v7358_v32  ;;  %6494 = vmatmul.mubr.msk.bf16.vlgmr.msra.gmra.mxu0 %vm735_vm3, %v7358_v32 }
  0xf6   : > { %6485 = vmatprep.mubr.msk.bf16.mxu1 %vm735_vm3, %v717_v47  ;;  %6497 = vmatprep.mubr.msk.bf16.mxu0 %vm735_vm3, %v717_v47 }
  0xf7   : > { %6514 = vmatpush3.bf16.msra.mxu0 %v6902_v42  ;;  %6502 = vmatpush3.bf16.msra.mxu1 %v6903_v43 }
  0xf8   : > { %6503 = vmatprep.subr.bf16.mxu1 %v6904_v49  ;;  %6515 = vmatprep.subr.bf16.mxu0 %v6905_v50 }
  0xfb   : > { %6504 = vmatpush3.bf16.msra.mxu1 %v6904_v49  ;;  %6516 = vmatpush3.bf16.msra.mxu0 %v6905_v50 }
  0xfc   : > { %6537 = vmatprep.subr.bf16.mxu0 %v6906_v51  ;;  %6525 = vmatprep.subr.bf16.mxu1 %v6907_v52 }
  0xfd   : > { %6486 = vmatmul.mubr.msk.bf16.gmra.mxu1 %vm735_vm3, %v718_v48  ;;  %6498 = vmatmul.mubr.msk.bf16.gmra.mxu0 %vm735_vm3, %v718_v48 }
  0xfe   : > { %6505 = vmatprep.mubr.msk.bf16.mxu1 %vm735_vm3, %v7356_v31  ;;  %6517 = vmatprep.mubr.msk.bf16.mxu0 %vm735_vm3, %v7356_v31 }
 0x105   : > { %6506 = vmatmul.mubr.msk.bf16.vlgmr.msra.gmra.mxu1 %vm735_vm3, %v7358_v32  ;;  %6518 = vmatmul.mubr.msk.bf16.vlgmr.msra.gmra.mxu0 %vm735_vm3, %v7358_v32 }
 0x106   : > { %6509 = vmatprep.mubr.msk.bf16.mxu1 %vm735_vm3, %v717_v47  ;;  %6521 = vmatprep.mubr.msk.bf16.mxu0 %vm735_vm3, %v717_v47 }
 0x107   : > { %6538 = vmatpush3.bf16.msra.mxu0 %v6906_v51  ;;  %6526 = vmatpush3.bf16.msra.mxu1 %v6907_v52 }
 0x108   : > { %6527 = vmatprep.subr.bf16.mxu1 %v6908_v53  ;;  %6539 = vmatprep.subr.bf16.mxu0 %v6909_v54 }
 0x10b   : > { %6528 = vmatpush3.bf16.msra.mxu1 %v6908_v53  ;;  %6540 = vmatpush3.bf16.msra.mxu0 %v6909_v54 }
 0x10c   : > { %6549 = vmatprep.subr.bf16.mxu1 %v6910_v55 }
 0x10d   : > { %6510 = vmatmul.mubr.msk.bf16.gmra.mxu1 %vm735_vm3, %v718_v48  ;;  %6522 = vmatmul.mubr.msk.bf16.gmra.mxu0 %vm735_vm3, %v718_v48 }
 0x10e   : > { %6529 = vmatprep.mubr.msk.bf16.mxu1 %vm735_vm3, %v7356_v31  ;;  %6541 = vmatprep.mubr.msk.bf16.mxu0 %vm735_vm3, %v7356_v31 }
 0x115   : > { %6530 = vmatmul.mubr.msk.bf16.vlgmr.msra.gmra.mxu1 %vm735_vm3, %v7358_v32  ;;  %6542 = vmatmul.mubr.msk.bf16.vlgmr.msra.gmra.mxu0 %vm735_vm3, %v7358_v32 }
 0x116   : > { %6533 = vmatprep.mubr.msk.bf16.mxu1 %vm735_vm3, %v717_v47  ;;  %6545 = vmatprep.mubr.msk.bf16.mxu0 %vm735_vm3, %v717_v47 }
 0x117   : > { %6550 = vmatpush3.bf16.msra.mxu1 %v6910_v55 }
 0x118   : > { %6551 = vmatprep.subr.bf16.mxu1 %v6911_v56 }
 0x11b   : > { %6552 = vmatpush3.bf16.msra.mxu1 %v6911_v56 }
 0x11d   : > { %6534 = vmatmul.mubr.msk.bf16.gmra.mxu1 %vm735_vm3, %v718_v48  ;;  %6546 = vmatmul.mubr.msk.bf16.gmra.mxu0 %vm735_vm3, %v718_v48 }
 0x11e   : > { %6553 = vmatprep.mubr.msk.bf16.mxu1 %vm735_vm3, %v7356_v31  ;;  %1579 = vmatprep.mubr.bf16.mxu0 %v6914_v57 }
 0x125   : > { %6554 = vmatmul.mubr.msk.bf16.vlgmr.msra.gmra.mxu1 %vm735_vm3, %v7358_v32 }
 0x126   : > { %6557 = vmatprep.mubr.msk.bf16.mxu1 %vm735_vm3, %v717_v47 }
 0x12d   : > { %6558 = vmatmul.mubr.msk.bf16.gmra.mxu1 %vm735_vm3, %v718_v48 }
 0x12e   : > { %1620 = vmatprep.mubr.bf16.mxu1 %v6917_v58 }
 0x1a5   : > { %v7456_v59 = vpop.f32.mrf.mxu1  ;;  %v6471_v60 = vpop.f32.mrf.mxu0 }
 0x1a7   : > { %v7458_v61 = vpop.f32.mrf.mxu1  ;;  %v868_v62 = vpop.f32.mrf.mxu0 }
 0x1a9   : > { %v7460_v63 = vpop.f32.mrf.mxu1  ;;  %v6472_v0 = vpop.f32.mrf.mxu0 }
 0x1aa   : > { %v900_v38 = vpack.c.bf16 %v6472_v0, %v6471_v60 }
 0x1ab   : > { %v7462_v1 = vpop.f32.mrf.mxu1  ;;  %v871_v2 = vpop.f32.mrf.mxu0 }
 0x1ac   : > { %v899_v44 = vpack.c.bf16 %v871_v2, %v868_v62  ;;  %v814_v2 = vpack.c.bf16 %v7460_v63, %v7456_v59 }
 0x1ad   : > { %v6463_v3 = vpop.f32.mrf.mxu1  ;;  %v6475_v4 = vpop.f32.mrf.mxu0 }
 0x1af   : > { %v7464_v5 = vpop.f32.mrf.mxu1  ;;  %v884_v6 = vpop.f32.mrf.mxu0 }
 0x1b1   : > { %v6464_v7 = vpop.f32.mrf.mxu1  ;;  %v6476_v8 = vpop.f32.mrf.mxu0 }
 0x1b2   : > { %v902_v26 = vpack.c.bf16 %v6476_v8, %v6475_v4  ;;  %v816_v50 = vpack.c.bf16 %v6464_v7, %v6463_v3  ;;  %v813_v8 = vpack.c.bf16 %v7462_v1, %v7458_v61 }
 0x1b3   : > { %v7466_v9 = vpop.f32.mrf.mxu1  ;;  %v887_v10 = vpop.f32.mrf.mxu0 }
 0x1b4   : > { %v901_v32 = vpack.c.bf16 %v887_v10, %v884_v6  ;;  %v815_v56 = vpack.c.bf16 %v7466_v9, %v7464_v5 }
 0x1b5   : > { %v7468_v11 = vpop.f32.mrf.mxu1  ;;  %v6495_v12 = vpop.f32.mrf.mxu0 }
 0x1b7   : > { %v7470_v13 = vpop.f32.mrf.mxu1  ;;  %v1040_v14 = vpop.f32.mrf.mxu0 }
 0x1b9   : > { %v6484_v15 = vpop.f32.mrf.mxu1  ;;  %v6496_v16 = vpop.f32.mrf.mxu0 }
 0x1ba   : > { %v1072_v35 = vpack.c.bf16 %v6496_v16, %v6495_v12  ;;  %v986_v60 = vpack.c.bf16 %v6484_v15, %v7468_v11  ;;  %v6912_v11 = vld [vmem:[%s8562_s5] ss:$20 sps:$4 sm:$0xff]  }
 0x1bb   : > { %v7472_v17 = vpop.f32.mrf.mxu1  ;;  %v1043_v18 = vpop.f32.mrf.mxu0 }
 0x1bc   : > { %v1071_v41 = vpack.c.bf16 %v1043_v18, %v1040_v14  ;;  %v985_v6 = vpack.c.bf16 %v7472_v17, %v7470_v13  ;;  %v7213_v14 = vmov 0.0  }
 0x1bd   : > { %v6487_v19 = vpop.f32.mrf.mxu1  ;;  %v6499_v20 = vpop.f32.mrf.mxu0 }
 0x1bf   : > { %v970_v21 = vpop.f32.mrf.mxu1  ;;  %v1056_v22 = vpop.f32.mrf.mxu0 }
 0x1c1   : > { %v6488_v23 = vpop.f32.mrf.mxu1  ;;  %v6500_v24 = vpop.f32.mrf.mxu0 }
 0x1c2   : > { %v1074_v25 = vpack.c.bf16 %v6500_v24, %v6499_v20  ;;  %v988_v47 = vpack.c.bf16 %v6488_v23, %v6487_v19 }
 0x1c3   : > { %v973_v27 = vpop.f32.mrf.mxu1  ;;  %v1059_v28 = vpop.f32.mrf.mxu0 }
 0x1c4   : > { %v1073_v29 = vpack.c.bf16 %v1059_v28, %v1056_v22  ;;  %6184 = vmatprep.subr.bf16.mxu0 %v1074_v25  ;;  %v987_v53 = vpack.c.bf16 %v973_v27, %v970_v21 }
 0x1c5   : > { %v7474_v30 = vpop.f32.mrf.mxu1  ;;  %v7476_v31 = vpop.f32.mrf.mxu0  ;;  %6185 = vmatpush3.bf16.msra.mxu0 %v902_v26 }
 0x1c6   : > { %6186 = vmatprep.subr.bf16.mxu0 %v1073_v29 }
 0x1c7   : > { %v7478_v33 = vpop.f32.mrf.mxu1  ;;  %v7480_v34 = vpop.f32.mrf.mxu0 }
 0x1c9   : > { %v7482_v36 = vpop.f32.mrf.mxu1  ;;  %v7484_v37 = vpop.f32.mrf.mxu0  ;;  %6187 = vmatpush3.bf16.msra.mxu0 %v901_v32 }
 0x1ca   : > { %6188 = vmatprep.subr.bf16.mxu0 %v1072_v35  ;;  %v1244_v21 = vpack.c.bf16 %v7484_v37, %v7476_v31 }
 0x1cb   : > { %v7486_v39 = vpop.f32.mrf.mxu1  ;;  %v7488_v40 = vpop.f32.mrf.mxu0 }
 0x1cc   : > { %v1243_v25 = vpack.c.bf16 %v7488_v40, %v7480_v34 }
 0x1cd   : > { %v7490_v42 = vpop.f32.mrf.mxu1  ;;  %v6523_v43 = vpop.f32.mrf.mxu0  ;;  %6189 = vmatpush3.bf16.msra.mxu0 %v900_v38 }
 0x1ce   : > { %6190 = vmatprep.subr.bf16.mxu0 %v1071_v41  ;;  %v1158_v41 = vpack.c.bf16 %v7482_v36, %v7474_v30  ;;  %v6915_v30 = vld [vmem:[%s8562_s5 + $0x8] ss:$20 sps:$4 sm:$0xff]  }
 0x1cf   : > { %v7492_v45 = vpop.f32.mrf.mxu1  ;;  %v1228_v46 = vpop.f32.mrf.mxu0  ;;  %v6920_v36 = vld [vmem:[%s8563_s6 + $0x38] sm:$0xff]  }
 0x1d1   : > { %v7494_v48 = vpop.f32.mrf.mxu1  ;;  %v6524_v49 = vpop.f32.mrf.mxu0  ;;  %6191 = vmatpush3.bf16.msra.mxu0 %v899_v44  ;;  %v1157_v44 = vpack.c.bf16 %v7486_v39, %v7478_v33  ;;  %v6919_v33 = vld [vmem:[%s8563_s6 + $0x18] sm:$0xff]   ;;  %v6921_v39 = vld [vmem:[%s8563_s6 + $0x10] sm:$0xff]  }
 0x1d2   : > { %6192 = vmatprep.subr.bf16.mxu0 %v988_v47  ;;  %v1246_v13 = vpack.c.bf16 %v6524_v49, %v6523_v43  ;;  %v1160_v32 = vpack.c.bf16 %v7494_v48, %v7490_v42  ;;  %v6923_v47 = vld [vmem:[%s8563_s6 + $0x8] sm:$0xff]   ;;  %v6925_v49 = vld [vmem:[%s8563_s6] sm:$0xff]  }
 0x1d3   : > { %v7496_v51 = vpop.f32.mrf.mxu1  ;;  %v1231_v52 = vpop.f32.mrf.mxu0  ;;  %v6924_v48 = vld [vmem:[%s8563_s6 + $0x28] sm:$0xff]  }
 0x1d4   : > { %v1245_v1 = vpack.c.bf16 %v1231_v52, %v1228_v46  ;;  %v1159_v34 = vpack.c.bf16 %v7496_v51, %v7492_v45  ;;  %v6918_v45 = vld [vmem:[%s8562_s5 + $0x10] ss:$20 sps:$4 sm:$0xff]  }
 0x1d5   : > { %v7498_v54 = vpop.f32.mrf.mxu1  ;;  %v6543_v55 = vpop.f32.mrf.mxu0  ;;  %6193 = vmatpush3.bf16.msra.mxu0 %v816_v50  ;;  %v6922_v46 = vld [vmem:[%s8563_s6 + $0x30] sm:$0xff]   ;;  %v6926_v50 = vld [vmem:[%s8563_s6 + $0x20] sm:$0xff]  }
 0x1d6   : > { %6194 = vmatprep.subr.bf16.mxu0 %v987_v53 }
 0x1d7   : > { %v7502_v57 = vpop.f32.mrf.mxu1  ;;  %v1384_v58 = vpop.f32.mrf.mxu0 }
 0x1d9   : > { %v7505_v62 = vpop.f32.mrf.mxu1  ;;  %v6544_v0 = vpop.f32.mrf.mxu0  ;;  %6195 = vmatpush3.bf16.msra.mxu0 %v815_v56 }
 0x1da   : > { %6196 = vmatprep.subr.bf16.mxu0 %v986_v60  ;;  %v1416_v19 = vpack.c.bf16 %v6544_v0, %v6543_v55  ;;  %v1330_v37 = vpack.c.bf16 %v7505_v62, %v7498_v54 }
 0x1db   : > { %v7509_v3 = vpop.f32.mrf.mxu1  ;;  %v1387_v4 = vpop.f32.mrf.mxu0 }
 0x1dc   : > { %v1415_v23 = vpack.c.bf16 %v1387_v4, %v1384_v58  ;;  %v1329_v42 = vpack.c.bf16 %v7509_v3, %v7502_v57  ;;  %v5625_v57 = vld [vmem:[%s8561_s4] ss:$0 sm:$0xff] }
 0x1dd   : > { %v6535_v5 = vpop.f32.mrf.mxu1  ;;  %v6547_v7 = vpop.f32.mrf.mxu0  ;;  %6197 = vmatpush3.bf16.msra.mxu0 %v814_v2 }
 0x1de   : > { %6198 = vmatprep.subr.bf16.mxu0 %v985_v6 }
 0x1df   : > { %v1314_v9 = vpop.f32.mrf.mxu1  ;;  %v1400_v10 = vpop.f32.mrf.mxu0 }
 0x1e1   : > { %v6536_v59 = vpop.f32.mrf.mxu1  ;;  %v6548_v63 = vpop.f32.mrf.mxu0  ;;  %6199 = vmatpush3.bf16.msra.mxu0 %v813_v8 }
 0x1e2   : > { %v1418_v12 = vpack.c.bf16 %v6548_v63, %v6547_v7  ;;  %6561 = vmatprep.subr.bf16.mxu0 %v7213_v14  ;;  %v1332_v27 = vpack.c.bf16 %v6536_v59, %v6535_v5 }
 0x1e3   : > { %v1317_v15 = vpop.f32.mrf.mxu1  ;;  %v1403_v16 = vpop.f32.mrf.mxu0 }
 0x1e4   : > { %v1417_v17 = vpack.c.bf16 %v1403_v16, %v1400_v10  ;;  %6206 = vmatprep.subr.bf16.mxu1 %v1418_v12  ;;  %1580 = vmatmul.mubr.bf16.vlgmr.msra.gmra.mxu0 %v6912_v11  ;;  %v1331_v38 = vpack.c.bf16 %v1317_v15, %v1314_v9  ;;  %v6927_v15 = vld [vmem:[%s8563_s6 + $0x58] sm:$0xff]  }
 0x1e5   : > { %v6555_v61 = vpop.f32.mrf.mxu1  ;;  %6207 = vmatpush3.bf16.msra.mxu1 %v1246_v13  ;;  %6569 = vmatprep.mubr.msk.bf16.mxu0 %vm7214_vm4, %v7213_v14  ;;  %v6928_v16 = vld [vmem:[%s8563_s6 + $0x78] sm:$0xff]  }
 0x1e6   : > { %6208 = vmatprep.subr.bf16.mxu1 %v1417_v17 }
 0x1e7   : > { %v1470_v18 = vpop.f32.mrf.mxu1 }
 0x1e9   : > { %v6556_v20 = vpop.f32.mrf.mxu1  ;;  %6209 = vmatpush3.bf16.msra.mxu1 %v1245_v1  ;;  %v6930_v1 = vld [vmem:[%s8563_s6 + $0x70] sm:$0xff]  }
 0x1ea   : > { %6210 = vmatprep.subr.bf16.mxu1 %v1416_v19  ;;  %v1502_v40 = vpack.c.bf16 %v6556_v20, %v6555_v61  ;;  %v6929_v61 = vld [vmem:[%s8563_s6 + $0x50] sm:$0xff]   ;;  %v6932_v19 = vld [vmem:[%s8563_s6 + $0x68] sm:$0xff]   ;;  %v6933_v20 = vld [vmem:[%s8563_s6 + $0x40] sm:$0xff]  }
 0x1eb   : > { %v1473_v22 = vpop.f32.mrf.mxu1 }
 0x1ec   : > { %v1501_v43 = vpack.c.bf16 %v1473_v22, %v1470_v18  ;;  %v6931_v18 = vld [vmem:[%s8563_s6 + $0x48] sm:$0xff]   ;;  %v6935_v22 = vld [vmem:[%s8563_s6 + $0x98] sm:$0xff]  }
 0x1ed   : > { %v6559_v24 = vpop.f32.mrf.mxu1  ;;  %6211 = vmatpush3.bf16.msra.mxu1 %v1244_v21  ;;  %v6934_v21 = vld [vmem:[%s8563_s6 + $0x60] sm:$0xff]  }
 0x1ee   : > { %6212 = vmatprep.subr.bf16.mxu1 %v1415_v23  ;;  %v6936_v23 = vld [vmem:[%s8563_s6 + $0xb8] sm:$0xff]  }
 0x1ef   : > { %v1486_v26 = vpop.f32.mrf.mxu1 }
 0x1f1   : > { %v6560_v28 = vpop.f32.mrf.mxu1  ;;  %6213 = vmatpush3.bf16.msra.mxu1 %v1243_v25  ;;  %v6938_v25 = vld [vmem:[%s8563_s6 + $0xb0] sm:$0xff]  }
 0x1f2   : > { %v1504_v29 = vpack.c.bf16 %v6560_v28, %v6559_v24  ;;  %6214 = vmatprep.subr.bf16.mxu1 %v1332_v27  ;;  %v6937_v24 = vld [vmem:[%s8563_s6 + $0x90] sm:$0xff]   ;;  %v6940_v27 = vld [vmem:[%s8563_s6 + $0xa8] sm:$0xff]   ;;  %v6941_v28 = vld [vmem:[%s8563_s6 + $0x80] sm:$0xff]  }
 0x1f3   : > { %v1489_v35 = vpop.f32.mrf.mxu1 }
 0x1f4   : > { %6562 = vmatpush3.bf16.msra.mxu0 %v1504_v29  ;;  %v1503_v31 = vpack.c.bf16 %v1489_v35, %v1486_v26  ;;  %v6939_v26 = vld [vmem:[%s8563_s6 + $0x88] sm:$0xff]   ;;  %v6942_v29 = vld [vmem:[%s8563_s6 + $0xa0] sm:$0xff]   ;;  %v6944_v35 = vld [vmem:[%s8563_s6 + $0xf8] sm:$0xff]  }
 0x1f5   : > { %6215 = vmatpush3.bf16.msra.mxu1 %v1160_v32  ;;  %6563 = vmatprep.subr.bf16.mxu0 %v7213_v14  ;;  %v6943_v32 = vld [vmem:[%s8563_s6 + $0xd8] sm:$0xff]  }
 0x1f6   : > { %6216 = vmatprep.subr.bf16.mxu1 %v1331_v38  ;;  %v6945_v38 = vld [vmem:[%s8563_s6 + $0xd0] sm:$0xff]  }
 0x1f8   : > { %6564 = vmatpush3.bf16.msra.mxu0 %v1503_v31  ;;  %v6946_v31 = vld [vmem:[%s8563_s6 + $0xf0] sm:$0xff]  }
 0x1f9   : > { %6217 = vmatpush3.bf16.msra.mxu1 %v1159_v34  ;;  %6565 = vmatprep.subr.bf16.mxu0 %v7213_v14  ;;  %v6947_v34 = vld [vmem:[%s8563_s6 + $0xc8] sm:$0xff]  }
 0x1fa   : > { %6218 = vmatprep.subr.bf16.mxu1 %v1330_v37  ;;  %v6948_v37 = vld [vmem:[%s8563_s6 + $0xe8] sm:$0xff]  }
 0x1fc   : > { %6566 = vmatpush3.bf16.msra.mxu0 %v1502_v40  ;;  %v6949_v40 = vld [vmem:[%s8563_s6 + $0xc0] sm:$0xff]  }
 0x1fd   : > { %6219 = vmatpush3.bf16.msra.mxu1 %v1158_v41  ;;  %6567 = vmatprep.subr.bf16.mxu0 %v7213_v14  ;;  %v6950_v41 = vld [vmem:[%s8563_s6 + $0xe0] sm:$0xff]  }
 0x1fe   : > { %6220 = vmatprep.subr.bf16.mxu1 %v1329_v42  ;;  %v6951_v42 = vld [vmem:[%s8563_s6 + $0x118] sm:$0xff]  }
 0x200   : > { %6568 = vmatpush3.bf16.msra.mxu0 %v1501_v43  ;;  %v6952_v43 = vld [vmem:[%s8563_s6 + $0x110] sm:$0xff]  }
 0x201   : > { %6221 = vmatpush3.bf16.msra.mxu1 %v1157_v44  ;;  %6585 = vmatprep.subr.bf16.mxu0 %v7213_v14  ;;  %v6953_v44 = vld [vmem:[%s8563_s6 + $0x108] sm:$0xff]  }
 0x202   : > { %6573 = vmatprep.subr.bf16.mxu1 %v7213_v14 }
 0x203   : > { %6570 = vmatmul.mubr.msk.bf16.vlgmr.msra.gmra.mxu0 %vm1543_vm5, %v6918_v45  ;;  %v6954_v45 = vld [vmem:[%s8563_s6 + $0x100] sm:$0xff]  }
 0x204   : > { %1621 = vmatmul.mubr.bf16.vlgmr.msra.gmra.mxu1 %v6915_v30  ;;  %6593 = vmatprep.mubr.msk.bf16.mxu0 %vm7214_vm4, %v7213_v14  ;;  %v7215_v30 = vmov 0  }
 0x205   : > { %6581 = vmatprep.mubr.msk.bf16.mxu1 %vm7214_vm4, %v7213_v14  ;;  %6574 = vmatpush3.bf16.msra.mxu1 %v6919_v33  ;;  %v6955_v33 = vld [vmem:[%s8565_s8 + $0x4] ss:$8 sps:$4 sm:$0xff]  }
 0x206   : > { %6586 = vmatpush3.bf16.msra.mxu0 %v6920_v36  ;;  %6575 = vmatprep.subr.bf16.mxu1 %v7213_v14 }
 0x207   : > { %6587 = vmatprep.subr.bf16.mxu0 %v7213_v14  ;;  %6888 = vset.pattern.permute.xlu0 %v7215_v30 }
 0x209   : > { %6576 = vmatpush3.bf16.msra.mxu1 %v6921_v39 }
 0x20a   : > { %6588 = vmatpush3.bf16.msra.mxu0 %v6922_v46  ;;  %6577 = vmatprep.subr.bf16.mxu1 %v7213_v14 }
 0x20b   : > { %6589 = vmatprep.subr.bf16.mxu0 %v7213_v14 }
 0x20d   : > { %6578 = vmatpush3.bf16.msra.mxu1 %v6923_v47 }
 0x20e   : > { %6590 = vmatpush3.bf16.msra.mxu0 %v6924_v48  ;;  %6579 = vmatprep.subr.bf16.mxu1 %v7213_v14 }
 0x20f   : > { %6591 = vmatprep.subr.bf16.mxu0 %v7213_v14 }
 0x211   : > { %6580 = vmatpush3.bf16.msra.mxu1 %v6925_v49 }
 0x212   : > { %6592 = vmatpush3.bf16.msra.mxu0 %v6926_v50  ;;  %6597 = vmatprep.subr.bf16.mxu1 %v7213_v14 }
 0x213   : > { %6609 = vmatprep.subr.bf16.mxu0 %v7213_v14 }
 0x2a4   : > { %v6200_v51 = vpop.f32.mrf.mxu0 }
 0x2a6   : > { %v6201_v52 = vpop.f32.mrf.mxu0 }
 0x2a7   : > { %v6202_v55 = vadd.f32 %v6201_v52, %v6200_v51 }
 0x2a8   : > { %v6203_v53 = vpop.f32.mrf.mxu0 }
 0x2a9   : > { %v1582_v0 = vadd.f32 %v6202_v55, %v5625_v57 }
 0x2aa   : > { %v6204_v54 = vpop.f32.mrf.mxu0 }
 0x2ab   : > { %v6205_v2 = vadd.f32 %v6204_v54, %v6203_v53 }
 0x2ad   : > { %v1585_v9 = vadd.f32 %v6205_v2, %v5625_v57 }
 0x2c3   : > { %v1663_v56 = vpop.f32.mrf.mxu0 }
 0x2c4   : > { %v6222_v58 = vpop.f32.mrf.mxu1 }
 0x2c5   : > { %v6571_v60 = vpop.f32.mrf.mxu0 }
 0x2c6   : > { %v6223_v62 = vpop.f32.mrf.mxu1 }
 0x2c7   : > { %v6224_v3 = vadd.f32 %v6223_v62, %v6222_v58  ;;  %v1666_v4 = vpop.f32.mrf.mxu0 }
 0x2c8   : > { %v6225_v6 = vpop.f32.mrf.mxu1 }
 0x2c9   : > { %v1623_v5 = vadd.f32 %v6224_v3, %v1582_v0  ;;  %v6572_v7 = vpop.f32.mrf.mxu0 }
 0x2ca   : > { %v6226_v8 = vpop.f32.mrf.mxu1 }
 0x2cb   : > { %v6227_v10 = vadd.f32 %v6226_v8, %v6225_v6  ;;  %v1664_v11 = vadd.f32 %v1663_v56, %v1623_v5 }
 0x2cd   : > { %v1626_v59 = vadd.f32 %v6227_v10, %v1585_v9  ;;  %v1670_v12 = vmax.f32 %v1664_v11, 0.0 }
 0x2cf   : > { %v1667_v63 = vadd.f32 %v1666_v4, %v1626_v59 }
 0x2d1   : > { %v1671_v13 = vmax.f32 %v1667_v63, 0.0 }
 0x2d3   : > { %v7594_v17 = vpack.c.bf16 %v1671_v13, %v1670_v12 }
 0x2d5   : > { %6582 = vmatmul.mubr.msk.bf16.vlgmr.msra.gmra.mxu1 %vm1543_vm5, %v7594_v17  ;;  %6594 = vmatmul.mubr.msk.bf16.vlgmr.msra.gmra.mxu0 %vm1543_vm5, %v7594_v17 }
 0x2d6   : > { %6598 = vmatpush3.bf16.msra.mxu1 %v6927_v15  ;;  %6610 = vmatpush3.bf16.msra.mxu0 %v6928_v16 }
 0x2d7   : > { %6599 = vmatprep.subr.bf16.mxu1 %v7213_v14  ;;  %6611 = vmatprep.subr.bf16.mxu0 %v7213_v14 }
 0x2d8   : > { %6605 = vmatprep.mubr.msk.bf16.mxu1 %vm7214_vm4, %v7213_v14  ;;  %6617 = vmatprep.mubr.msk.bf16.mxu0 %vm7214_vm4, %v7213_v14 }
 0x2da   : > { %6600 = vmatpush3.bf16.msra.mxu1 %v6929_v61  ;;  %6612 = vmatpush3.bf16.msra.mxu0 %v6930_v1 }
 0x2db   : > { %6601 = vmatprep.subr.bf16.mxu1 %v7213_v14  ;;  %6613 = vmatprep.subr.bf16.mxu0 %v7213_v14 }
 0x2de   : > { %6602 = vmatpush3.bf16.msra.mxu1 %v6931_v18  ;;  %6614 = vmatpush3.bf16.msra.mxu0 %v6932_v19 }
 0x2df   : > { %6603 = vmatprep.subr.bf16.mxu1 %v7213_v14  ;;  %6615 = vmatprep.subr.bf16.mxu0 %v7213_v14 }
 0x2e2   : > { %6604 = vmatpush3.bf16.msra.mxu1 %v6933_v20  ;;  %6616 = vmatpush3.bf16.msra.mxu0 %v6934_v21 }
 0x2e3   : > { %6621 = vmatprep.subr.bf16.mxu1 %v7213_v14  ;;  %6633 = vmatprep.subr.bf16.mxu0 %v7213_v14 }
 0x2e5   : > { %6606 = vmatmul.mubr.msk.bf16.vlgmr.msra.gmra.mxu1 %vm1543_vm5, %v7594_v17  ;;  %6618 = vmatmul.mubr.msk.bf16.vlgmr.msra.gmra.mxu0 %vm1543_vm5, %v7594_v17 }
 0x2e6   : > { %6622 = vmatpush3.bf16.msra.mxu1 %v6935_v22  ;;  %6634 = vmatpush3.bf16.msra.mxu0 %v6936_v23 }
 0x2e7   : > { %6623 = vmatprep.subr.bf16.mxu1 %v7213_v14  ;;  %6635 = vmatprep.subr.bf16.mxu0 %v7213_v14 }
 0x2e8   : > { %6629 = vmatprep.mubr.msk.bf16.mxu1 %vm7214_vm4, %v7213_v14  ;;  %6641 = vmatprep.mubr.msk.bf16.mxu0 %vm7214_vm4, %v7213_v14 }
 0x2ea   : > { %6624 = vmatpush3.bf16.msra.mxu1 %v6937_v24  ;;  %6636 = vmatpush3.bf16.msra.mxu0 %v6938_v25 }
 0x2eb   : > { %6625 = vmatprep.subr.bf16.mxu1 %v7213_v14  ;;  %6637 = vmatprep.subr.bf16.mxu0 %v7213_v14 }
 0x2ee   : > { %6626 = vmatpush3.bf16.msra.mxu1 %v6939_v26  ;;  %6638 = vmatpush3.bf16.msra.mxu0 %v6940_v27  ;;  %v6957_v26 = vld [vmem:[%s8565_s8] ss:$8 sps:$4 sm:$0xff]  }
 0x2ef   : > { %6627 = vmatprep.subr.bf16.mxu1 %v7213_v14  ;;  %6639 = vmatprep.subr.bf16.mxu0 %v7213_v14  ;;  %v5741_v27 = vld [vmem:[%s8564_s7] ss:$0 sm:$0xff] }
 0x2f2   : > { %6628 = vmatpush3.bf16.msra.mxu1 %v6941_v28  ;;  %6640 = vmatpush3.bf16.msra.mxu0 %v6942_v29 }
 0x2f3   : > { %6645 = vmatprep.subr.bf16.mxu1 %v7213_v14  ;;  %6657 = vmatprep.subr.bf16.mxu0 %v7213_v14 }
 0x2f5   : > { %6630 = vmatmul.mubr.msk.bf16.vlgmr.msra.gmra.mxu1 %vm1543_vm5, %v7594_v17  ;;  %6642 = vmatmul.mubr.msk.bf16.vlgmr.msra.gmra.mxu0 %vm1543_vm5, %v7594_v17 }
 0x2f6   : > { %6646 = vmatpush3.bf16.msra.mxu1 %v6943_v32  ;;  %6658 = vmatpush3.bf16.msra.mxu0 %v6944_v35 }
 0x2f7   : > { %6647 = vmatprep.subr.bf16.mxu1 %v7213_v14  ;;  %6659 = vmatprep.subr.bf16.mxu0 %v7213_v14 }
 0x2f8   : > { %6653 = vmatprep.mubr.msk.bf16.mxu1 %vm7214_vm4, %v7213_v14  ;;  %6665 = vmatprep.mubr.msk.bf16.mxu0 %vm7214_vm4, %v7213_v14 }
 0x2fa   : > { %6648 = vmatpush3.bf16.msra.mxu1 %v6945_v38  ;;  %6660 = vmatpush3.bf16.msra.mxu0 %v6946_v31 }
 0x2fb   : > { %6649 = vmatprep.subr.bf16.mxu1 %v7213_v14  ;;  %6661 = vmatprep.subr.bf16.mxu0 %v7213_v14 }
 0x2fe   : > { %6650 = vmatpush3.bf16.msra.mxu1 %v6947_v34  ;;  %6662 = vmatpush3.bf16.msra.mxu0 %v6948_v37 }
 0x2ff   : > { %6651 = vmatprep.subr.bf16.mxu1 %v7213_v14  ;;  %6663 = vmatprep.subr.bf16.mxu0 %v7213_v14 }
 0x302   : > { %6652 = vmatpush3.bf16.msra.mxu1 %v6949_v40  ;;  %6664 = vmatpush3.bf16.msra.mxu0 %v6950_v41  ;;  %v6958_v41 = vld [vmem:[%s8568_s11] sm:$0xff]  }
 0x303   : > { %6669 = vmatprep.subr.bf16.mxu1 %v7213_v14  ;;  %2372 = vmatprep.subr.bf16.mxu0 %v7215_v30 }
 0x305   : > { %6654 = vmatmul.mubr.msk.bf16.vlgmr.msra.gmra.mxu1 %vm1543_vm5, %v7594_v17  ;;  %6666 = vmatmul.mubr.msk.bf16.vlgmr.msra.gmra.mxu0 %vm1543_vm5, %v7594_v17 }
 0x306   : > { %6670 = vmatpush3.bf16.msra.mxu1 %v6951_v42  ;;  %6677 = vmatprep.mubr.msk.bf16.mxu1 %vm7214_vm4, %v7213_v14  ;;  %v6959_v42 = vld [vmem:[%s8568_s11 + $0x20] sm:$0xff]  }
 0x307   : > { %6671 = vmatprep.subr.bf16.mxu1 %v7213_v14  ;;  %5744 = vmatprep.mubr.msk.bf16.mxu0 %vm2368_vm6, %v6955_v33  ;;  %v6962_v33 = vld [vmem:[%s8568_s11 + $0x10] sm:$0xff]  }
 0x30a   : > { %6672 = vmatpush3.bf16.msra.mxu1 %v6952_v43  ;;  %v6960_v43 = vld [vmem:[%s8568_s11 + $0x8] sm:$0xff]  }
 0x30b   : > { %6673 = vmatprep.subr.bf16.mxu1 %v7213_v14 }
 0x30e   : > { %6674 = vmatpush3.bf16.msra.mxu1 %v6953_v44  ;;  %v6961_v44 = vld [vmem:[%s8568_s11 + $0x30] sm:$0xff]  }
 0x30f   : > { %6675 = vmatprep.subr.bf16.mxu1 %v7213_v14 }
 0x312   : > { %6676 = vmatpush3.bf16.msra.mxu1 %v6954_v45  ;;  %v6976_v45 = vld [vmem:[%s8566_s9 + $0xf8] sm:$0xff]  }
 0x313   : > { %6681 = vmatprep.subr.bf16.mxu1 %v7213_v14 }
 0x315   : > { %6678 = vmatmul.mubr.msk.bf16.vlgmr.msra.gmra.mxu1 %vm1543_vm5, %v7594_v17 }
 0x316   : > { %6683 = vmatprep.mubr.msk.bf16.mxu1 %vm7214_vm4, %v7213_v14 }
 0x395   : > { %v1742_v36 = vpop.f32.mrf.mxu1  ;;  %v1817_v39 = vpop.f32.mrf.mxu0 }
 0x397   : > { %v6583_v46 = vpop.f32.mrf.mxu1  ;;  %v6595_v47 = vpop.f32.mrf.mxu0 }
 0x398   : > { %v6964_v46 = vld [vmem:[%s8568_s11 + $0x28] sm:$0xff]   ;;  %v6967_v47 = vld [vmem:[%s8566_s9 + $0x78] sm:$0xff]  }
 0x399   : > { %v1745_v48 = vpop.f32.mrf.mxu1  ;;  %v1820_v49 = vpop.f32.mrf.mxu0 }
 0x39a   : > { %v1749_v50 = vpack.c.bf16 %v1745_v48, %v1742_v36  ;;  %v1824_v51 = vpack.c.bf16 %v1820_v49, %v1817_v39  ;;  %v6966_v36 = vld [vmem:[%s8568_s11 + $0x40] sm:$0xff]   ;;  %v6963_v39 = vld [vmem:[%s8568_s11 + $0x18] sm:$0xff]  }
 0x39b   : > { %v6584_v52 = vpop.f32.mrf.mxu1  ;;  %v6596_v53 = vpop.f32.mrf.mxu0  ;;  %v6965_v48 = vld [vmem:[%s8568_s11 + $0x38] sm:$0xff]  }
 0x39c   : > { %v6968_v49 = vld [vmem:[%s8566_s9 + $0x38] sm:$0xff]   ;;  %v6971_v52 = vld [vmem:[%s8566_s9 + $0x68] sm:$0xff]  }
 0x39d   : > { %v6972_v53 = vld [vmem:[%s8566_s9 + $0x28] sm:$0xff]  }
 0x3a5   : > { %v1892_v54 = vpop.f32.mrf.mxu1  ;;  %v1967_v55 = vpop.f32.mrf.mxu0 }
 0x3a7   : > { %v6607_v56 = vpop.f32.mrf.mxu1  ;;  %v6619_v57 = vpop.f32.mrf.mxu0 }
 0x3a8   : > { %v6975_v56 = vld [vmem:[%s8566_s9 + $0x58] sm:$0xff]  }
 0x3a9   : > { %v1895_v58 = vpop.f32.mrf.mxu1  ;;  %v1970_v60 = vpop.f32.mrf.mxu0  ;;  %v6977_v57 = vld [vmem:[%s8566_s9 + $0x18] sm:$0xff]  }
 0x3aa   : > { %v1974_v22 = vpack.c.bf16 %v1970_v60, %v1967_v55  ;;  %v1899_v24 = vpack.c.bf16 %v1895_v58, %v1892_v54  ;;  %v6973_v54 = vld [vmem:[%s8566_s9 + $0x60] sm:$0xff]   ;;  %v6978_v58 = vld [vmem:[%s8566_s9 + $0xb8] sm:$0xff]   ;;  %v6979_v60 = vld [vmem:[%s8566_s9 + $0x50] sm:$0xff]  }
 0x3ab   : > { %v6608_v62 = vpop.f32.mrf.mxu1  ;;  %v6620_v0 = vpop.f32.mrf.mxu0  ;;  %v6974_v55 = vld [vmem:[%s8566_s9 + $0x20] sm:$0xff]  }
 0x3ac   : > { %v6980_v62 = vld [vmem:[%s8566_s9 + $0xf0] sm:$0xff]  }
 0x3ad   : > { %v6981_v0 = vld [vmem:[%s8566_s9 + $0x10] sm:$0xff]  }
 0x3b5   : > { %v2042_v2 = vpop.f32.mrf.mxu1  ;;  %v2117_v3 = vpop.f32.mrf.mxu0 }
 0x3b7   : > { %v6631_v4 = vpop.f32.mrf.mxu1  ;;  %v6643_v6 = vpop.f32.mrf.mxu0 }
 0x3b8   : > { %v6984_v4 = vld [vmem:[%s8566_s9 + $0xe8] sm:$0xff]  }
 0x3b9   : > { %v2045_v5 = vpop.f32.mrf.mxu1  ;;  %v2120_v7 = vpop.f32.mrf.mxu0  ;;  %v6985_v6 = vld [vmem:[%s8566_s9 + $0x8] sm:$0xff]  }
 0x3ba   : > { %v2124_v1 = vpack.c.bf16 %v2120_v7, %v2117_v3  ;;  %v2049_v19 = vpack.c.bf16 %v2045_v5, %v2042_v2  ;;  %v6982_v2 = vld [vmem:[%s8566_s9 + $0xb0] sm:$0xff]   ;;  %v6983_v3 = vld [vmem:[%s8566_s9 + $0x48] sm:$0xff]   ;;  %v6987_v7 = vld [vmem:[%s8566_s9 + $0x40] sm:$0xff]  }
 0x3bb   : > { %v6632_v8 = vpop.f32.mrf.mxu1  ;;  %v6644_v9 = vpop.f32.mrf.mxu0  ;;  %v6986_v5 = vld [vmem:[%s8566_s9 + $0xa8] sm:$0xff]  }
 0x3bc   : > { %v6988_v8 = vld [vmem:[%s8566_s9 + $0xe0] sm:$0xff]  }
 0x3bd   : > { %v6989_v9 = vld [vmem:[%s8566_s9] sm:$0xff]  }
 0x3c5   : > { %v2192_v10 = vpop.f32.mrf.mxu1  ;;  %v2267_v11 = vpop.f32.mrf.mxu0 }
 0x3c7   : > { %v6655_v59 = vpop.f32.mrf.mxu1  ;;  %v6667_v63 = vpop.f32.mrf.mxu0 }
 0x3c8   : > { %v6992_v59 = vld [vmem:[%s8566_s9 + $0x178] sm:$0xff]  }
 0x3c9   : > { %v2195_v12 = vpop.f32.mrf.mxu1  ;;  %v2270_v13 = vpop.f32.mrf.mxu0  ;;  %v6993_v63 = vld [vmem:[%s8566_s9 + $0x98] sm:$0xff]  }
 0x3ca   : > { %v2274_v15 = vpack.c.bf16 %v2270_v13, %v2267_v11  ;;  %v2199_v61 = vpack.c.bf16 %v2195_v12, %v2192_v10  ;;  %v6990_v10 = vld [vmem:[%s8566_s9 + $0xa0] sm:$0xff]   ;;  %v6991_v11 = vld [vmem:[%s8566_s9 + $0xd8] sm:$0xff]   ;;  %v6995_v12 = vld [vmem:[%s8566_s9 + $0xd0] sm:$0xff]  }
 0x3cb   : > { %v6656_v16 = vpop.f32.mrf.mxu1  ;;  %v6668_v17 = vpop.f32.mrf.mxu0  ;;  %v6997_v13 = vld [vmem:[%s8566_s9 + $0x90] sm:$0xff]  }
 0x3cc   : > { %2373 = vmatpush1.bf16.msra.mxu0 %v2274_v15  ;;  %v6999_v15 = vld [vmem:[%s8566_s9 + $0xc8] sm:$0xff]   ;;  %v7003_v17 = vld [vmem:[%s8566_s9 + $0xc0] sm:$0xff]  }
 0x3cd   : > { %2374 = vmatprep.subr.bf16.mxu0 %v7215_v30  ;;  %v7001_v16 = vld [vmem:[%s8566_s9 + $0x88] sm:$0xff]  }
 0x3d0   : > { %2375 = vmatpush1.bf16.msra.mxu0 %v2199_v61  ;;  %v7005_v61 = vld [vmem:[%s8566_s9 + $0x80] sm:$0xff]  }
 0x3d1   : > { %2376 = vmatprep.subr.bf16.mxu0 %v7215_v30 }
 0x3d4   : > { %2377 = vmatpush1.bf16.msra.mxu0 %v2124_v1  ;;  %v7008_v1 = vld [vmem:[%s8566_s9 + $0x1f8] sm:$0xff]  }
 0x3d5   : > { %v2342_v18 = vpop.f32.mrf.mxu1  ;;  %2378 = vmatprep.subr.bf16.mxu0 %v7215_v30 }
 0x3d7   : > { %v6679_v20 = vpop.f32.mrf.mxu1 }
 0x3d8   : > { %2379 = vmatpush1.bf16.msra.mxu0 %v2049_v19 }
 0x3d9   : > { %v2345_v21 = vpop.f32.mrf.mxu1  ;;  %2380 = vmatprep.subr.bf16.mxu0 %v7215_v30 }
 0x3da   : > { %v2349_v25 = vpack.c.bf16 %v2345_v21, %v2342_v18 }
 0x3db   : > { %v6680_v23 = vpop.f32.mrf.mxu1 }
 0x3dc   : > { %2381 = vmatpush1.bf16.msra.mxu0 %v1974_v22 }
 0x3dd   : > { %2382 = vmatprep.subr.bf16.mxu0 %v7215_v30 }
 0x3e0   : > { %2383 = vmatpush1.bf16.msra.mxu0 %v1899_v24 }
 0x3e1   : > { %2384 = vmatprep.subr.bf16.mxu0 %v7215_v30 }
 0x3e4   : > { %2385 = vmatpush1.bf16.msra.mxu0 %v1824_v51  ;;  %v6970_v51 = vld [vmem:[%s8566_s9 + $0x30] sm:$0xff]  }
 0x3e5   : > { %2386 = vmatprep.subr.bf16.mxu0 %v7215_v30 }
 0x3e8   : > { %2387 = vmatpush1.bf16.msra.mxu0 %v1749_v50  ;;  %v6969_v50 = vld [vmem:[%s8566_s9 + $0x70] sm:$0xff]  }
 0x3e9   : > { %2402 = vmatprep.subr.bf16.mxu0 %v7215_v30 }
 0x3ec   : > { %2403 = vmatpush2.bf16.msra.mxu0 %v2349_v25 }
 0x3ed   : > { %6705 = vmatprep.subr.bf16.mxu0 %v7213_v14 }
 0x3ef   : > { %2405 = vmatmul.mubr.bf16.vlgmr.msra.gmra.mxu0 %v6957_v26 }
 0x3f0   : > { %6707 = vmatprep.mubr.msk.bf16.mxu0 %vm7214_vm4, %v7213_v14 }
 0x4af   : > { %v2406_v28 = vpop.f32.mrf.mxu0 }
 0x4b0   : > { %v2407_v32 = vadd.f32 %v5741_v27, %v2406_v28 }
 0x4b1   : > { %v2408_v29 = vpop.f32.mrf.mxu0 }
 0x4b2   : > { %v2413_v34 = vmax.f32 %v2407_v32, 0.0 }
 0x4b3   : > { %v2409_v35 = vpop.f32.mrf.mxu0 }
 0x4b4   : > { %v2410_v38 = vadd.f32 %v5741_v27, %v2409_v35 }
 0x4b5   : > { %v2411_v31 = vpop.f32.mrf.mxu0 }
 0x4b6   : > { %v2414_v37 = vmax.f32 %v2410_v38, 0.0  ;;  %v6994_v31 = vld [vmem:[%s8566_s9 + $0x138] sm:$0xff]  }
 0x4b8   : > { %v2415_v40 = vpack.c.bf16 %v2414_v37, %v2413_v34 }
 0x4ba   : > { %6682 = vmatpush3.bf16.msra.mxu1 %v2415_v40  ;;  %6706 = vmatpush3.bf16.msra.mxu0 %v2415_v40 }
 0x4bb   : > { %6687 = vmatprep.subr.bf16.mxu1 %v7213_v14  ;;  %6717 = vmatprep.subr.bf16.mxu0 %v7213_v14 }
 0x4bd   : > { %6684 = vmatmul.mubr.msk.bf16.vlgmr.msra.gmra.mxu1 %vm2368_vm6, %v6958_v41  ;;  %6708 = vmatmul.mubr.msk.bf16.vlgmr.msra.gmra.mxu0 %vm2368_vm6, %v6959_v42 }
 0x4be   : > { %6688 = vmatpush3.bf16.msra.mxu1 %v2415_v40  ;;  %6718 = vmatpush3.bf16.msra.mxu0 %v2415_v40 }
 0x4bf   : > { %6689 = vmatprep.mubr.msk.bf16.mxu1 %vm7214_vm4, %v7213_v14  ;;  %6693 = vmatprep.subr.bf16.mxu1 %v7213_v14 }
 0x4c0   : > { %6719 = vmatprep.mubr.msk.bf16.mxu0 %vm7214_vm4, %v7213_v14  ;;  %6729 = vmatprep.subr.bf16.mxu0 %v7213_v14 }
 0x4c5   : > { %6690 = vmatmul.mubr.msk.bf16.vlgmr.msra.gmra.mxu1 %vm2368_vm6, %v6960_v43  ;;  %6720 = vmatmul.mubr.msk.bf16.vlgmr.msra.gmra.mxu0 %vm2368_vm6, %v6961_v44  ;;  %v6998_v44 = vld [vmem:[%s8566_s9 + $0x130] sm:$0xff]  }
 0x4c6   : > { %6694 = vmatpush3.bf16.msra.mxu1 %v2415_v40  ;;  %6730 = vmatpush3.bf16.msra.mxu0 %v2415_v40 }
 0x4c7   : > { %6695 = vmatprep.mubr.msk.bf16.mxu1 %vm7214_vm4, %v7213_v14  ;;  %6699 = vmatprep.subr.bf16.mxu1 %v7213_v14 }
 0x4c8   : > { %6731 = vmatprep.mubr.msk.bf16.mxu0 %vm7214_vm4, %v7213_v14  ;;  %6318 = vmatprep.subr.bf16.mxu0 %v6976_v45 }
 0x4cd   : > { %6696 = vmatmul.mubr.msk.bf16.vlgmr.msra.gmra.mxu1 %vm2368_vm6, %v6962_v33  ;;  %6732 = vmatmul.mubr.msk.bf16.vlgmr.msra.gmra.mxu0 %vm2368_vm6, %v6966_v36  ;;  %v7000_v33 = vld [vmem:[%s8566_s9 + $0x168] sm:$0xff]  }
 0x4ce   : > { %6700 = vmatpush3.bf16.msra.mxu1 %v2415_v40  ;;  %6701 = vmatprep.mubr.msk.bf16.mxu1 %vm7214_vm4, %v7213_v14 }
 0x4cf   : > { %6711 = vmatprep.subr.bf16.mxu1 %v7213_v14  ;;  %6319 = vmatpush3.bf16.msra.mxu0 %v6978_v58  ;;  %v7010_v58 = vld [vmem:[%s8566_s9 + $0x1b8] sm:$0xff]  }
 0x4d0   : > { %6320 = vmatprep.subr.bf16.mxu0 %v6980_v62  ;;  %v7011_v62 = vld [vmem:[%s8566_s9 + $0x150] sm:$0xff]  }
 0x4d3   : > { %6321 = vmatpush3.bf16.msra.mxu0 %v6982_v2 }
 0x4d4   : > { %6322 = vmatprep.subr.bf16.mxu0 %v6984_v4  ;;  %v7013_v4 = vld [vmem:[%s8566_s9 + $0x110] sm:$0xff]  }
 0x4d5   : > { %6702 = vmatmul.mubr.msk.bf16.vlgmr.msra.gmra.mxu1 %vm2368_vm6, %v6963_v39 }
 0x4d6   : > { %6712 = vmatpush3.bf16.msra.mxu1 %v2415_v40  ;;  %6713 = vmatprep.mubr.msk.bf16.mxu1 %vm7214_vm4, %v7213_v14 }
 0x4d7   : > { %6723 = vmatprep.subr.bf16.mxu1 %v7213_v14  ;;  %6323 = vmatpush3.bf16.msra.mxu0 %v6986_v5  ;;  %v7015_v5 = vld [vmem:[%s8566_s9 + $0x148] sm:$0xff]  }
 0x4d8   : > { %6324 = vmatprep.subr.bf16.mxu0 %v6988_v8 }
 0x4db   : > { %6325 = vmatpush3.bf16.msra.mxu0 %v6990_v10  ;;  %v7017_v10 = vld [vmem:[%s8566_s9 + $0x108] sm:$0xff]  }
 0x4dc   : > { %6326 = vmatprep.subr.bf16.mxu0 %v6991_v11  ;;  %v7018_v11 = vld [vmem:[%s8566_s9 + $0x1a8] sm:$0xff]  }
 0x4dd   : > { %6714 = vmatmul.mubr.msk.bf16.vlgmr.msra.gmra.mxu1 %vm2368_vm6, %v6964_v46 }
 0x4de   : > { %6724 = vmatpush3.bf16.msra.mxu1 %v2415_v40  ;;  %6725 = vmatprep.mubr.msk.bf16.mxu1 %vm7214_vm4, %v7213_v14  ;;  %v6996_v40 = vld [vmem:[%s8566_s9 + $0x170] sm:$0xff]  }
 0x4df   : > { %6296 = vmatprep.subr.bf16.mxu1 %v6967_v47  ;;  %6327 = vmatpush3.bf16.msra.mxu0 %v6993_v63  ;;  %v7002_v47 = vld [vmem:[%s8566_s9 + $0x128] sm:$0xff]   ;;  %v7019_v63 = vld [vmem:[%s8566_s9 + $0x140] sm:$0xff]  }
 0x4e0   : > { %6328 = vmatprep.subr.bf16.mxu0 %v6995_v12  ;;  %v7020_v12 = vld [vmem:[%s8566_s9 + $0x1e0] sm:$0xff]  }
 0x4e3   : > { %6329 = vmatpush3.bf16.msra.mxu0 %v6997_v13 }
 0x4e4   : > { %6330 = vmatprep.subr.bf16.mxu0 %v6999_v15 }
 0x4e5   : > { %6726 = vmatmul.mubr.msk.bf16.vlgmr.msra.gmra.mxu1 %vm2368_vm6, %v6965_v48 }
 0x4e6   : > { %6297 = vmatpush3.bf16.msra.mxu1 %v6968_v49  ;;  %v7004_v49 = vld [vmem:[%s8566_s9 + $0x160] sm:$0xff]  }
 0x4e7   : > { %6298 = vmatprep.subr.bf16.mxu1 %v6969_v50  ;;  %6331 = vmatpush3.bf16.msra.mxu0 %v7001_v16  ;;  %v7021_v16 = vld [vmem:[%s8566_s9 + $0x100] sm:$0xff]  }
 0x4e8   : > { %6332 = vmatprep.subr.bf16.mxu0 %v7003_v17  ;;  %v7022_v17 = vld [vmem:[%s8566_s9 + $0x1a0] sm:$0xff]  }
 0x4ea   : > { %6299 = vmatpush3.bf16.msra.mxu1 %v6970_v51 }
 0x4eb   : > { %6300 = vmatprep.subr.bf16.mxu1 %v6971_v52  ;;  %6333 = vmatpush3.bf16.msra.mxu0 %v7005_v61  ;;  %v7006_v52 = vld [vmem:[%s8566_s9 + $0x120] sm:$0xff]   ;;  %v7023_v61 = vld [vmem:[%s8566_s9 + $0x1d8] sm:$0xff]  }
 0x4ec   : > { %6362 = vmatprep.subr.bf16.mxu0 %v7008_v1 }
 0x4ee   : > { %6301 = vmatpush3.bf16.msra.mxu1 %v6972_v53 }
 0x4ef   : > { %6302 = vmatprep.subr.bf16.mxu1 %v6973_v54  ;;  %v7007_v54 = vld [vmem:[%s8566_s9 + $0x158] sm:$0xff]  }
 0x4f2   : > { %6303 = vmatpush3.bf16.msra.mxu1 %v6974_v55 }
 0x4f3   : > { %6304 = vmatprep.subr.bf16.mxu1 %v6975_v56 }
 0x4f6   : > { %6305 = vmatpush3.bf16.msra.mxu1 %v6977_v57  ;;  %v7009_v57 = vld [vmem:[%s8566_s9 + $0x118] sm:$0xff]  }
 0x4f7   : > { %6306 = vmatprep.subr.bf16.mxu1 %v6979_v60 }
 0x4fa   : > { %6307 = vmatpush3.bf16.msra.mxu1 %v6981_v0  ;;  %v7012_v0 = vld [vmem:[%s8566_s9 + $0x1f0] sm:$0xff]  }
 0x4fb   : > { %6308 = vmatprep.subr.bf16.mxu1 %v6983_v3 }
 0x4fe   : > { %6309 = vmatpush3.bf16.msra.mxu1 %v6985_v6  ;;  %v7014_v6 = vld [vmem:[%s8566_s9 + $0x1b0] sm:$0xff]  }
 0x4ff   : > { %6310 = vmatprep.subr.bf16.mxu1 %v6987_v7  ;;  %v7016_v7 = vld [vmem:[%s8566_s9 + $0x1e8] sm:$0xff]  }
 0x502   : > { %6311 = vmatpush3.bf16.msra.mxu1 %v6989_v9 }
 0x503   : > { %6340 = vmatprep.subr.bf16.mxu1 %v6992_v59 }
 0x57d   : > { %v2460_v18 = vpop.f32.mrf.mxu1  ;;  %v7917_v19 = vpop.f32.mrf.mxu0 }
 0x57f   : > { %v6685_v20 = vpop.f32.mrf.mxu1  ;;  %v6709_v21 = vpop.f32.mrf.mxu0 }
 0x580   : > { %v7024_v20 = vld [vmem:[%s8566_s9 + $0x198] sm:$0xff]  }
 0x581   : > { %v2463_v22 = vpop.f32.mrf.mxu1  ;;  %v7919_v23 = vpop.f32.mrf.mxu0  ;;  %v7025_v21 = vld [vmem:[%s8566_s9 + $0x238] sm:$0xff]  }
 0x582   : > { %v2467_v34 = vpack.c.bf16 %v2463_v22, %v2460_v18 }
 0x583   : > { %v6686_v24 = vpop.f32.mrf.mxu1  ;;  %v6710_v25 = vpop.f32.mrf.mxu0 }
 0x584   : > { %v2679_v24 = vpack.c.bf16 %v7919_v23, %v7917_v19  ;;  %v7026_v25 = vld [vmem:[%s8566_s9 + $0x1d0] sm:$0xff]   ;;  %v7029_v23 = vld [vmem:[%s8566_s9 + $0x1c8] sm:$0xff]  }
 0x585   : > { %v2513_v26 = vpop.f32.mrf.mxu1  ;;  %v7921_v27 = vpop.f32.mrf.mxu0  ;;  %v7028_v19 = vld [vmem:[%s8566_s9 + $0x230] sm:$0xff]  }
 0x587   : > { %v6691_v28 = vpop.f32.mrf.mxu1  ;;  %v6721_v29 = vpop.f32.mrf.mxu0 }
 0x588   : > { %v7027_v28 = vld [vmem:[%s8566_s9 + $0x190] sm:$0xff]   ;;  %v7030_v29 = vld [vmem:[%s8566_s9 + $0x188] sm:$0xff]  }
 0x589   : > { %v2516_v32 = vpop.f32.mrf.mxu1  ;;  %v7923_v35 = vpop.f32.mrf.mxu0 }
 0x58a   : > { %v2520_v38 = vpack.c.bf16 %v2516_v32, %v2513_v26  ;;  %v7031_v32 = vld [vmem:[%s8566_s9 + $0x228] sm:$0xff]  }
 0x58b   : > { %v6692_v37 = vpop.f32.mrf.mxu1  ;;  %v6722_v41 = vpop.f32.mrf.mxu0 }
 0x58c   : > { %3507 = vmatprep.mubr.bf16.mxu1 %v2520_v38  ;;  %v7032_v38 = vld [vmem:[%s8566_s9 + $0x1c0] sm:$0xff]   ;;  %v2785_v37 = vpack.c.bf16 %v7923_v35, %v7921_v27  ;;  %v7036_v41 = vld [vmem:[%s8566_s9 + $0x210] sm:$0xff]   ;;  %v7037_v27 = vld [vmem:[%s8566_s9 + $0x208] sm:$0xff]  }
 0x58d   : > { %v2566_v42 = vpop.f32.mrf.mxu1  ;;  %3508 = vmatmul.mubr.bf16.vlgmr.msra.gmra.mxu1 %v2467_v34  ;;  %v7931_v43 = vpop.f32.mrf.mxu0  ;;  %v7034_v34 = vld [vmem:[%s8566_s9 + $0x220] sm:$0xff]  }
 0x58e   : > { %6341 = vmatpush3.bf16.msra.mxu1 %v6994_v31  ;;  %v7033_v31 = vld [vmem:[%s8566_s9 + $0x180] sm:$0xff]  }
 0x58f   : > { %v6697_v45 = vpop.f32.mrf.mxu1  ;;  %6342 = vmatprep.subr.bf16.mxu1 %v6996_v40  ;;  %v6733_v36 = vpop.f32.mrf.mxu0  ;;  %v7035_v40 = vld [vmem:[%s8566_s9 + $0x218] sm:$0xff]   ;;  %v7038_v35 = vld [vmem:[%s8566_s9 + $0x200] sm:$0xff]  }
 0x590   : > { %v7040_v45 = vld [vmem:[%s8569_s12 + $0x58] sm:$0xff]   ;;  %v7043_v36 = vld [vmem:[%s8569_s12 + $0x8] sm:$0xff]  }
 0x591   : > { %v2569_v39 = vpop.f32.mrf.mxu1  ;;  %v7939_v46 = vpop.f32.mrf.mxu0 }
 0x592   : > { %6343 = vmatpush3.bf16.msra.mxu1 %v6998_v44  ;;  %v2573_v60 = vpack.c.bf16 %v2569_v39, %v2566_v42  ;;  %v2891_v42 = vpack.c.bf16 %v7939_v46, %v7931_v43  ;;  %v7039_v44 = vld [vmem:[%s8569_s12 + $0x18] sm:$0xff]   ;;  %v7041_v43 = vld [vmem:[%s8569_s12 + $0x10] sm:$0xff]   ;;  %v7044_v39 = vld [vmem:[%s8569_s12 + $0x48] sm:$0xff]  }
 0x593   : > { %v6698_v48 = vpop.f32.mrf.mxu1  ;;  %6344 = vmatprep.subr.bf16.mxu1 %v7000_v33  ;;  %v6734_v50 = vpop.f32.mrf.mxu0  ;;  %v7042_v33 = vld [vmem:[%s8569_s12 + $0x50] sm:$0xff]   ;;  %v7045_v46 = vld [vmem:[%s8569_s12] sm:$0xff]  }
 0x595   : > { %v2619_v51 = vpop.f32.mrf.mxu1 }
 0x596   : > { %6345 = vmatpush3.bf16.msra.mxu1 %v7002_v47  ;;  %v7046_v47 = vld [vmem:[%s8569_s12 + $0x40] sm:$0xff]  }
 0x597   : > { %v6703_v53 = vpop.f32.mrf.mxu1  ;;  %6346 = vmatprep.subr.bf16.mxu1 %v7004_v49 }
 0x599   : > { %v2622_v55 = vpop.f32.mrf.mxu1 }
 0x59a   : > { %v2626_v56 = vpack.c.bf16 %v2622_v55, %v2619_v51  ;;  %6347 = vmatpush3.bf16.msra.mxu1 %v7006_v52 }
 0x59b   : > { %6348 = vmatprep.subr.bf16.mxu1 %v7007_v54  ;;  %v6704_v2 = vpop.f32.mrf.mxu1 }
 0x59c   : > { %3548 = vmatprep.mubr.bf16.mxu0 %v2626_v56  ;;  %v5779_v2 = vld [vmem:[%s8567_s10] ss:$0 sm:$0xff] }
 0x59d   : > { %3549 = vmatmul.mubr.bf16.vlgmr.msra.gmra.mxu0 %v2573_v60  ;;  %v2725_v3 = vpop.f32.mrf.mxu1 }
 0x59e   : > { %6349 = vmatpush3.bf16.msra.mxu1 %v7009_v57  ;;  %6363 = vmatpush3.bf16.msra.mxu0 %v7010_v58 }
 0x59f   : > { %6350 = vmatprep.subr.bf16.mxu1 %v7011_v62  ;;  %6364 = vmatprep.subr.bf16.mxu0 %v7012_v0  ;;  %v6715_v8 = vpop.f32.mrf.mxu1 }
 0x5a1   : > { %v2728_v9 = vpop.f32.mrf.mxu1 }
 0x5a2   : > { %6351 = vmatpush3.bf16.msra.mxu1 %v7013_v4  ;;  %6365 = vmatpush3.bf16.msra.mxu0 %v7014_v6  ;;  %v2732_v59 = vpack.c.bf16 %v2728_v9, %v2725_v3 }
 0x5a3   : > { %6352 = vmatprep.subr.bf16.mxu1 %v7015_v5  ;;  %6366 = vmatprep.subr.bf16.mxu0 %v7016_v7  ;;  %v6716_v13 = vpop.f32.mrf.mxu1 }
 0x5a4   : > { %3589 = vmatprep.mubr.bf16.mxu1 %v2732_v59 }
 0x5a5   : > { %v2831_v15 = vpop.f32.mrf.mxu1 }
 0x5a6   : > { %6353 = vmatpush3.bf16.msra.mxu1 %v7017_v10  ;;  %6367 = vmatpush3.bf16.msra.mxu0 %v7018_v11 }
 0x5a7   : > { %6354 = vmatprep.subr.bf16.mxu1 %v7019_v63  ;;  %6368 = vmatprep.subr.bf16.mxu0 %v7020_v12  ;;  %v6727_v1 = vpop.f32.mrf.mxu1 }
 0x5a9   : > { %v2834_v18 = vpop.f32.mrf.mxu1 }
 0x5aa   : > { %6355 = vmatpush3.bf16.msra.mxu1 %v7021_v16  ;;  %6369 = vmatpush3.bf16.msra.mxu0 %v7022_v17  ;;  %v2838_v22 = vpack.c.bf16 %v2834_v18, %v2831_v15 }
 0x5ab   : > { %6370 = vmatprep.subr.bf16.mxu0 %v7023_v61  ;;  %6735 = vmatprep.subr.bf16.mxu1 %v7213_v14  ;;  %v6728_v26 = vpop.f32.mrf.mxu1 }
 0x5ac   : > { %3630 = vmatprep.mubr.bf16.mxu0 %v2838_v22 }
 0x5ad   : > { %3590 = vmatmul.mubr.bf16.vlgmr.msra.gmra.mxu1 %v2679_v24 }
 0x5ae   : > { %6371 = vmatpush3.bf16.msra.mxu0 %v7024_v20  ;;  %6736 = vmatpush3.bf16.msra.mxu1 %v7025_v21 }
 0x5af   : > { %6372 = vmatprep.subr.bf16.mxu0 %v7026_v25  ;;  %6737 = vmatprep.subr.bf16.mxu1 %v7213_v14 }
 0x5b0   : > { %6751 = vmatprep.mubr.msk.bf16.mxu1 %vm7214_vm4, %v7213_v14 }
 0x5b2   : > { %6373 = vmatpush3.bf16.msra.mxu0 %v7027_v28  ;;  %6738 = vmatpush3.bf16.msra.mxu1 %v7028_v19  ;;  %v7047_v19 = vld [vmem:[%s8569_s12 + $0x38] sm:$0xff]  }
 0x5b3   : > { %6374 = vmatprep.subr.bf16.mxu0 %v7029_v23  ;;  %6739 = vmatprep.subr.bf16.mxu1 %v7213_v14  ;;  %v7048_v23 = vld [vmem:[%s8569_s12 + $0x98] sm:$0xff]  }
 0x5b6   : > { %6375 = vmatpush3.bf16.msra.mxu0 %v7030_v29  ;;  %6740 = vmatpush3.bf16.msra.mxu1 %v7031_v32  ;;  %v7049_v32 = vld [vmem:[%s8569_s12 + $0x30] sm:$0xff]  }
 0x5b7   : > { %6376 = vmatprep.subr.bf16.mxu0 %v7032_v38  ;;  %6741 = vmatprep.subr.bf16.mxu1 %v7213_v14  ;;  %v7050_v38 = vld [vmem:[%s8569_s12 + $0x90] sm:$0xff]  }
 0x5ba   : > { %6377 = vmatpush3.bf16.msra.mxu0 %v7033_v31  ;;  %6742 = vmatpush3.bf16.msra.mxu1 %v7034_v34  ;;  %v7051_v31 = vld [vmem:[%s8569_s12 + $0x28] sm:$0xff]  }
 0x5bb   : > { %6743 = vmatprep.subr.bf16.mxu1 %v7213_v14  ;;  %6755 = vmatprep.subr.bf16.mxu0 %v7213_v14  ;;  %v7052_v34 = vld [vmem:[%s8569_s12 + $0x88] sm:$0xff]  }
 0x5bd   : > { %3631 = vmatmul.mubr.bf16.vlgmr.msra.gmra.mxu0 %v2785_v37  ;;  %v7053_v37 = vld [vmem:[%s8569_s12 + $0x20] sm:$0xff]  }
 0x5be   : > { %6744 = vmatpush3.bf16.msra.mxu1 %v7035_v40  ;;  %6763 = vmatprep.mubr.msk.bf16.mxu0 %vm7214_vm4, %v7213_v14  ;;  %v7054_v40 = vld [vmem:[%s8569_s12 + $0x80] sm:$0xff]  }
 0x5bf   : > { %6745 = vmatprep.subr.bf16.mxu1 %v7213_v14  ;;  %6756 = vmatpush3.bf16.msra.mxu0 %v7039_v44  ;;  %v7059_v44 = vld [vmem:[%s8569_s12 + $0x68] sm:$0xff]  }
 0x5c0   : > { %6757 = vmatprep.subr.bf16.mxu0 %v7213_v14 }
 0x5c2   : > { %6746 = vmatpush3.bf16.msra.mxu1 %v7036_v41  ;;  %v7055_v41 = vld [vmem:[%s8569_s12 + $0x78] sm:$0xff]  }
 0x5c3   : > { %6747 = vmatprep.subr.bf16.mxu1 %v7213_v14  ;;  %6758 = vmatpush3.bf16.msra.mxu0 %v7041_v43  ;;  %v7061_v43 = vld [vmem:[%s8569_s12 + $0x60] sm:$0xff]  }
 0x5c4   : > { %6759 = vmatprep.subr.bf16.mxu0 %v7213_v14 }
 0x5c6   : > { %6748 = vmatpush3.bf16.msra.mxu1 %v7037_v27  ;;  %v7056_v27 = vld [vmem:[%s8569_s12 + $0xd8] sm:$0xff]  }
 0x5c7   : > { %6749 = vmatprep.subr.bf16.mxu1 %v7213_v14  ;;  %6760 = vmatpush3.bf16.msra.mxu0 %v7043_v36  ;;  %v7063_v36 = vld [vmem:[%s8569_s12 + $0xb8] sm:$0xff]  }
 0x5c8   : > { %6761 = vmatprep.subr.bf16.mxu0 %v7213_v14 }
 0x5ca   : > { %6750 = vmatpush3.bf16.msra.mxu1 %v7038_v35  ;;  %v7057_v35 = vld [vmem:[%s8569_s12 + $0x70] sm:$0xff]  }
 0x5cb   : > { %6779 = vmatprep.subr.bf16.mxu1 %v7213_v14  ;;  %6762 = vmatpush3.bf16.msra.mxu0 %v7045_v46  ;;  %v7065_v46 = vld [vmem:[%s8569_s12 + $0xb0] sm:$0xff]  }
 0x5cc   : > { %6767 = vmatprep.subr.bf16.mxu0 %v7213_v14 }
 0x5cd   : > { %6752 = vmatmul.mubr.bf16.vlgmr.msra.gmra.mxu1 %v2891_v42  ;;  %v7058_v42 = vld [vmem:[%s8569_s12 + $0xd0] sm:$0xff]  }
 0x5ce   : > { %6787 = vmatprep.mubr.msk.bf16.mxu1 %vm7214_vm4, %v7213_v14  ;;  %6780 = vmatpush3.bf16.msra.mxu1 %v7040_v45  ;;  %v7060_v45 = vld [vmem:[%s8569_s12 + $0xc8] sm:$0xff]  }
 0x5cf   : > { %6781 = vmatprep.subr.bf16.mxu1 %v7213_v14 }
 0x5d2   : > { %6782 = vmatpush3.bf16.msra.mxu1 %v7042_v33  ;;  %v7062_v33 = vld [vmem:[%s8569_s12 + $0xc0] sm:$0xff]  }
 0x5d3   : > { %6783 = vmatprep.subr.bf16.mxu1 %v7213_v14 }
 0x5d6   : > { %6784 = vmatpush3.bf16.msra.mxu1 %v7044_v39  ;;  %v7064_v39 = vld [vmem:[%s8569_s12 + $0x118] sm:$0xff]  }
 0x5d7   : > { %6785 = vmatprep.subr.bf16.mxu1 %v7213_v14 }
 0x5da   : > { %6786 = vmatpush3.bf16.msra.mxu1 %v7046_v47  ;;  %v7066_v47 = vld [vmem:[%s8569_s12 + $0x110] sm:$0xff]  }
 0x5db   : > { %6803 = vmatprep.subr.bf16.mxu1 %v7213_v14 }
 0x64d   : > { %v6312_v48 = vpop.f32.mrf.mxu1 }
 0x64f   : > { %v6313_v50 = vpop.f32.mrf.mxu1 }
 0x650   : > { %v6314_v0 = vadd.f32 %v6313_v50, %v6312_v48  ;;  %v7067_v48 = vld [vmem:[%s8569_s12 + $0xa8] sm:$0xff]   ;;  %v7069_v50 = vld [vmem:[%s8569_s12 + $0xa0] sm:$0xff]  }
 0x651   : > { %v6315_v52 = vpop.f32.mrf.mxu1 }
 0x652   : > { %v3510_v7 = vadd.f32 %v6314_v0, %v5779_v2 }
 0x653   : > { %v6316_v54 = vpop.f32.mrf.mxu1 }
 0x654   : > { %v6317_v4 = vadd.f32 %v6316_v54, %v6315_v52  ;;  %v7071_v52 = vld [vmem:[%s8569_s12 + $0xf8] sm:$0xff]   ;;  %v7073_v54 = vld [vmem:[%s8569_s12 + $0xe8] sm:$0xff]  }
 0x656   : > { %v3513_v11 = vadd.f32 %v6317_v4, %v5779_v2 }
 0x65d   : > { %v6334_v49 = vpop.f32.mrf.mxu0 }
 0x65f   : > { %v6335_v51 = vpop.f32.mrf.mxu0 }
 0x660   : > { %v6336_v6 = vadd.f32 %v6335_v51, %v6334_v49  ;;  %v7068_v49 = vld [vmem:[%s8569_s12 + $0x108] sm:$0xff]   ;;  %v7070_v51 = vld [vmem:[%s8569_s12 + $0x100] sm:$0xff]  }
 0x661   : > { %v6337_v53 = vpop.f32.mrf.mxu0 }
 0x662   : > { %v3551_v59 = vadd.f32 %v6336_v6, %v3510_v7 }
 0x663   : > { %v6338_v55 = vpop.f32.mrf.mxu0 }
 0x664   : > { %v6339_v8 = vadd.f32 %v6338_v55, %v6337_v53  ;;  %v7072_v53 = vld [vmem:[%s8569_s12 + $0xf0] sm:$0xff]   ;;  %v7074_v55 = vld [vmem:[%s8569_s12 + $0xe0] sm:$0xff]  }
 0x666   : > { %v3554_v13 = vadd.f32 %v6339_v8, %v3513_v11 }
 0x66d   : > { %v6356_v56 = vpop.f32.mrf.mxu1 }
 0x66f   : > { %v6357_v58 = vpop.f32.mrf.mxu1 }
 0x670   : > { %v6358_v9 = vadd.f32 %v6357_v58, %v6356_v56  ;;  %v7075_v56 = vld [vmem:[%s8571_s14 + $0x4] ss:$8 sps:$4 sm:$0xff]  }
 0x671   : > { %v6359_v62 = vpop.f32.mrf.mxu1 }
 0x672   : > { %v3592_v15 = vadd.f32 %v6358_v9, %v3551_v59 }
 0x673   : > { %v6360_v5 = vpop.f32.mrf.mxu1 }
 0x674   : > { %v6361_v63 = vadd.f32 %v6360_v5, %v6359_v62 }
 0x676   : > { %v3595_v61 = vadd.f32 %v6361_v63, %v3554_v13 }
 0x67d   : > { %v6378_v57 = vpop.f32.mrf.mxu0 }
 0x67f   : > { %v6379_v60 = vpop.f32.mrf.mxu0 }
 0x680   : > { %v6380_v12 = vadd.f32 %v6379_v60, %v6378_v57 }
 0x681   : > { %v6381_v3 = vpop.f32.mrf.mxu0 }
 0x682   : > { %v3633_v1 = vadd.f32 %v6380_v12, %v3592_v15 }
 0x683   : > { %v6382_v10 = vpop.f32.mrf.mxu0 }
 0x684   : > { %v6383_v16 = vadd.f32 %v6382_v10, %v6381_v3 }
 0x686   : > { %v3636_v21 = vadd.f32 %v6383_v16, %v3595_v61 }
 0x68d   : > { %v3673_v17 = vpop.f32.mrf.mxu1 }
 0x68e   : > { %v3674_v20 = vadd.f32 %v3673_v17, %v3633_v1 }
 0x68f   : > { %v6753_v18 = vpop.f32.mrf.mxu1 }
 0x690   : > { %v3680_v26 = vmax.f32 %v3674_v20, 0.0 }
 0x691   : > { %v3676_v22 = vpop.f32.mrf.mxu1 }
 0x692   : > { %v3677_v24 = vadd.f32 %v3676_v22, %v3636_v21 }
 0x693   : > { %v6754_v25 = vpop.f32.mrf.mxu1 }
 0x694   : > { %v3681_v28 = vmax.f32 %v3677_v24, 0.0 }
 0x696   : > { %v8106_v29 = vpack.c.bf16 %v3681_v28, %v3680_v26 }
 0x698   : > { %6764 = vmatmul.mubr.msk.bf16.vlgmr.msra.gmra.mxu0 %vm1543_vm5, %v8106_v29  ;;  %6788 = vmatmul.mubr.msk.bf16.vlgmr.msra.gmra.mxu1 %vm1543_vm5, %v8106_v29 }
 0x699   : > { %6768 = vmatpush3.bf16.msra.mxu0 %v7047_v19  ;;  %6804 = vmatpush3.bf16.msra.mxu1 %v7048_v23 }
 0x69a   : > { %6769 = vmatprep.subr.bf16.mxu0 %v7213_v14  ;;  %6805 = vmatprep.subr.bf16.mxu1 %v7213_v14 }
 0x69b   : > { %6775 = vmatprep.mubr.msk.bf16.mxu0 %vm7214_vm4, %v7213_v14  ;;  %6811 = vmatprep.mubr.msk.bf16.mxu1 %vm7214_vm4, %v7213_v14 }
 0x69d   : > { %6770 = vmatpush3.bf16.msra.mxu0 %v7049_v32  ;;  %6806 = vmatpush3.bf16.msra.mxu1 %v7050_v38 }
 0x69e   : > { %6771 = vmatprep.subr.bf16.mxu0 %v7213_v14  ;;  %6807 = vmatprep.subr.bf16.mxu1 %v7213_v14 }
 0x6a1   : > { %6772 = vmatpush3.bf16.msra.mxu0 %v7051_v31  ;;  %6808 = vmatpush3.bf16.msra.mxu1 %v7052_v34 }
 0x6a2   : > { %6773 = vmatprep.subr.bf16.mxu0 %v7213_v14  ;;  %6809 = vmatprep.subr.bf16.mxu1 %v7213_v14 }
 0x6a5   : > { %6774 = vmatpush3.bf16.msra.mxu0 %v7053_v37  ;;  %6810 = vmatpush3.bf16.msra.mxu1 %v7054_v40 }
 0x6a6   : > { %6791 = vmatprep.subr.bf16.mxu0 %v7213_v14  ;;  %6827 = vmatprep.subr.bf16.mxu1 %v7213_v14 }
 0x6a8   : > { %6776 = vmatmul.mubr.msk.bf16.vlgmr.msra.gmra.mxu0 %vm1543_vm5, %v8106_v29  ;;  %6812 = vmatmul.mubr.msk.bf16.vlgmr.msra.gmra.mxu1 %vm1543_vm5, %v8106_v29 }
 0x6a9   : > { %6792 = vmatpush3.bf16.msra.mxu0 %v7055_v41  ;;  %6828 = vmatpush3.bf16.msra.mxu1 %v7056_v27 }
 0x6aa   : > { %6793 = vmatprep.subr.bf16.mxu0 %v7213_v14  ;;  %6829 = vmatprep.subr.bf16.mxu1 %v7213_v14 }
 0x6ab   : > { %6799 = vmatprep.mubr.msk.bf16.mxu0 %vm7214_vm4, %v7213_v14  ;;  %6835 = vmatprep.mubr.msk.bf16.mxu1 %vm7214_vm4, %v7213_v14 }
 0x6ad   : > { %6794 = vmatpush3.bf16.msra.mxu0 %v7057_v35  ;;  %6830 = vmatpush3.bf16.msra.mxu1 %v7058_v42 }
 0x6ae   : > { %6795 = vmatprep.subr.bf16.mxu0 %v7213_v14  ;;  %6831 = vmatprep.subr.bf16.mxu1 %v7213_v14 }
 0x6b1   : > { %6796 = vmatpush3.bf16.msra.mxu0 %v7059_v44  ;;  %6832 = vmatpush3.bf16.msra.mxu1 %v7060_v45  ;;  %v7077_v44 = vld [vmem:[%s8571_s14] ss:$8 sps:$4 sm:$0xff]   ;;  %v7078_v45 = vld [vmem:[%s8571_s14 + $0x14] ss:$8 sps:$4 sm:$0xff]  }
 0x6b2   : > { %6797 = vmatprep.subr.bf16.mxu0 %v7213_v14  ;;  %6833 = vmatprep.subr.bf16.mxu1 %v7213_v14 }
 0x6b5   : > { %6798 = vmatpush3.bf16.msra.mxu0 %v7061_v43  ;;  %6834 = vmatpush3.bf16.msra.mxu1 %v7062_v33  ;;  %v7080_v43 = vld [vmem:[%s8571_s14 + $0x10] ss:$8 sps:$4 sm:$0xff]   ;;  %v7081_v33 = vld [vmem:[%s8571_s14 + $0x24] ss:$8 sps:$4 sm:$0xff]  }
 0x6b6   : > { %6815 = vmatprep.subr.bf16.mxu0 %v7213_v14  ;;  %6851 = vmatprep.subr.bf16.mxu1 %v7213_v14 }
 0x6b8   : > { %6800 = vmatmul.mubr.msk.bf16.vlgmr.msra.gmra.mxu0 %vm1543_vm5, %v8106_v29  ;;  %6836 = vmatmul.mubr.msk.bf16.vlgmr.msra.gmra.mxu1 %vm1543_vm5, %v8106_v29 }
 0x6b9   : > { %6816 = vmatpush3.bf16.msra.mxu0 %v7063_v36  ;;  %6852 = vmatpush3.bf16.msra.mxu1 %v7064_v39  ;;  %v7083_v36 = vld [vmem:[%s8571_s14 + $0x20] ss:$8 sps:$4 sm:$0xff]   ;;  %v7084_v39 = vld [vmem:[%s8571_s14 + $0x34] ss:$8 sps:$4 sm:$0xff]  }
 0x6ba   : > { %6817 = vmatprep.subr.bf16.mxu0 %v7213_v14  ;;  %6853 = vmatprep.subr.bf16.mxu1 %v7213_v14 }
 0x6bb   : > { %6823 = vmatprep.mubr.msk.bf16.mxu0 %vm7214_vm4, %v7213_v14  ;;  %6859 = vmatprep.mubr.msk.bf16.mxu1 %vm7214_vm4, %v7213_v14 }
 0x6bd   : > { %6818 = vmatpush3.bf16.msra.mxu0 %v7065_v46  ;;  %6854 = vmatpush3.bf16.msra.mxu1 %v7066_v47  ;;  %v7086_v46 = vld [vmem:[%s8571_s14 + $0x30] ss:$8 sps:$4 sm:$0xff]  }
 0x6be   : > { %6819 = vmatprep.subr.bf16.mxu0 %v7213_v14  ;;  %6855 = vmatprep.subr.bf16.mxu1 %v7213_v14  ;;  %v7088_v47 = vld [vmem:[%s8574_s17 + $0x30] ss:$8 sps:$4 sm:$0xff]  }
 0x6c1   : > { %6820 = vmatpush3.bf16.msra.mxu0 %v7067_v48  ;;  %6856 = vmatpush3.bf16.msra.mxu1 %v7068_v49  ;;  %v7090_v48 = vld [vmem:[%s8574_s17 + $0x34] ss:$8 sps:$4 sm:$0xff]   ;;  %v7096_v49 = vld [vmem:[%s8574_s17 + $0x24] ss:$8 sps:$4 sm:$0xff]  }
 0x6c2   : > { %6821 = vmatprep.subr.bf16.mxu0 %v7213_v14  ;;  %6857 = vmatprep.subr.bf16.mxu1 %v7213_v14 }
 0x6c5   : > { %6822 = vmatpush3.bf16.msra.mxu0 %v7069_v50  ;;  %6858 = vmatpush3.bf16.msra.mxu1 %v7070_v51  ;;  %v7094_v50 = vld [vmem:[%s8574_s17 + $0x20] ss:$8 sps:$4 sm:$0xff]   ;;  %v7102_v51 = vld [vmem:[%s8574_s17 + $0x14] ss:$8 sps:$4 sm:$0xff]  }
 0x6c6   : > { %6839 = vmatprep.subr.bf16.mxu0 %v7213_v14  ;;  %6863 = vmatprep.subr.bf16.mxu1 %v7213_v14 }
 0x6c8   : > { %6824 = vmatmul.mubr.msk.bf16.vlgmr.msra.gmra.mxu0 %vm1543_vm5, %v8106_v29  ;;  %6860 = vmatmul.mubr.msk.bf16.vlgmr.msra.gmra.mxu1 %vm1543_vm5, %v8106_v29 }
 0x6c9   : > { %6840 = vmatpush3.bf16.msra.mxu0 %v7071_v52  ;;  %6847 = vmatprep.mubr.msk.bf16.mxu0 %vm7214_vm4, %v7213_v14  ;;  %v7100_v52 = vld [vmem:[%s8574_s17 + $0x10] ss:$8 sps:$4 sm:$0xff]  }
 0x6ca   : > { %6841 = vmatprep.subr.bf16.mxu0 %v7213_v14  ;;  %6871 = vmatprep.mubr.msk.bf16.mxu1 %vm7214_vm4, %v7213_v14 }
 0x6cd   : > { %6842 = vmatpush3.bf16.msra.mxu0 %v7072_v53  ;;  %v7108_v53 = vld [vmem:[%s8574_s17 + $0x4] ss:$8 sps:$4 sm:$0xff]  }
 0x6ce   : > { %6843 = vmatprep.subr.bf16.mxu0 %v7213_v14 }
 0x6d1   : > { %6844 = vmatpush3.bf16.msra.mxu0 %v7073_v54  ;;  %v7106_v54 = vld [vmem:[%s8574_s17] ss:$8 sps:$4 sm:$0xff]  }
 0x6d2   : > { %6845 = vmatprep.subr.bf16.mxu0 %v7213_v14 }
 0x6d5   : > { %6846 = vmatpush3.bf16.msra.mxu0 %v7074_v55 }
 0x6d6   : > { %4423 = vmatprep.subr.bf16.mxu0 %v7215_v30 }
 0x6d8   : > { %6848 = vmatmul.mubr.msk.bf16.vlgmr.msra.gmra.mxu0 %vm1543_vm5, %v8106_v29 }
 0x6d9   : > { %5970 = vmatprep.mubr.msk.bf16.mxu0 %vm2368_vm6, %v7075_v56 }
 0x758   : > { %v3752_v57 = vpop.f32.mrf.mxu0  ;;  %v3902_v58 = vpop.f32.mrf.mxu1 }
 0x75a   : > { %v6765_v60 = vpop.f32.mrf.mxu0  ;;  %v6789_v62 = vpop.f32.mrf.mxu1 }
 0x75c   : > { %v3755_v0 = vpop.f32.mrf.mxu0  ;;  %v3905_v2 = vpop.f32.mrf.mxu1 }
 0x75d   : > { %v3759_v3 = vpack.c.bf16 %v3755_v0, %v3752_v57  ;;  %v3909_v4 = vpack.c.bf16 %v3905_v2, %v3902_v58 }
 0x75e   : > { %v6766_v6 = vpop.f32.mrf.mxu0  ;;  %v6790_v5 = vpop.f32.mrf.mxu1 }
 0x768   : > { %v3827_v7 = vpop.f32.mrf.mxu0  ;;  %v4052_v8 = vpop.f32.mrf.mxu1 }
 0x76a   : > { %v6777_v9 = vpop.f32.mrf.mxu0  ;;  %v6813_v10 = vpop.f32.mrf.mxu1 }
 0x76c   : > { %v3830_v11 = vpop.f32.mrf.mxu0  ;;  %v4055_v59 = vpop.f32.mrf.mxu1 }
 0x76d   : > { %v3834_v63 = vpack.c.bf16 %v3830_v11, %v3827_v7  ;;  %v4059_v27 = vpack.c.bf16 %v4055_v59, %v4052_v8  ;;  %v5961_v8 = vld [vmem:[%s8570_s13] ss:$0 sm:$0xff] }
 0x76e   : > { %v6778_v12 = vpop.f32.mrf.mxu0  ;;  %v6814_v13 = vpop.f32.mrf.mxu1 }
 0x778   : > { %v3977_v15 = vpop.f32.mrf.mxu0  ;;  %v4202_v16 = vpop.f32.mrf.mxu1 }
 0x77a   : > { %v6801_v17 = vpop.f32.mrf.mxu0  ;;  %v6837_v61 = vpop.f32.mrf.mxu1 }
 0x77c   : > { %v3980_v1 = vpop.f32.mrf.mxu0  ;;  %v4205_v18 = vpop.f32.mrf.mxu1 }
 0x77d   : > { %v4209_v40 = vpack.c.bf16 %v4205_v18, %v4202_v16  ;;  %v3984_v35 = vpack.c.bf16 %v3980_v1, %v3977_v15 }
 0x77e   : > { %v6802_v20 = vpop.f32.mrf.mxu0  ;;  %v6838_v21 = vpop.f32.mrf.mxu1 }
 0x788   : > { %v4127_v22 = vpop.f32.mrf.mxu0  ;;  %v4352_v24 = vpop.f32.mrf.mxu1 }
 0x78a   : > { %v6825_v25 = vpop.f32.mrf.mxu0  ;;  %v6861_v26 = vpop.f32.mrf.mxu1 }
 0x78c   : > { %v4130_v28 = vpop.f32.mrf.mxu0  ;;  %v4355_v19 = vpop.f32.mrf.mxu1 }
 0x78d   : > { %v4134_v41 = vpack.c.bf16 %v4130_v28, %v4127_v22  ;;  %v4359_v42 = vpack.c.bf16 %v4355_v19, %v4352_v24 }
 0x78e   : > { %v6826_v23 = vpop.f32.mrf.mxu0  ;;  %v6862_v29 = vpop.f32.mrf.mxu1 }
 0x798   : > { %v4277_v32 = vpop.f32.mrf.mxu0 }
 0x79a   : > { %v6849_v38 = vpop.f32.mrf.mxu0 }
 0x79c   : > { %v4280_v31 = vpop.f32.mrf.mxu0 }
 0x79d   : > { %v4284_v34 = vpack.c.bf16 %v4280_v31, %v4277_v32 }
 0x79e   : > { %v6850_v37 = vpop.f32.mrf.mxu0 }
 0x79f   : > { %4424 = vmatpush1.bf16.msra.mxu0 %v4284_v34  ;;  %v7093_v34 = vld [vmem:[%s8574_s17 + $0x74] ss:$8 sps:$4 sm:$0xff]  }
 0x7a0   : > { %4425 = vmatprep.subr.bf16.mxu0 %v7215_v30 }
 0x7a3   : > { %4426 = vmatpush1.bf16.msra.mxu0 %v4209_v40  ;;  %v7087_v40 = vld [vmem:[%s8572_s15] sm:$0x1f]  }
 0x7a4   : > { %4427 = vmatprep.subr.bf16.mxu0 %v7215_v30 }
 0x7a7   : > { %4428 = vmatpush1.bf16.msra.mxu0 %v4134_v41  ;;  %v7091_v41 = vld [vmem:[%s8574_s17 + $0x70] ss:$8 sps:$4 sm:$0xff]  }
 0x7a8   : > { %4429 = vmatprep.subr.bf16.mxu0 %v7215_v30 }
 0x7ab   : > { %4430 = vmatpush1.bf16.msra.mxu0 %v4059_v27  ;;  %v7097_v27 = vld [vmem:[%s8574_s17 + $0x60] ss:$8 sps:$4 sm:$0xff]  }
 0x7ac   : > { %4431 = vmatprep.subr.bf16.mxu0 %v7215_v30 }
 0x7af   : > { %4432 = vmatpush1.bf16.msra.mxu0 %v3984_v35  ;;  %v7105_v35 = vld [vmem:[%s8574_s17 + $0x54] ss:$8 sps:$4 sm:$0xff]  }
 0x7b0   : > { %4433 = vmatprep.subr.bf16.mxu0 %v7215_v30 }
 0x7b3   : > { %4434 = vmatpush1.bf16.msra.mxu0 %v3909_v4 }
 0x7b4   : > { %4435 = vmatprep.subr.bf16.mxu0 %v7215_v30 }
 0x7b7   : > { %4436 = vmatpush1.bf16.msra.mxu0 %v3834_v63 }
 0x7b8   : > { %4437 = vmatprep.subr.bf16.mxu0 %v7215_v30 }
 0x7bb   : > { %4438 = vmatpush1.bf16.msra.mxu0 %v3759_v3 }
 0x7bc   : > { %4453 = vmatprep.subr.bf16.mxu0 %v7215_v30 }
 0x7bf   : > { %4454 = vmatpush2.bf16.msra.mxu0 %v4359_v42  ;;  %v7103_v42 = vld [vmem:[%s8574_s17 + $0x50] ss:$8 sps:$4 sm:$0xff]  }
 0x7c0   : > { %4718 = vmatprep.subr.bf16.mxu0 %v7090_v48  ;;  %v7120_v48 = vld [vmem:[%s8574_s17 + $0xe4] ss:$8 sps:$4 sm:$0xff]  }
 0x7c2   : > { %4456 = vmatmul.mubr.bf16.vlgmr.msra.gmra.mxu0 %v7077_v44  ;;  %v7111_v44 = vld [vmem:[%s8574_s17 + $0x44] ss:$8 sps:$4 sm:$0xff]  }
 0x7c3   : > { %5971 = vmatprep.mubr.msk.bf16.mxu0 %vm2368_vm6, %v7078_v45  ;;  %4719 = vmatpush1.bf16.msra.mxu0 %v7088_v47  ;;  %v7109_v45 = vld [vmem:[%s8574_s17 + $0x40] ss:$8 sps:$4 sm:$0xff]  }
 0x7c4   : > { %4720 = vmatprep.subr.bf16.mxu0 %v7096_v49 }
 0x7c7   : > { %4721 = vmatpush1.bf16.msra.mxu0 %v7094_v50  ;;  %v7115_v50 = vld [vmem:[%s8574_s17 + $0xb0] ss:$8 sps:$4 sm:$0xff]  }
 0x7c8   : > { %4722 = vmatprep.subr.bf16.mxu0 %v7102_v51 }
 0x7ca   : > { %4464 = vmatmul.mubr.bf16.gmra.mxu0 %v7080_v43  ;;  %v7114_v43 = vld [vmem:[%s8574_s17 + $0xf4] ss:$8 sps:$4 sm:$0xff]  }
 0x7cb   : > { %5972 = vmatprep.mubr.msk.bf16.mxu0 %vm2368_vm6, %v7081_v33  ;;  %4723 = vmatpush1.bf16.msra.mxu0 %v7100_v52  ;;  %v7117_v33 = vld [vmem:[%s8574_s17 + $0xb4] ss:$8 sps:$4 sm:$0xff]   ;;  %v7123_v52 = vld [vmem:[%s8574_s17 + $0xa4] ss:$8 sps:$4 sm:$0xff]  }
 0x7cc   : > { %4724 = vmatprep.subr.bf16.mxu0 %v7108_v53 }
 0x7cf   : > { %4725 = vmatpush1.bf16.msra.mxu0 %v7106_v54  ;;  %v7118_v54 = vld [vmem:[%s8574_s17 + $0xe0] ss:$8 sps:$4 sm:$0xff]  }
 0x7d0   : > { %4909 = vmatprep.subr.bf16.mxu0 %v7114_v43  ;;  %v7189_v43 = vld [vmem:[%s8574_s17 + $0x224] ss:$8 sps:$4 sm:$0xff]  }
 0x7d2   : > { %4472 = vmatmul.mubr.bf16.gmra.mxu0 %v7083_v36  ;;  %v5424_v36 = vld [vmem:[#allocation2] sm:$0x1] }
 0x7d3   : > { %5973 = vmatprep.mubr.msk.bf16.mxu0 %vm2368_vm6, %v7084_v39  ;;  %5427 = vperm.xlu0 %6888, %v5424_v36   ;;  %v7192_v36 = vld [vmem:[%s8574_s17 + $0x214] ss:$8 sps:$4 sm:$0xff]  }
 0x7da   : > { %4480 = vmatmul.mubr.bf16.gmra.mxu0 %v7086_v46  ;;  %v7112_v46 = vld [vmem:[%s8574_s17 + $0xf0] ss:$8 sps:$4 sm:$0xff]  }
 0x7db   : > { %4742 = vmatprep.mubr.bf16.mxu0 %v7215_v30 }
 0x882   : > { %v4457_v55 = vpop.f32.mrf.mxu0 }
 0x883   : > { %v4458_v23 = vadd.f32 %v5961_v8, %v4457_v55  ;;  %v7126_v55 = vld [vmem:[%s8574_s17 + $0xd4] ss:$8 sps:$4 sm:$0xff]  }
 0x884   : > { %v4459_v56 = vpop.f32.mrf.mxu0 }
 0x885   : > { %v4488_v38 = vmax.f32 %v4458_v23, 0.0  ;;  %v7171_v23 = vld [vmem:[%s8574_s17 + $0x1a4] ss:$8 sps:$4 sm:$0xff]  }
 0x886   : > { %v4460_v57 = vpop.f32.mrf.mxu0 }
 0x887   : > { %v4461_v28 = vadd.f32 %v5961_v8, %v4460_v57  ;;  %v7121_v57 = vld [vmem:[%s8574_s17 + $0xa0] ss:$8 sps:$4 sm:$0xff]  }
 0x888   : > { %v4462_v58 = vpop.f32.mrf.mxu0 }
 0x889   : > { %v4489_v29 = vmax.f32 %v4461_v28, 0.0  ;;  %v7129_v58 = vld [vmem:[%s8574_s17 + $0x94] ss:$8 sps:$4 sm:$0xff]   ;;  %v7163_v28 = vld [vmem:[%s8574_s17 + $0x1b0] ss:$8 sps:$4 sm:$0xff]  }
 0x88a   : > { %v4465_v60 = vpop.f32.mrf.mxu0 }
 0x88b   : > { %v4466_v22 = vadd.f32 %v5961_v8, %v4465_v60  ;;  %v4496_v31 = vpack.c.bf16 %v4489_v29, %v4488_v38  ;;  %v7124_v60 = vld [vmem:[%s8574_s17 + $0xd0] ss:$8 sps:$4 sm:$0xff]   ;;  %v7166_v29 = vld [vmem:[%s8574_s17 + $0x1e0] ss:$8 sps:$4 sm:$0xff]  }
 0x88c   : > { %v4467_v62 = vpop.f32.mrf.mxu0  ;;  %v7169_v38 = vld [vmem:[%s8574_s17 + $0x1a0] ss:$8 sps:$4 sm:$0xff]  }
 0x88d   : > { %v4490_v26 = vmax.f32 %v4466_v22, 0.0  ;;  %v4511_v37 = vsel %vm735_vm3, %v4496_v31, 0  ;;  %v7132_v62 = vld [vmem:[%s8574_s17 + $0xc4] ss:$8 sps:$4 sm:$0xff]   ;;  %v7165_v22 = vld [vmem:[%s8574_s17 + $0x1b4] ss:$8 sps:$4 sm:$0xff]  }
 0x88e   : > { %v4468_v0 = vpop.f32.mrf.mxu0  ;;  %v7177_v31 = vld [vmem:[%s8574_s17 + $0x194] ss:$8 sps:$4 sm:$0xff]  }
 0x88f   : > { %v4469_v20 = vadd.f32 %v5961_v8, %v4468_v0  ;;  %v7127_v0 = vld [vmem:[%s8574_s17 + $0x90] ss:$8 sps:$4 sm:$0xff]  }
 0x890   : > { %v4470_v2 = vpop.f32.mrf.mxu0 }
 0x891   : > { %v4491_v24 = vmax.f32 %v4469_v20, 0.0  ;;  %v7135_v2 = vld [vmem:[%s8574_s17 + $0x84] ss:$8 sps:$4 sm:$0xff]   ;;  %v7162_v20 = vld [vmem:[%s8574_s17 + $0x1f4] ss:$8 sps:$4 sm:$0xff]  }
 0x892   : > { %v4473_v3 = vpop.f32.mrf.mxu0 }
 0x893   : > { %v4474_v16 = vadd.f32 %v5961_v8, %v4473_v3  ;;  %v4497_v19 = vpack.c.bf16 %v4491_v24, %v4490_v26  ;;  %v7130_v3 = vld [vmem:[%s8574_s17 + $0xc0] ss:$8 sps:$4 sm:$0xff]   ;;  %v7160_v24 = vld [vmem:[%s8574_s17 + $0x1f0] ss:$8 sps:$4 sm:$0xff]   ;;  %v7168_v26 = vld [vmem:[%s8574_s17 + $0x1e4] ss:$8 sps:$4 sm:$0xff]  }
 0x894   : > { %v4475_v4 = vpop.f32.mrf.mxu0 }
 0x895   : > { %v4492_v18 = vmax.f32 %v4474_v16, 0.0  ;;  %v4514_v32 = vsel %vm735_vm3, %v4497_v19, 0  ;;  %v7138_v4 = vld [vmem:[%s8574_s17 + $0x174] ss:$8 sps:$4 sm:$0xff]   ;;  %v7148_v16 = vld [vmem:[%s8574_s17 + $0x150] ss:$8 sps:$4 sm:$0xff]  }
 0x896   : > { %v4476_v6 = vpop.f32.mrf.mxu0 }
 0x897   : > { %v4477_v12 = vadd.f32 %v5961_v8, %v4476_v6  ;;  %v7133_v6 = vld [vmem:[%s8574_s17 + $0x80] ss:$8 sps:$4 sm:$0xff]  }
 0x898   : > { %v4478_v5 = vpop.f32.mrf.mxu0 }
 0x899   : > { %v4493_v61 = vmax.f32 %v4477_v12, 0.0  ;;  %v7141_v5 = vld [vmem:[%s8574_s17 + $0x134] ss:$8 sps:$4 sm:$0xff]  }
 0x89a   : > { %v4481_v7 = vpop.f32.mrf.mxu0  ;;  %v7150_v12 = vld [vmem:[%s8574_s17 + $0x154] ss:$8 sps:$4 sm:$0xff]  }
 0x89b   : > { %v4482_v10 = vadd.f32 %v5961_v8, %v4481_v7  ;;  %v4498_v21 = vpack.c.bf16 %v4493_v61, %v4492_v18  ;;  %v7136_v7 = vld [vmem:[%s8574_s17 + $0x170] ss:$8 sps:$4 sm:$0xff]   ;;  %v7154_v18 = vld [vmem:[%s8574_s17 + $0x140] ss:$8 sps:$4 sm:$0xff]  }
 0x89c   : > { %v4483_v9 = vpop.f32.mrf.mxu0  ;;  %v7151_v61 = vld [vmem:[%s8574_s17 + $0x110] ss:$8 sps:$4 sm:$0xff]  }
 0x89d   : > { %v4494_v13 = vmax.f32 %v4482_v10, 0.0  ;;  %v4517_v25 = vsel %vm735_vm3, %v4498_v21, 0  ;;  %v7144_v9 = vld [vmem:[%s8574_s17 + $0x164] ss:$8 sps:$4 sm:$0xff]   ;;  %v7139_v10 = vld [vmem:[%s8574_s17 + $0x130] ss:$8 sps:$4 sm:$0xff]  }
 0x89e   : > { %v4484_v11 = vpop.f32.mrf.mxu0  ;;  %v7157_v21 = vld [vmem:[%s8574_s17 + $0x100] ss:$8 sps:$4 sm:$0xff]  }
 0x89f   : > { %v4485_v59 = vadd.f32 %v5961_v8, %v4484_v11 }
 0x8a0   : > { %v4486_v63 = vpop.f32.mrf.mxu0 }
 0x8a1   : > { %v4495_v15 = vmax.f32 %v4485_v59, 0.0  ;;  %v7147_v59 = vld [vmem:[%s8574_s17 + $0x124] ss:$8 sps:$4 sm:$0xff]   ;;  %v7142_v63 = vld [vmem:[%s8574_s17 + $0x160] ss:$8 sps:$4 sm:$0xff]  }
 0x8a3   : > { %v4499_v17 = vpack.c.bf16 %v4495_v15, %v4494_v13  ;;  %v7145_v13 = vld [vmem:[%s8574_s17 + $0x120] ss:$8 sps:$4 sm:$0xff]   ;;  %v7153_v15 = vld [vmem:[%s8574_s17 + $0x114] ss:$8 sps:$4 sm:$0xff]  }
 0x8a5   : > { %v4520_v1 = vsel %vm735_vm3, %v4499_v17, 0  ;;  %v7156_v17 = vld [vmem:[%s8574_s17 + $0x144] ss:$8 sps:$4 sm:$0xff]  }
 0x8a6   : > { %6864 = vmatpush3.bf16.xpose.msra.mxu1 %v4520_v1  ;;  %v7159_v1 = vld [vmem:[%s8574_s17 + $0x104] ss:$8 sps:$4 sm:$0xff]  }
 0x8a7   : > { %6865 = vmatprep.subr.bf16.mxu1 %v7213_v14 }
 0x8ae   : > { %6866 = vmatpush3.bf16.xpose.msra.mxu1 %v4517_v25 }
 0x8af   : > { %6867 = vmatprep.subr.bf16.mxu1 %v7213_v14 }
 0x8b6   : > { %6868 = vmatpush3.bf16.xpose.msra.mxu1 %v4514_v32  ;;  %v7174_v32 = vld [vmem:[%s8574_s17 + $0x1d4] ss:$8 sps:$4 sm:$0xff]  }
 0x8b7   : > { %6869 = vmatprep.subr.bf16.mxu1 %v7213_v14  ;;  %v7099_v14 = vld [vmem:[%s8574_s17 + $0x64] ss:$8 sps:$4 sm:$0xff]  }
 0x8be   : > { %6870 = vmatpush3.bf16.xpose.msra.mxu1 %v4511_v37  ;;  %v7180_v37 = vld [vmem:[%s8574_s17 + $0x1c4] ss:$8 sps:$4 sm:$0xff]  }
 0x8bf   : > { %4635 = vmatprep.subr.bf16.mxu1 %v7093_v34  ;;  %v7172_v34 = vld [vmem:[%s8574_s17 + $0x1d0] ss:$8 sps:$4 sm:$0xff]  }
 0x8c5   : > { %6872 = vmatmul.mubr.msk.bf16.vlgmr.msra.gmra.mxu1 %vm735_vm3, %v7087_v40  ;;  %v7175_v40 = vld [vmem:[%s8574_s17 + $0x190] ss:$8 sps:$4 sm:$0xff]  }
 0x8c6   : > { %4636 = vmatpush1.bf16.msra.mxu1 %v7091_v41  ;;  %4659 = vmatprep.mubr.bf16.mxu1 %v7215_v30  ;;  %v7183_v41 = vld [vmem:[%s8574_s17 + $0x184] ss:$8 sps:$4 sm:$0xff]  }
 0x8c7   : > { %4637 = vmatprep.subr.bf16.mxu1 %v7099_v14  ;;  %v7178_v14 = vld [vmem:[%s8574_s17 + $0x1c0] ss:$8 sps:$4 sm:$0xff]  }
 0x8ca   : > { %4638 = vmatpush1.bf16.msra.mxu1 %v7097_v27  ;;  %v7181_v27 = vld [vmem:[%s8574_s17 + $0x180] ss:$8 sps:$4 sm:$0xff]  }
 0x8cb   : > { %4639 = vmatprep.subr.bf16.mxu1 %v7105_v35  ;;  %v7186_v35 = vld [vmem:[%s8574_s17 + $0x234] ss:$8 sps:$4 sm:$0xff]  }
 0x8ce   : > { %4640 = vmatpush1.bf16.msra.mxu1 %v7103_v42 }
 0x8cf   : > { %4641 = vmatprep.subr.bf16.mxu1 %v7111_v44  ;;  %v7184_v44 = vld [vmem:[%s8574_s17 + $0x230] ss:$8 sps:$4 sm:$0xff]  }
 0x8d2   : > { %4642 = vmatpush1.bf16.msra.mxu1 %v7109_v45 }
 0x8d3   : > { %4813 = vmatprep.subr.bf16.mxu1 %v7117_v33  ;;  %v7187_v33 = vld [vmem:[%s8574_s17 + $0x220] ss:$8 sps:$4 sm:$0xff]  }
 0x985   : > { %v4556_v39 = vpop.f32.mrf.mxu1 }
 0x986   : > { %v8357_v47 = vpack.c.bf16 %v4556_v39, %v4556_v39  ;;  %v7190_v39 = vld [vmem:[%s8574_s17 + $0x210] ss:$8 sps:$4 sm:$0xff]  }
 0x987   : > { %v6873_v49 = vpop.f32.mrf.mxu1 }
 0x988   : > { %v8366_v51 = vshrl.u32 %v8357_v47, 16  ;;  %6001 = vmatmul.mubr.msk.bf16.vlgmr.msra.gmra.mxu0 %vm1543_vm5, %v8357_v47  ;;  %v4761_v11 = vrot.slane %v8357_v47, 1  ;;  %v4953_v19 = vrot.slane %v8357_v47, 2  ;;  %v5145_v45 = vrot.slane %v8357_v47, 3 }
 0x989   : > { %4910 = vmatpush1.bf16.msra.mxu0 %v7112_v46  ;;  %v8373_v53 = vpop.f32.mrf.mxu1  ;;  %4933 = vmatprep.mubr.bf16.mxu0 %v7215_v30  ;;  %v7195_v46 = vld [vmem:[%s8574_s17 + $0x204] ss:$8 sps:$4 sm:$0xff]  }
 0x98a   : > { %5992 = vmatmul.mubr.msk.bf16.vlgmr.msra.gmra.mxu1 %vm1543_vm5, %v8366_v51  ;;  %4911 = vmatprep.subr.bf16.mxu0 %v7120_v48  ;;  %v4857_v8 = vrot.slane %v8366_v51, 1  ;;  %v5049_v25 = vrot.slane %v8366_v51, 2  ;;  %v5241_v42 = vrot.slane %v8366_v51, 3  ;;  %v5328_v47 = vpack.c.bf16 %v8373_v53, %v8373_v53 }
 0x98b   : > { %4814 = vmatpush1.bf16.msra.mxu1 %v7115_v50  ;;  %v6874_v56 = vpop.f32.mrf.mxu1  ;;  %4837 = vmatprep.mubr.bf16.mxu1 %v7215_v30 }
 0x98c   : > { %4815 = vmatprep.subr.bf16.mxu1 %v7123_v52 }
 0x98d   : > { %4912 = vmatpush1.bf16.msra.mxu0 %v7118_v54 }
 0x98e   : > { %4913 = vmatprep.subr.bf16.mxu0 %v7126_v55 }
 0x98f   : > { %4816 = vmatpush1.bf16.msra.mxu1 %v7121_v57 }
 0x990   : > { %4817 = vmatprep.subr.bf16.mxu1 %v7129_v58 }
 0x991   : > { %4914 = vmatpush1.bf16.msra.mxu0 %v7124_v60 }
 0x992   : > { %4915 = vmatprep.subr.bf16.mxu0 %v7132_v62 }
 0x993   : > { %4818 = vmatpush1.bf16.msra.mxu1 %v7127_v0 }
 0x994   : > { %4819 = vmatprep.subr.bf16.mxu1 %v7135_v2 }
 0x995   : > { %4916 = vmatpush1.bf16.msra.mxu0 %v7130_v3 }
 0x996   : > { %5101 = vmatprep.subr.bf16.mxu0 %v7138_v4 }
 0x997   : > { %4820 = vmatpush1.bf16.msra.mxu1 %v7133_v6 }
 0x998   : > { %6035 = vmatmul.mubr.msk.bf16.vlgmr.msra.gmra.mxu0 %vm1543_vm5, %v4857_v8  ;;  %5005 = vmatprep.subr.bf16.mxu1 %v7141_v5 }
 0x999   : > { %5102 = vmatpush1.bf16.msra.mxu0 %v7136_v7  ;;  %5125 = vmatprep.mubr.bf16.mxu0 %v7215_v30 }
 0x99a   : > { %6018 = vmatmul.mubr.msk.bf16.vlgmr.msra.gmra.mxu1 %vm1543_vm5, %v4761_v11  ;;  %5103 = vmatprep.subr.bf16.mxu0 %v7144_v9 }
 0x99b   : > { %5006 = vmatpush1.bf16.msra.mxu1 %v7139_v10  ;;  %5029 = vmatprep.mubr.bf16.mxu1 %v7215_v30 }
 0x99c   : > { %5007 = vmatprep.subr.bf16.mxu1 %v7147_v59 }
 0x99d   : > { %5104 = vmatpush1.bf16.msra.mxu0 %v7142_v63 }
 0x99e   : > { %5105 = vmatprep.subr.bf16.mxu0 %v7150_v12 }
 0x99f   : > { %5008 = vmatpush1.bf16.msra.mxu1 %v7145_v13 }
 0x9a0   : > { %5009 = vmatprep.subr.bf16.mxu1 %v7153_v15 }
 0x9a1   : > { %5106 = vmatpush1.bf16.msra.mxu0 %v7148_v16 }
 0x9a2   : > { %5107 = vmatprep.subr.bf16.mxu0 %v7156_v17 }
 0x9a3   : > { %5010 = vmatpush1.bf16.msra.mxu1 %v7151_v61 }
 0x9a4   : > { %5011 = vmatprep.subr.bf16.mxu1 %v7159_v1 }
 0x9a5   : > { %5108 = vmatpush1.bf16.msra.mxu0 %v7154_v18 }
 0x9a6   : > { %5293 = vmatprep.subr.bf16.mxu0 %v7162_v20  ;;  %v5430_v20 = vlaneseq }
 0x9a7   : > { %5012 = vmatpush1.bf16.msra.mxu1 %v7157_v21 }
 0x9a8   : > { %6069 = vmatmul.mubr.msk.bf16.vlgmr.msra.gmra.mxu0 %vm1543_vm5, %v5049_v25  ;;  %5197 = vmatprep.subr.bf16.mxu1 %v7165_v22  ;;  %vm5468_vm7 = vcmp.lt.s32.totalorder %v5430_v20, 256 }
 0x9a9   : > { %5294 = vmatpush1.bf16.msra.mxu0 %v7160_v24  ;;  %5317 = vmatprep.mubr.bf16.mxu0 %v7215_v30 }
 0x9aa   : > { %6052 = vmatmul.mubr.msk.bf16.vlgmr.msra.gmra.mxu1 %vm1543_vm5, %v4953_v19  ;;  %5295 = vmatprep.subr.bf16.mxu0 %v7168_v26  ;;  %v5431_v19 = vshrl.u32 %v5430_v20, 7 }
 0x9ab   : > { %5198 = vmatpush1.bf16.msra.mxu1 %v7163_v28  ;;  %5221 = vmatprep.mubr.bf16.mxu1 %v7215_v30 }
 0x9ac   : > { %5199 = vmatprep.subr.bf16.mxu1 %v7171_v23 }
 0x9ad   : > { %5296 = vmatpush1.bf16.msra.mxu0 %v7166_v29 }
 0x9ae   : > { %5297 = vmatprep.subr.bf16.mxu0 %v7174_v32 }
 0x9af   : > { %5200 = vmatpush1.bf16.msra.mxu1 %v7169_v38  ;;  %v5432_v38 = vsub.s32 0, %v5431_v19 }
 0x9b0   : > { %5201 = vmatprep.subr.bf16.mxu1 %v7177_v31  ;;  %v5428_v31 = vpop.permute.xlu0 %5427 }
 0x9b1   : > { %5298 = vmatpush1.bf16.msra.mxu0 %v7172_v34 }
 0x9b2   : > { %5299 = vmatprep.subr.bf16.mxu0 %v7180_v37  ;;  %v5433_v37 = vrot.slane %v5428_v31, %v5432_v38 }
 0x9b3   : > { %5202 = vmatpush1.bf16.msra.mxu1 %v7175_v40 }
 0x9b4   : > { %5203 = vmatprep.subr.bf16.mxu1 %v7183_v41 }
 0x9b5   : > { %5300 = vmatpush1.bf16.msra.mxu0 %v7178_v14 }
 0x9b7   : > { %5204 = vmatpush1.bf16.msra.mxu1 %v7181_v27 }
 0x9b8   : > { %6103 = vmatmul.mubr.msk.bf16.vlgmr.msra.gmra.mxu0 %vm1543_vm5, %v5241_v42  ;;  %5389 = vmatprep.subr.bf16.mxu1 %v7186_v35 }
 0x9ba   : > { %6086 = vmatmul.mubr.msk.bf16.vlgmr.msra.gmra.mxu1 %vm1543_vm5, %v5145_v45 }
 0x9bb   : > { %5390 = vmatpush1.bf16.msra.mxu1 %v7184_v44  ;;  %5413 = vmatprep.mubr.bf16.mxu1 %v7215_v30  ;;  %v7193_v30 = vld [vmem:[%s8574_s17 + $0x200] ss:$8 sps:$4 sm:$0xff]  }
 0x9bc   : > { %5391 = vmatprep.subr.bf16.mxu1 %v7189_v43 }
 0x9bf   : > { %5392 = vmatpush1.bf16.msra.mxu1 %v7187_v33 }
 0x9c0   : > { %5393 = vmatprep.subr.bf16.mxu1 %v7192_v36 }
 0x9c3   : > { %5394 = vmatpush1.bf16.msra.mxu1 %v7190_v39 }
 0x9c4   : > { %5395 = vmatprep.subr.bf16.mxu1 %v7195_v46 }
 0x9c7   : > { %5396 = vmatpush1.bf16.msra.mxu1 %v7193_v30 }
 0x9ca   : > { %6120 = vmatmul.mubr.msk.bf16.vlgmr.msra.gmra.mxu1 %vm1543_vm5, %v5328_v47 }
 0xa48   : > { %v4744_v48 = vpop.f32.mrf.mxu0 }
 0xa4a   : > { %v4661_v49 = vpop.f32.mrf.mxu1  ;;  %v4746_v50 = vpop.f32.mrf.mxu0 }
 0xa4b   : > { %v4745_v59 = vadd.f32 %v4744_v48, %v4661_v49  ;;  %v7216_v49 = vmov 1966171168  }
 0xa4c   : > { %v4663_v51 = vpop.f32.mrf.mxu1  ;;  %v4748_v52 = vpop.f32.mrf.mxu0 }
 0xa4d   : > { %v4747_v12 = vadd.f32 %v4746_v50, %v4663_v51  ;;  %v5452_v50 = vunpack.c.l.s4 %v7216_v49 }
 0xa4e   : > { %v4665_v54 = vpop.f32.mrf.mxu1  ;;  %v4749_v55 = vpop.f32.mrf.mxu0 }
 0xa4f   : > { %v5453_v51 = vunpack.c.0.s8 %v5452_v50 }
 0xa50   : > { %v4666_v56 = vpop.f32.mrf.mxu1 }
 0xa51   : > { %v5456_v54 = vsub.s32 %v5453_v51, %v5431_v19 }
 0xa58   : > { %v4935_v57 = vpop.f32.mrf.mxu0 }
 0xa5a   : > { %v4839_v58 = vpop.f32.mrf.mxu1  ;;  %v4937_v60 = vpop.f32.mrf.mxu0 }
 0xa5b   : > { %v4846_v13 = vadd.f32 %v4839_v58, %v4745_v59 }
 0xa5c   : > { %v4841_v62 = vpop.f32.mrf.mxu1  ;;  %v4939_v0 = vpop.f32.mrf.mxu0 }
 0xa5d   : > { %v4847_v17 = vadd.f32 %v4841_v62, %v4747_v12  ;;  %v4942_v18 = vadd.f32 %v4935_v57, %v4846_v13 }
 0xa5e   : > { %v4843_v2 = vpop.f32.mrf.mxu1  ;;  %v4940_v3 = vpop.f32.mrf.mxu0 }
 0xa5f   : > { %v4943_v25 = vadd.f32 %v4937_v60, %v4847_v17 }
 0xa60   : > { %v4844_v4 = vpop.f32.mrf.mxu1 }
 0xa68   : > { %v5127_v6 = vpop.f32.mrf.mxu0 }
 0xa6a   : > { %v5031_v53 = vpop.f32.mrf.mxu1  ;;  %v5129_v5 = vpop.f32.mrf.mxu0 }
 0xa6b   : > { %v5038_v24 = vadd.f32 %v5031_v53, %v4942_v18 }
 0xa6c   : > { %v5033_v7 = vpop.f32.mrf.mxu1  ;;  %v5131_v8 = vpop.f32.mrf.mxu0 }
 0xa6d   : > { %v5039_v28 = vadd.f32 %v5033_v7, %v4943_v25  ;;  %v5134_v23 = vadd.f32 %v5127_v6, %v5038_v24 }
 0xa6e   : > { %v5035_v9 = vpop.f32.mrf.mxu1  ;;  %v5132_v10 = vpop.f32.mrf.mxu0 }
 0xa6f   : > { %v5135_v32 = vadd.f32 %v5129_v5, %v5039_v28 }
 0xa70   : > { %v5036_v11 = vpop.f32.mrf.mxu1 }
 0xa78   : > { %v5319_v63 = vpop.f32.mrf.mxu0 }
 0xa7a   : > { %v5223_v15 = vpop.f32.mrf.mxu1  ;;  %v5321_v16 = vpop.f32.mrf.mxu0 }
 0xa7b   : > { %v5230_v29 = vadd.f32 %v5223_v15, %v5134_v23 }
 0xa7c   : > { %v5225_v61 = vpop.f32.mrf.mxu1  ;;  %v5323_v1 = vpop.f32.mrf.mxu0 }
 0xa7d   : > { %v5231_v34 = vadd.f32 %v5225_v61, %v5135_v32  ;;  %v5326_v40 = vadd.f32 %v5319_v63, %v5230_v29 }
 0xa7e   : > { %v5227_v21 = vpop.f32.mrf.mxu1  ;;  %v5324_v22 = vpop.f32.mrf.mxu0 }
 0xa7f   : > { %v5327_v27 = vadd.f32 %v5321_v16, %v5231_v34 }
 0xa80   : > { %v5228_v26 = vpop.f32.mrf.mxu1 }
 0xa8a   : > { %v5415_v41 = vpop.f32.mrf.mxu1 }
 0xa8b   : > { %v5422_v14 = vadd.f32 %v5415_v41, %v5326_v40 }
 0xa8c   : > { %v5417_v35 = vpop.f32.mrf.mxu1 }
 0xa8d   : > { %v5434_v42 = vadd.f32 %v5433_v37, %v5422_v14  ;;  %v5423_v44 = vadd.f32 %v5417_v35, %v5327_v27 }
 0xa8e   : > { %v5419_v45 = vpop.f32.mrf.mxu1 }
 0xa8f   : > { %v6121_v43 = vmul.f32 -1.442695, %v5434_v42  ;;  %v5435_v33 = vadd.f32 %v5433_v37, %v5423_v44 }
 0xa90   : > { %v5420_v36 = vpop.f32.mrf.mxu1 }
 0xa91   : > { %7196 = vpow2.f32 %v6121_v43  ;;  %v6122_v39 = vmul.f32 -1.442695, %v5435_v33 }
 0xa93   : > { %7198 = vpow2.f32 %v6122_v39 }
 0xa9e   : > { %v7197_v46 = vpop.eup %7196 }
 0xa9f   : > { %v5442_v30 = vadd.f32 1.0, %v7197_v46 }
 0xaa0   : > { %v7199_v47 = vpop.eup %7198 }
 0xaa1   : > { %v5443_v48 = vadd.f32 1.0, %v7199_v47  ;;  %7200 = vrcp.f32 %v5442_v30 }
 0xaa3   : > { %7202 = vrcp.f32 %v5443_v48 }
 0xaae   : > { %v7201_v52 = vpop.eup %7200 }
 0xab0   : > { %v7203_v55 = vpop.eup %7202 }
 0xab1   : > { %v5450_v56 = vcombine.low %v7201_v52, %v7203_v55 }
 0xab3   : > { %v5457_v57 = vrot.slane %v5450_v56, %v5456_v54 }
 0xab5   : > { %v5464_v58 = vrot.slane %v5457_v57, %v5456_v54 }
 0xab7   : > { %5470 = vst.msk [vmem:[%s577_s24] sm:$0x3] %vm5468_vm7, %v5464_v58 }
 0xab8 PF: > { %s30_s29 = sadd.s32 1, %s7210_s29  }
 0xab9   : > { %p27_p5 = scmp.ge.s32.totalorder %s30_s29, 4  }
 0xabb   :  { %29 = sbr.rel (!%p27_p5) target bundleno = 4 (0x4), region = 162 }

</bundles_post_ra>
